<compile_context>
chip_gen: v7x
topology: tpu7x:2x2x1
jax: 0.10.0
libtpu: 0.0.40
codegen_flags: <defaults>
</compile_context>

<pallas_src>
import jax
import jax.numpy as jnp
from jax.experimental import pallas as pl
from jax.experimental.pallas import tpu as pltpu

EPS = 1e-5
_LEFT = 8   # sublane offset of the conv interior inside the padded scratch
            # (8-aligned so the interior store hits whole f32 sublane tiles)


def _conv3x3(pad_ref, w_ref, hh, ww):
    """3x3 'same' conv read from the zero-padded VMEM scratch.

    pad_ref : Ref[(H+2, _LEFT+W+1, Cin) f32] -- interior at rows 1..H,
              cols _LEFT.._LEFT+W-1, zero halo around it.
    w_ref   : Ref[(9, Cin, Cout) bf16]       -- tap-major HWIO weights with the
              following BN's scale already folded into the output channels.
    returns : (H, W, Cout) f32
    """
    cin = pad_ref.shape[-1]
    cout = w_ref.shape[-1]
    p = pad_ref[...]                                  # one VMEM load, sliced 9x
    taps = []
    for kh in range(3):
        for kw in range(3):
            start = _LEFT - 1 + kw
            taps.append(
                p[kh:kh + hh, start:start + ww, :].reshape(hh * ww, cin))
    # Single batched MXU dispatch over the 9 taps: bf16 inputs, f32 accumulate.
    patch = jnp.stack(taps, axis=0).astype(jnp.bfloat16)          # (9, H*W, Cin)
    out9 = jnp.einsum("tmc,tco->tmo", patch, w_ref[...],
                      preferred_element_type=jnp.float32)          # (9, H*W, Cout)
    return jnp.sum(out9, axis=0).reshape(hh, ww, cout)


def _ibasic_block_kernel(x_ref, w1_ref, w2_ref, s1_ref, b1_ref, b2_ref,
                         alpha_ref, b3_ref, out_ref, pad_ref):
    _, hh, ww, _ = x_ref.shape

    # Zero the padded scratch so its halo is 0 for both convs.  Done every grid
    # step (a few KiB) so the kernel stays correct under "parallel"/megacore
    # grid semantics where no step ordering can be assumed.
    pad_ref[...] = jnp.zeros_like(pad_ref)

    x = x_ref[0]                                       # (H, W, Cin) f32 residual
    # bn1 (inference, folded running stats): one per-channel FMA.  The scale is
    # NOT folded into conv1 because bn1's bias must be applied before the zero
    # padding to stay exact at the image borders.
    y = x * s1_ref[0] + b1_ref[0]

    # conv1 (bn2 scale pre-folded into w1's output channels).
    pad_ref[1:hh + 1, _LEFT:_LEFT + ww, :] = y
    h = _conv3x3(pad_ref, w1_ref, hh, ww)
    # bn2 bias + PReLU (per-channel slope), f32 on the VPU.
    h = h + b2_ref[0]
    h = jnp.where(h > 0, h, alpha_ref[0] * h)

    # conv2 (bn3 scale pre-folded into w2's output channels); reuses the scratch.
    pad_ref[1:hh + 1, _LEFT:_LEFT + ww, :] = h
    h = _conv3x3(pad_ref, w2_ref, hh, ww)

    # bn3 bias + residual add.
    out_ref[0] = (h + b3_ref[0] + x).astype(out_ref.dtype)


def _fold_bn(gamma, beta, mean, var, eps=EPS):
    """Inference BatchNorm -> per-channel (scale, bias), f32."""
    s = gamma.astype(jnp.float32) / jnp.sqrt(var.astype(jnp.float32) + eps)
    b = beta.astype(jnp.float32) - mean.astype(jnp.float32) * s
    return s, b


def ibasic_block_forward(x_nchw, params):
    """IBasicBlock forward (stride=1, downsample=None).  NCHW in / NCHW out."""
    x = jnp.transpose(x_nchw, (0, 2, 3, 1)).astype(jnp.float32)    # NHWC
    B, H, W, Cin = x.shape

    s1, b1 = _fold_bn(params["bn1_g"], params["bn1_b"], params["bn1_m"], params["bn1_v"])
    s2, b2 = _fold_bn(params["bn2_g"], params["bn2_b"], params["bn2_m"], params["bn2_v"])
    s3, b3 = _fold_bn(params["bn3_g"], params["bn3_b"], params["bn3_m"], params["bn3_v"])

    def prep_w(w_oihw, out_scale):
        # OIHW -> HWIO, fold the following BN's scale into the output channels
        # (exact algebraic transform), flatten the 3x3 taps, cast bf16 for MXU.
        w = jnp.transpose(w_oihw, (2, 3, 1, 0)).astype(jnp.float32)
        w = w * out_scale[None, None, None, :]
        kh, kw, ci, co = w.shape
        return w.reshape(kh * kw, ci, co).astype(jnp.bfloat16)      # (9, Cin, Cout)

    w1 = prep_w(params["conv1_w"], s2)
    w2 = prep_w(params["conv2_w"], s3)
    Cout = w1.shape[-1]
    assert Cin == Cout, "stride-1 / no-downsample IBasicBlock needs Cin == Cout"

    vec = lambda v: v.reshape(1, -1).astype(jnp.float32)            # (1, C)
    s1v, b1v, b2v, b3v = vec(s1), vec(b1), vec(b2), vec(b3)
    alphav = vec(params["prelu_a"])

    out = pl.pallas_call(
        _ibasic_block_kernel,
        out_shape=jax.ShapeDtypeStruct((B, H, W, Cout), jnp.float32),
        grid=(B,),                                   # one image per grid step
        in_specs=[
            pl.BlockSpec((1, H, W, Cin), lambda b: (b, 0, 0, 0)),   # x
            pl.BlockSpec((9, Cin, Cout), lambda b: (0, 0, 0)),      # w1 (bf16)
            pl.BlockSpec((9, Cout, Cout), lambda b: (0, 0, 0)),     # w2 (bf16)
            pl.BlockSpec((1, Cin), lambda b: (0, 0)),               # bn1 scale
            pl.BlockSpec((1, Cin), lambda b: (0, 0)),               # bn1 bias
            pl.BlockSpec((1, Cout), lambda b: (0, 0)),              # bn2 bias
            pl.BlockSpec((1, Cout), lambda b: (0, 0)),              # prelu slope
            pl.BlockSpec((1, Cout), lambda b: (0, 0)),              # bn3 bias
        ],
        out_specs=pl.BlockSpec((1, H, W, Cout), lambda b: (b, 0, 0, 0)),
        scratch_shapes=[pltpu.VMEM((H + 2, _LEFT + W + 1, Cin), jnp.float32)],
        compiler_params=pltpu.CompilerParams(
            dimension_semantics=("parallel",),       # v7x: split batch over 2 TCs
            vmem_limit_bytes=32 * 1024 * 1024,       # explicit, ample headroom
        ),
    )(x, w1, w2, s1v, b1v, b2v, alphav, b3v)
    return jnp.transpose(out, (0, 3, 1, 2))                         # back to NCHW


def _reference_forward(x, p):
    """Pure-JAX (XLA, f32) reference of the torch forward, in NCHW."""
    def bn(t, g, b, m, v):
        g = g.reshape(1, -1, 1, 1); b = b.reshape(1, -1, 1, 1)
        m = m.reshape(1, -1, 1, 1); v = v.reshape(1, -1, 1, 1)
        return (t - m) / jnp.sqrt(v + EPS) * g + b

    def conv(t, w):
        return jax.lax.conv_general_dilated(
            t, w, window_strides=(1, 1), padding=((1, 1), (1, 1)),
            dimension_numbers=("NCHW", "OIHW", "NCHW"))

    out = bn(x, p["bn1_g"], p["bn1_b"], p["bn1_m"], p["bn1_v"])
    out = conv(out, p["conv1_w"])
    out = bn(out, p["bn2_g"], p["bn2_b"], p["bn2_m"], p["bn2_v"])
    a = p["prelu_a"].reshape(1, -1, 1, 1)
    out = jnp.where(out > 0, out, a * out)
    out = conv(out, p["conv2_w"])
    out = bn(out, p["bn3_g"], p["bn3_b"], p["bn3_m"], p["bn3_v"])
    return out + x


if __name__ == "__main__":
    key = jax.random.PRNGKey(0)
    B, Cin, H, W = 2, 4, 16, 16
    planes = 4
    keys = jax.random.split(key, 8)

    x = jax.random.normal(keys[0], (B, Cin, H, W), jnp.float32)

    def bn_params(k, c):
        k1, k2, k3, k4 = jax.random.split(k, 4)
        return (jax.random.uniform(k1, (c,), jnp.float32, 0.5, 1.5),   # gamma
                0.1 * jax.random.normal(k2, (c,), jnp.float32),        # beta
                0.1 * jax.random.normal(k3, (c,), jnp.float32),        # running_mean
                jax.random.uniform(k4, (c,), jnp.float32, 0.5, 1.5))   # running_var

    g1, be1, m1, v1 = bn_params(keys[1], Cin)
    g2, be2, m2, v2 = bn_params(keys[2], planes)
    g3, be3, m3, v3 = bn_params(keys[3], planes)

    params = dict(
        bn1_g=g1, bn1_b=be1, bn1_m=m1, bn1_v=v1,
        conv1_w=0.1 * jax.random.normal(keys[4], (planes, Cin, 3, 3), jnp.float32),
        bn2_g=g2, bn2_b=be2, bn2_m=m2, bn2_v=v2,
        prelu_a=jnp.full((planes,), 0.25, jnp.float32)
                + 0.05 * jax.random.normal(keys[5], (planes,), jnp.float32),
        conv2_w=0.1 * jax.random.normal(keys[6], (planes, planes, 3, 3), jnp.float32),
        bn3_g=g3, bn3_b=be3, bn3_m=m3, bn3_v=v3,
    )

    out = jax.block_until_ready(ibasic_block_forward(x, params))
    ref = jax.block_until_ready(_reference_forward(x, params))

    assert out.shape == (B, planes, H, W)
    err = float(jnp.max(jnp.abs(out - ref)))
    # Tolerance is loosened vs. the pure-f32 reference because the kernel feeds
    # the MXU with bf16 operands (f32 accumulation), per the perf review.
    assert jnp.allclose(out, ref, atol=5e-2, rtol=5e-2), f"max abs err = {err}"
    print("KERNEL_OK")
</pallas_src>

<mosaic_0001>
module attributes {stable_mosaic.version = 11 : i64} {
  func.func @_ibasic_block_kernel(%arg0: i32, %arg1: memref<1x16x16x4xf32, #tpu.memory_space<vmem>>, %arg2: memref<9x4x4xbf16, #tpu.memory_space<vmem>>, %arg3: memref<9x4x4xbf16, #tpu.memory_space<vmem>>, %arg4: memref<1x4xf32, #tpu.memory_space<vmem>>, %arg5: memref<1x4xf32, #tpu.memory_space<vmem>>, %arg6: memref<1x4xf32, #tpu.memory_space<vmem>>, %arg7: memref<1x4xf32, #tpu.memory_space<vmem>>, %arg8: memref<1x4xf32, #tpu.memory_space<vmem>>, %arg9: memref<1x16x16x4xf32, #tpu.memory_space<vmem>>, %arg10: memref<18x25x4xf32, #tpu.memory_space<vmem>>) attributes {dimension_semantics = [#tpu.dimension_semantics<parallel>], iteration_bounds = array<i64: 2>, scalar_prefetch = 0 : i64, scratch_operands = 1 : i64, tpu.core_type = #tpu.core_type<tc>, window_params = [{transform_indices = @transform_0, window_bounds = array<i64: 1, 16, 16, 4>}, {pipeline_mode = #tpu.pipeline_mode<synchronous>, transform_indices = @transform_1, window_bounds = array<i64: 9, 4, 4>}, {pipeline_mode = #tpu.pipeline_mode<synchronous>, transform_indices = @transform_2, window_bounds = array<i64: 9, 4, 4>}, {pipeline_mode = #tpu.pipeline_mode<synchronous>, transform_indices = @transform_3, window_bounds = array<i64: 1, 4>}, {pipeline_mode = #tpu.pipeline_mode<synchronous>, transform_indices = @transform_4, window_bounds = array<i64: 1, 4>}, {pipeline_mode = #tpu.pipeline_mode<synchronous>, transform_indices = @transform_5, window_bounds = array<i64: 1, 4>}, {pipeline_mode = #tpu.pipeline_mode<synchronous>, transform_indices = @transform_6, window_bounds = array<i64: 1, 4>}, {pipeline_mode = #tpu.pipeline_mode<synchronous>, transform_indices = @transform_7, window_bounds = array<i64: 1, 4>}, {transform_indices = @transform_8, window_bounds = array<i64: 1, 16, 16, 4>}]} {
    %cst = arith.constant 0.000000e+00 : f32
    %0 = vector.broadcast %cst : f32 to vector<18x25x4xf32>
    %c0 = arith.constant 0 : index
    %c0_0 = arith.constant 0 : index
    %c0_1 = arith.constant 0 : index
    %1 = vector.load %arg10[%c0, %c0_0, %c0_1] : memref<18x25x4xf32, #tpu.memory_space<vmem>>, vector<18x25x4xf32>
    tpu.vector_store %arg10[%c0, %c0_0, %c0_1], %0 {strides = array<i32>} : memref<18x25x4xf32, #tpu.memory_space<vmem>>, vector<18x25x4xf32>,
    %c0_2 = arith.constant 0 : index
    %c0_3 = arith.constant 0 : index
    %c0_4 = arith.constant 0 : index
    %c0_5 = arith.constant 0 : index
    %2 = vector.load %arg1[%c0_2, %c0_3, %c0_4, %c0_5] : memref<1x16x16x4xf32, #tpu.memory_space<vmem>>, vector<1x16x16x4xf32>
    %3 = vector.shape_cast %2 : vector<1x16x16x4xf32> to vector<16x16x4xf32>
    %c0_6 = arith.constant 0 : index
    %c0_7 = arith.constant 0 : index
    %4 = vector.load %arg4[%c0_6, %c0_7] : memref<1x4xf32, #tpu.memory_space<vmem>>, vector<1x4xf32>
    %5 = vector.shape_cast %4 : vector<1x4xf32> to vector<4xf32>
    %6 = vector.shape_cast %5 : vector<4xf32> to vector<1x1x4xf32>
    %7 = vector.broadcast %6 : vector<1x1x4xf32> to vector<16x16x4xf32>
    %8 = arith.mulf %3, %7 : vector<16x16x4xf32>
    %c0_8 = arith.constant 0 : index
    %c0_9 = arith.constant 0 : index
    %9 = vector.load %arg5[%c0_8, %c0_9] : memref<1x4xf32, #tpu.memory_space<vmem>>, vector<1x4xf32>
    %10 = vector.shape_cast %9 : vector<1x4xf32> to vector<4xf32>
    %11 = vector.shape_cast %10 : vector<4xf32> to vector<1x1x4xf32>
    %12 = vector.broadcast %11 : vector<1x1x4xf32> to vector<16x16x4xf32>
    %13 = arith.addf %8, %12 : vector<16x16x4xf32>
    %c1 = arith.constant 1 : index
    %c8 = arith.constant 8 : index
    %c0_10 = arith.constant 0 : index
    %14 = vector.load %arg10[%c1, %c8, %c0_10] : memref<18x25x4xf32, #tpu.memory_space<vmem>>, vector<16x16x4xf32>
    tpu.vector_store %arg10[%c1, %c8, %c0_10], %13 {strides = array<i32>} : memref<18x25x4xf32, #tpu.memory_space<vmem>>, vector<16x16x4xf32>,
    %c0_11 = arith.constant 0 : index
    %c0_12 = arith.constant 0 : index
    %c0_13 = arith.constant 0 : index
    %15 = vector.load %arg10[%c0_11, %c0_12, %c0_13] : memref<18x25x4xf32, #tpu.memory_space<vmem>>, vector<18x25x4xf32>
    %16 = vector.extract_strided_slice %15 {offsets = [0, 7, 0], sizes = [16, 16, 4], strides = [1, 1, 1]} : vector<18x25x4xf32> to vector<16x16x4xf32>
    %17 = vector.shape_cast %16 : vector<16x16x4xf32> to vector<256x4xf32>
    %18 = vector.extract_strided_slice %15 {offsets = [0, 8, 0], sizes = [16, 16, 4], strides = [1, 1, 1]} : vector<18x25x4xf32> to vector<16x16x4xf32>
    %19 = vector.shape_cast %18 : vector<16x16x4xf32> to vector<256x4xf32>
    %20 = vector.extract_strided_slice %15 {offsets = [0, 9, 0], sizes = [16, 16, 4], strides = [1, 1, 1]} : vector<18x25x4xf32> to vector<16x16x4xf32>
    %21 = vector.shape_cast %20 : vector<16x16x4xf32> to vector<256x4xf32>
    %22 = vector.extract_strided_slice %15 {offsets = [1, 7, 0], sizes = [16, 16, 4], strides = [1, 1, 1]} : vector<18x25x4xf32> to vector<16x16x4xf32>
    %23 = vector.shape_cast %22 : vector<16x16x4xf32> to vector<256x4xf32>
    %24 = vector.extract_strided_slice %15 {offsets = [1, 8, 0], sizes = [16, 16, 4], strides = [1, 1, 1]} : vector<18x25x4xf32> to vector<16x16x4xf32>
    %25 = vector.shape_cast %24 : vector<16x16x4xf32> to vector<256x4xf32>
    %26 = vector.extract_strided_slice %15 {offsets = [1, 9, 0], sizes = [16, 16, 4], strides = [1, 1, 1]} : vector<18x25x4xf32> to vector<16x16x4xf32>
    %27 = vector.shape_cast %26 : vector<16x16x4xf32> to vector<256x4xf32>
    %28 = vector.extract_strided_slice %15 {offsets = [2, 7, 0], sizes = [16, 16, 4], strides = [1, 1, 1]} : vector<18x25x4xf32> to vector<16x16x4xf32>
    %29 = vector.shape_cast %28 : vector<16x16x4xf32> to vector<256x4xf32>
    %30 = vector.extract_strided_slice %15 {offsets = [2, 8, 0], sizes = [16, 16, 4], strides = [1, 1, 1]} : vector<18x25x4xf32> to vector<16x16x4xf32>
    %31 = vector.shape_cast %30 : vector<16x16x4xf32> to vector<256x4xf32>
    %32 = vector.extract_strided_slice %15 {offsets = [2, 9, 0], sizes = [16, 16, 4], strides = [1, 1, 1]} : vector<18x25x4xf32> to vector<16x16x4xf32>
    %33 = vector.shape_cast %32 : vector<16x16x4xf32> to vector<256x4xf32>
    %34 = vector.shape_cast %17 : vector<256x4xf32> to vector<1x256x4xf32>
    %35 = vector.shape_cast %19 : vector<256x4xf32> to vector<1x256x4xf32>
    %36 = vector.shape_cast %21 : vector<256x4xf32> to vector<1x256x4xf32>
    %37 = vector.shape_cast %23 : vector<256x4xf32> to vector<1x256x4xf32>
    %38 = vector.shape_cast %25 : vector<256x4xf32> to vector<1x256x4xf32>
    %39 = vector.shape_cast %27 : vector<256x4xf32> to vector<1x256x4xf32>
    %40 = vector.shape_cast %29 : vector<256x4xf32> to vector<1x256x4xf32>
    %41 = vector.shape_cast %31 : vector<256x4xf32> to vector<1x256x4xf32>
    %42 = vector.shape_cast %33 : vector<256x4xf32> to vector<1x256x4xf32>
    %43 = tpu.concatenate %34, %35, %36, %37, %38, %39, %40, %41, %42 in 0 : vector<1x256x4xf32>, vector<1x256x4xf32>, vector<1x256x4xf32>, vector<1x256x4xf32>, vector<1x256x4xf32>, vector<1x256x4xf32>, vector<1x256x4xf32>, vector<1x256x4xf32>, vector<1x256x4xf32> -> vector<9x256x4xf32>
    %44 = arith.truncf %43 : vector<9x256x4xf32> to vector<9x256x4xbf16>
    %c0_14 = arith.constant 0 : index
    %c0_15 = arith.constant 0 : index
    %c0_16 = arith.constant 0 : index
    %45 = vector.load %arg2[%c0_14, %c0_15, %c0_16] : memref<9x4x4xbf16, #tpu.memory_space<vmem>>, vector<9x4x4xbf16>
    "tpu.trace_start"() <{level = 10 : i32, message = "tmc,tco->tmo"}> : () -> ()
    %cst_17 = arith.constant dense<0.000000e+00> : vector<9x256x4xf32>
    %46 = tpu.matmul %44, %45, %cst_17 {dimension_numbers = #tpu.dot_dimension_numbers<[2], [1], [1], [2], [0, 0, 0, 1, 1, 2], [0], [0]>} : vector<9x256x4xbf16>, vector<9x4x4xbf16>, vector<9x256x4xf32> -> vector<9x256x4xf32>
    "tpu.trace_stop"() : () -> ()
    %cst_18 = arith.constant dense<0.000000e+00> : vector<256x4xf32>
    %47 = vector.multi_reduction <add>, %46, %cst_18 [0] : vector<9x256x4xf32> to vector<256x4xf32>
    %48 = vector.shape_cast %47 : vector<256x4xf32> to vector<16x16x4xf32>
    %c0_19 = arith.constant 0 : index
    %c0_20 = arith.constant 0 : index
    %49 = vector.load %arg6[%c0_19, %c0_20] : memref<1x4xf32, #tpu.memory_space<vmem>>, vector<1x4xf32>
    %50 = vector.shape_cast %49 : vector<1x4xf32> to vector<4xf32>
    %51 = vector.shape_cast %50 : vector<4xf32> to vector<1x1x4xf32>
    %52 = vector.broadcast %51 : vector<1x1x4xf32> to vector<16x16x4xf32>
    %53 = arith.addf %48, %52 : vector<16x16x4xf32>
    %cst_21 = arith.constant 0.000000e+00 : f32
    %54 = vector.broadcast %cst_21 : f32 to vector<16x16x4xf32>
    %55 = arith.cmpf ogt, %53, %54 : vector<16x16x4xf32>
    %c0_22 = arith.constant 0 : index
    %c0_23 = arith.constant 0 : index
    %56 = vector.load %arg7[%c0_22, %c0_23] : memref<1x4xf32, #tpu.memory_space<vmem>>, vector<1x4xf32>
    %57 = vector.shape_cast %56 : vector<1x4xf32> to vector<4xf32>
    %58 = vector.shape_cast %57 : vector<4xf32> to vector<1x1x4xf32>
    %59 = vector.broadcast %58 : vector<1x1x4xf32> to vector<16x16x4xf32>
    %60 = arith.mulf %59, %53 : vector<16x16x4xf32>
    %61 = arith.select %55, %53, %60 : vector<16x16x4xi1>, vector<16x16x4xf32>
    %c1_24 = arith.constant 1 : index
    %c8_25 = arith.constant 8 : index
    %c0_26 = arith.constant 0 : index
    %62 = vector.load %arg10[%c1_24, %c8_25, %c0_26] : memref<18x25x4xf32, #tpu.memory_space<vmem>>, vector<16x16x4xf32>
    tpu.vector_store %arg10[%c1_24, %c8_25, %c0_26], %61 {strides = array<i32>} : memref<18x25x4xf32, #tpu.memory_space<vmem>>, vector<16x16x4xf32>,
    %c0_27 = arith.constant 0 : index
    %c0_28 = arith.constant 0 : index
    %c0_29 = arith.constant 0 : index
    %63 = vector.load %arg10[%c0_27, %c0_28, %c0_29] : memref<18x25x4xf32, #tpu.memory_space<vmem>>, vector<18x25x4xf32>
    %64 = vector.extract_strided_slice %63 {offsets = [0, 7, 0], sizes = [16, 16, 4], strides = [1, 1, 1]} : vector<18x25x4xf32> to vector<16x16x4xf32>
    %65 = vector.shape_cast %64 : vector<16x16x4xf32> to vector<256x4xf32>
    %66 = vector.extract_strided_slice %63 {offsets = [0, 8, 0], sizes = [16, 16, 4], strides = [1, 1, 1]} : vector<18x25x4xf32> to vector<16x16x4xf32>
    %67 = vector.shape_cast %66 : vector<16x16x4xf32> to vector<256x4xf32>
    %68 = vector.extract_strided_slice %63 {offsets = [0, 9, 0], sizes = [16, 16, 4], strides = [1, 1, 1]} : vector<18x25x4xf32> to vector<16x16x4xf32>
    %69 = vector.shape_cast %68 : vector<16x16x4xf32> to vector<256x4xf32>
    %70 = vector.extract_strided_slice %63 {offsets = [1, 7, 0], sizes = [16, 16, 4], strides = [1, 1, 1]} : vector<18x25x4xf32> to vector<16x16x4xf32>
    %71 = vector.shape_cast %70 : vector<16x16x4xf32> to vector<256x4xf32>
    %72 = vector.extract_strided_slice %63 {offsets = [1, 8, 0], sizes = [16, 16, 4], strides = [1, 1, 1]} : vector<18x25x4xf32> to vector<16x16x4xf32>
    %73 = vector.shape_cast %72 : vector<16x16x4xf32> to vector<256x4xf32>
    %74 = vector.extract_strided_slice %63 {offsets = [1, 9, 0], sizes = [16, 16, 4], strides = [1, 1, 1]} : vector<18x25x4xf32> to vector<16x16x4xf32>
    %75 = vector.shape_cast %74 : vector<16x16x4xf32> to vector<256x4xf32>
    %76 = vector.extract_strided_slice %63 {offsets = [2, 7, 0], sizes = [16, 16, 4], strides = [1, 1, 1]} : vector<18x25x4xf32> to vector<16x16x4xf32>
    %77 = vector.shape_cast %76 : vector<16x16x4xf32> to vector<256x4xf32>
    %78 = vector.extract_strided_slice %63 {offsets = [2, 8, 0], sizes = [16, 16, 4], strides = [1, 1, 1]} : vector<18x25x4xf32> to vector<16x16x4xf32>
    %79 = vector.shape_cast %78 : vector<16x16x4xf32> to vector<256x4xf32>
    %80 = vector.extract_strided_slice %63 {offsets = [2, 9, 0], sizes = [16, 16, 4], strides = [1, 1, 1]} : vector<18x25x4xf32> to vector<16x16x4xf32>
    %81 = vector.shape_cast %80 : vector<16x16x4xf32> to vector<256x4xf32>
    %82 = vector.shape_cast %65 : vector<256x4xf32> to vector<1x256x4xf32>
    %83 = vector.shape_cast %67 : vector<256x4xf32> to vector<1x256x4xf32>
    %84 = vector.shape_cast %69 : vector<256x4xf32> to vector<1x256x4xf32>
    %85 = vector.shape_cast %71 : vector<256x4xf32> to vector<1x256x4xf32>
    %86 = vector.shape_cast %73 : vector<256x4xf32> to vector<1x256x4xf32>
    %87 = vector.shape_cast %75 : vector<256x4xf32> to vector<1x256x4xf32>
    %88 = vector.shape_cast %77 : vector<256x4xf32> to vector<1x256x4xf32>
    %89 = vector.shape_cast %79 : vector<256x4xf32> to vector<1x256x4xf32>
    %90 = vector.shape_cast %81 : vector<256x4xf32> to vector<1x256x4xf32>
    %91 = tpu.concatenate %82, %83, %84, %85, %86, %87, %88, %89, %90 in 0 : vector<1x256x4xf32>, vector<1x256x4xf32>, vector<1x256x4xf32>, vector<1x256x4xf32>, vector<1x256x4xf32>, vector<1x256x4xf32>, vector<1x256x4xf32>, vector<1x256x4xf32>, vector<1x256x4xf32> -> vector<9x256x4xf32>
    %92 = arith.truncf %91 : vector<9x256x4xf32> to vector<9x256x4xbf16>
    %c0_30 = arith.constant 0 : index
    %c0_31 = arith.constant 0 : index
    %c0_32 = arith.constant 0 : index
    %93 = vector.load %arg3[%c0_30, %c0_31, %c0_32] : memref<9x4x4xbf16, #tpu.memory_space<vmem>>, vector<9x4x4xbf16>
    "tpu.trace_start"() <{level = 10 : i32, message = "tmc,tco->tmo"}> : () -> ()
    %cst_33 = arith.constant dense<0.000000e+00> : vector<9x256x4xf32>
    %94 = tpu.matmul %92, %93, %cst_33 {dimension_numbers = #tpu.dot_dimension_numbers<[2], [1], [1], [2], [0, 0, 0, 1, 1, 2], [0], [0]>} : vector<9x256x4xbf16>, vector<9x4x4xbf16>, vector<9x256x4xf32> -> vector<9x256x4xf32>
    "tpu.trace_stop"() : () -> ()
    %cst_34 = arith.constant dense<0.000000e+00> : vector<256x4xf32>
    %95 = vector.multi_reduction <add>, %94, %cst_34 [0] : vector<9x256x4xf32> to vector<256x4xf32>
    %96 = vector.shape_cast %95 : vector<256x4xf32> to vector<16x16x4xf32>
    %c0_35 = arith.constant 0 : index
    %c0_36 = arith.constant 0 : index
    %97 = vector.load %arg8[%c0_35, %c0_36] : memref<1x4xf32, #tpu.memory_space<vmem>>, vector<1x4xf32>
    %98 = vector.shape_cast %97 : vector<1x4xf32> to vector<4xf32>
    %99 = vector.shape_cast %98 : vector<4xf32> to vector<1x1x4xf32>
    %100 = vector.broadcast %99 : vector<1x1x4xf32> to vector<16x16x4xf32>
    %101 = arith.addf %96, %100 : vector<16x16x4xf32>
    %102 = arith.addf %101, %3 : vector<16x16x4xf32>
    %c0_37 = arith.constant 0 : index
    %c0_38 = arith.constant 0 : index
    %c0_39 = arith.constant 0 : index
    %c0_40 = arith.constant 0 : index
    %103 = vector.load %arg9[%c0_37, %c0_38, %c0_39, %c0_40] : memref<1x16x16x4xf32, #tpu.memory_space<vmem>>, vector<1x16x16x4xf32>
    %104 = vector.shape_cast %103 : vector<1x16x16x4xf32> to vector<16x16x4xf32>
    %105 = vector.shape_cast %102 : vector<16x16x4xf32> to vector<1x16x16x4xf32>
    tpu.vector_store %arg9[%c0_37, %c0_38, %c0_39, %c0_40], %105 {strides = array<i32>} : memref<1x16x16x4xf32, #tpu.memory_space<vmem>>, vector<1x16x16x4xf32>,
    return
  }
  func.func @transform_0(%arg0: i32) -> (i32, i32, i32, i32) {
    %c0_i32 = arith.constant 0 : i32
    %c0_i32_0 = arith.constant 0 : i32
    %c0_i32_1 = arith.constant 0 : i32
    %c0_i32_2 = arith.constant 0 : i32
    return %arg0, %c0_i32, %c0_i32_0, %c0_i32_1 : i32, i32, i32, i32
  }
  func.func @transform_1(%arg0: i32) -> (i32, i32, i32) {
    %c0_i32 = arith.constant 0 : i32
    %c0_i32_0 = arith.constant 0 : i32
    %c0_i32_1 = arith.constant 0 : i32
    %c0_i32_2 = arith.constant 0 : i32
    return %c0_i32, %c0_i32_0, %c0_i32_1 : i32, i32, i32
  }
  func.func @transform_2(%arg0: i32) -> (i32, i32, i32) {
    %c0_i32 = arith.constant 0 : i32
    %c0_i32_0 = arith.constant 0 : i32
    %c0_i32_1 = arith.constant 0 : i32
    %c0_i32_2 = arith.constant 0 : i32
    return %c0_i32, %c0_i32_0, %c0_i32_1 : i32, i32, i32
  }
  func.func @transform_3(%arg0: i32) -> (i32, i32) {
    %c0_i32 = arith.constant 0 : i32
    %c0_i32_0 = arith.constant 0 : i32
    %c0_i32_1 = arith.constant 0 : i32
    return %c0_i32, %c0_i32_0 : i32, i32
  }
  func.func @transform_4(%arg0: i32) -> (i32, i32) {
    %c0_i32 = arith.constant 0 : i32
    %c0_i32_0 = arith.constant 0 : i32
    %c0_i32_1 = arith.constant 0 : i32
    return %c0_i32, %c0_i32_0 : i32, i32
  }
  func.func @transform_5(%arg0: i32) -> (i32, i32) {
    %c0_i32 = arith.constant 0 : i32
    %c0_i32_0 = arith.constant 0 : i32
    %c0_i32_1 = arith.constant 0 : i32
    return %c0_i32, %c0_i32_0 : i32, i32
  }
  func.func @transform_6(%arg0: i32) -> (i32, i32) {
    %c0_i32 = arith.constant 0 : i32
    %c0_i32_0 = arith.constant 0 : i32
    %c0_i32_1 = arith.constant 0 : i32
    return %c0_i32, %c0_i32_0 : i32, i32
  }
  func.func @transform_7(%arg0: i32) -> (i32, i32) {
    %c0_i32 = arith.constant 0 : i32
    %c0_i32_0 = arith.constant 0 : i32
    %c0_i32_1 = arith.constant 0 : i32
    return %c0_i32, %c0_i32_0 : i32, i32
  }
  func.func @transform_8(%arg0: i32) -> (i32, i32, i32, i32) {
    %c0_i32 = arith.constant 0 : i32
    %c0_i32_0 = arith.constant 0 : i32
    %c0_i32_1 = arith.constant 0 : i32
    %c0_i32_2 = arith.constant 0 : i32
    return %arg0, %c0_i32, %c0_i32_0, %c0_i32_1 : i32, i32, i32, i32
  }
}

</mosaic_0001>

<bundles_post_ra>
// kernel: tpu_custom_call.1
= control target key start
LH: loop header
LB: loop body
LE: loop exit
PB: predicated region body
PF: predicated region fallthrough
CT: control target
= control target key end

     0   :  { %s7478_s27 = smov 0   ;;  %s11044_s0 = inlined_call_operand.vmem [shape: f32[2,16,16,4], index: 0, kind: input, shape index: {}]   ;;  %s11045_s1 = inlined_call_operand.vmem [shape: bf16[9,4,4], index: 1, kind: input, shape index: {}]   ;;  %s11046_s2 = inlined_call_operand.vmem [shape: bf16[9,4,4], index: 2, kind: input, shape index: {}]   ;;  %s11047_s3 = inlined_call_operand.vmem [shape: f32[1,4], index: 3, kind: input, shape index: {}]   ;;  %s11048_s4 = inlined_call_operand.vmem [shape: f32[1,4], index: 4, kind: input, shape index: {}]   ;;  %s11049_s5 = inlined_call_operand.vmem [shape: f32[1,4], index: 5, kind: input, shape index: {}]   ;;  %s11050_s6 = inlined_call_operand.vmem [shape: f32[1,4], index: 6, kind: input, shape index: {}]   ;;  %s11051_s7 = inlined_call_operand.vmem [shape: f32[1,4], index: 7, kind: input, shape index: {}]   ;;  %s11052_s8 = inlined_call_operand.vmem [shape: f32[2,16,16,4], index: 8, kind: output, shape index: {}]  }
   0x1 LB: > { %s6141_s28 = sadd.s32 4294967295, %s7430_s27   ;;  %p6145_p0 = scmp.ge.s32.totalorder %s7430_s27, 1  ;;  %s7430_s27 = sphi %s7478_s27, %s18_s27  }
   0x2   : > { %p262_p1 = scmp.lt.s32.totalorder %s7430_s27, 3 }
   0x4   : > { %p263_p2 = pnand %p6145_p0, %p262_p1 }
   0x6   : > { %266 = sbr.rel (%p263_p2) target bundleno = 1111 (0x457), region = 52 }
   0xd   : > { %v976_v0 = vld [vmem:[%s11045_s1] sm:$0x3]  ;;  %vm1033_vm0 = vcmask 1041408   ;;  %v977_v1 = vld [vmem:[%s11045_s1 + $0x2] sm:$0x3]  ;;  %vm307_vm1 = vcmask 31744  }
   0xe   : > { %7365 = vmatprep.subr.msk.bf16.mxu0 %vm1033_vm0, %v976_v0  ;;  %v1035_v2 = vsel %vm1033_vm0, %v976_v0, 0  ;;  %7366 = vmatprep.subr.msk.bf16.mxu1 %vm1033_vm0, %v977_v1  ;;  %v1247_v3 = vsel %vm1033_vm0, %v977_v1, 0  ;;  %v7499_v4 = vld [vmem:[%s11045_s1 + $0x4] sm:$0x3]  ;;  %v7432_v5 = vmov 0.0   ;;  %p296_p3 = scmp.lt.s32.totalorder %s6141_s28, 1 }
   0xf   : > { %6754 = vmatpush3.bf16.msra.mxu0 %v1035_v2  ;;  %6788 = vmatpush3.bf16.msra.mxu1 %v1247_v3  ;;  %308 = vst.msk [vmem:[#allocation2] sm:$0xff] %vm307_vm1, %v7432_v5  ;;  %309 = vst.msk [vmem:[#allocation2 + $0x8] sm:$0xff] %vm307_vm1, %v7432_v5  ;;  %v7616_v6 = vld [vmem:[%s11045_s1 + $0x6] sm:$0x3]  ;;  %vm311_vm2 = vcmask 24576   ;;  %vm644_vm3 = vcmask 1040384  }
  0x10   : > { %310 = vst.msk [vmem:[#allocation2 + $0x10] sm:$0xff] %vm307_vm1, %v7432_v5  ;;  %313 = vst.msk [vmem:[#allocation2 + $0x20] sm:$0xff] %vm307_vm1, %v7432_v5  ;;  %7367 = vmatprep.subr.msk.bf16.mxu0 %vm1033_vm0, %v7499_v4  ;;  %s11288_s28 = smov (!%p296_p3, %s6141_s28), 1  ;;  %7368 = vmatprep.subr.msk.bf16.mxu1 %vm1033_vm0, %v7616_v6  ;;  %v7664_v7 = vld [vmem:[%s11047_s3] ss:$0 sm:$0xff]  ;;  %v7723_v48 = vsel %vm1033_vm0, %v7499_v4, 0 }
  0x11   : > { %314 = vst.msk [vmem:[#allocation2 + $0x28] sm:$0xff] %vm307_vm1, %v7432_v5  ;;  %315 = vst.msk [vmem:[#allocation2 + $0x30] sm:$0xff] %vm307_vm1, %v7432_v5  ;;  %s6445_s15 = sshll.u32 %s11288_s28, 8  ;;  %v7676_v8 = vld [vmem:[%s11048_s4] ss:$0 sm:$0xff]  ;;  %v1626_v0 = vsel %vm1033_vm0, %v7616_v6, 0 }
  0x12   : > { %317 = vst.msk [vmem:[#allocation2 + $0x40] sm:$0xff] %vm307_vm1, %v7432_v5  ;;  %318 = vst.msk [vmem:[#allocation2 + $0x48] sm:$0xff] %vm307_vm1, %v7432_v5  ;;  %s7671_s20 = scalar_lea.vmem %s11044_s0, %s6445_s15  ;;  %vm773_vm4 = vcmask 1046528   ;;  %s10855_s23 = scalar_lea.vmem %s11052_s8, %s6445_s15 }
  0x13   : > { %319 = vst.msk [vmem:[#allocation2 + $0x50] sm:$0xff] %vm307_vm1, %v7432_v5  ;;  %321 = vst.msk [vmem:[#allocation2 + $0x60] sm:$0xff] %vm307_vm1, %v7432_v5  ;;  %v381_v9 = vld [vmem:[%s7671_s20] sm:$0xff]  ;;  %v382_v10 = vld [vmem:[%s7671_s20 + $0x8] sm:$0xff] }
  0x14   : > { %322 = vst.msk [vmem:[#allocation2 + $0x68] sm:$0xff] %vm307_vm1, %v7432_v5  ;;  %323 = vst.msk [vmem:[#allocation2 + $0x70] sm:$0xff] %vm307_vm1, %v7432_v5  ;;  %v383_v11 = vld [vmem:[%s7671_s20 + $0x10] sm:$0xff]  ;;  %v420_v15 = vmul.f32 %v7664_v7, %v381_v9  ;;  %v421_v16 = vmul.f32 %v7664_v7, %v382_v10  ;;  %v384_v21 = vld [vmem:[%s7671_s20 + $0x18] sm:$0xff] }
  0x15   : > { %325 = vst.msk [vmem:[#allocation2 + $0x80] sm:$0xff] %vm307_vm1, %v7432_v5  ;;  %326 = vst.msk [vmem:[#allocation2 + $0x88] sm:$0xff] %vm307_vm1, %v7432_v5  ;;  %v422_v17 = vmul.f32 %v7664_v7, %v383_v11  ;;  %v385_v25 = vld [vmem:[%s7671_s20 + $0x20] sm:$0xff]  ;;  %v386_v26 = vld [vmem:[%s7671_s20 + $0x28] sm:$0xff]  ;;  %v423_v29 = vmul.f32 %v7664_v7, %v384_v21 }
  0x16   : > { %327 = vst.msk [vmem:[#allocation2 + $0x90] sm:$0xff] %vm307_vm1, %v7432_v5  ;;  %329 = vst.msk [vmem:[#allocation2 + $0xa0] sm:$0xff] %vm307_vm1, %v7432_v5  ;;  %v524_v12 = vld [vmem:[#allocation2] sm:$0xff]  ;;  %v7681_v13 = vld [vmem:[#allocation2 + $0x8] sm:$0xff]  ;;  %v459_v23 = vadd.f32 %v7676_v8, %v420_v15  ;;  %v460_v24 = vadd.f32 %v7676_v8, %v421_v16  ;;  %v424_v34 = vmul.f32 %v7664_v7, %v385_v25 }
  0x17   : > { %330 = vst.msk [vmem:[#allocation2 + $0xa8] sm:$0xff] %vm307_vm1, %v7432_v5  ;;  %331 = vst.msk [vmem:[#allocation2 + $0xb0] sm:$0xff] %vm307_vm1, %v7432_v5  ;;  %v7683_v14 = vld [vmem:[#allocation2 + $0x10] sm:$0xff]  ;;  %v645_v18 = vrot.slane %v524_v12, 7  ;;  %v646_v19 = vrot.slane %v7681_v13, 7  ;;  %v388_v31 = vld [vmem:[%s7671_s20 + $0x38] sm:$0xff]  ;;  %v461_v33 = vadd.f32 %v7676_v8, %v422_v17  ;;  %v462_v37 = vadd.f32 %v7676_v8, %v423_v29 }
  0x18   : > { %333 = vst.msk [vmem:[#allocation2 + $0xc0] sm:$0xff] %vm307_vm1, %v7432_v5  ;;  %334 = vst.msk [vmem:[#allocation2 + $0xc8] sm:$0xff] %vm307_vm1, %v7432_v5  ;;  %v648_v20 = vrot.slane %v7683_v14, 7  ;;  %v938_v22 = vpack.c.bf16 %v7683_v14, %v7681_v13  ;;  %v387_v30 = vld [vmem:[%s7671_s20 + $0x30] sm:$0xff]  ;;  %v389_v35 = vld [vmem:[%s7671_s20 + $0x40] sm:$0xff]  ;;  %v425_v38 = vmul.f32 %v7664_v7, %v386_v26  ;;  %v463_v42 = vadd.f32 %v7676_v8, %v424_v34 }
  0x19   : > { %335 = vst.msk [vmem:[#allocation2 + $0xd0] sm:$0xff] %vm307_vm1, %v7432_v5  ;;  %337 = vst.msk [vmem:[#allocation2 + $0xe0] sm:$0xff] %vm307_vm1, %v7432_v5  ;;  %v647_v27 = vsel %vm644_vm3, %v645_v18, %v646_v19  ;;  %v390_v36 = vld [vmem:[%s7671_s20 + $0x48] sm:$0xff]  ;;  %v426_v39 = vmul.f32 %v7664_v7, %v387_v30  ;;  %v391_v40 = vld [vmem:[%s7671_s20 + $0x50] sm:$0xff]  ;;  %v427_v43 = vmul.f32 %v7664_v7, %v388_v31 }
  0x1a   : > { %338 = vst.msk [vmem:[#allocation2 + $0xe8] sm:$0xff] %vm307_vm1, %v7432_v5  ;;  %339 = vst.msk [vmem:[#allocation2 + $0xf0] sm:$0xff] %vm307_vm1, %v7432_v5  ;;  %v649_v28 = vsel %vm644_vm3, %v646_v19, %v648_v20  ;;  %6789 = vmatprep.mubr.msk.bf16.mxu1 %vm307_vm1, %v938_v22  ;;  %v392_v41 = vld [vmem:[%s7671_s20 + $0x58] sm:$0xff]  ;;  %v428_v44 = vmul.f32 %v7664_v7, %v389_v35  ;;  %v393_v45 = vld [vmem:[%s7671_s20 + $0x60] sm:$0xff]  ;;  %v464_v49 = vadd.f32 %v7676_v8, %v425_v38 }
  0x1b   : > { %341 = vst.msk [vmem:[#allocation2 + $0x100] sm:$0xff] %vm307_vm1, %v7432_v5  ;;  %342 = vst.msk [vmem:[#allocation2 + $0x108] sm:$0xff] %vm307_vm1, %v7432_v5  ;;  %v922_v32 = vpack.c.bf16 %v649_v28, %v647_v27  ;;  %v394_v46 = vld [vmem:[%s7671_s20 + $0x68] sm:$0xff]  ;;  %v528_v47 = vld [vmem:[#allocation2 + $0x20] sm:$0xff]  ;;  %v465_v50 = vadd.f32 %v7676_v8, %v426_v39  ;;  %v429_v51 = vmul.f32 %v7664_v7, %v390_v36 }
  0x1c   : > { %343 = vst.msk [vmem:[#allocation2 + $0x110] sm:$0xff] %vm307_vm1, %v7432_v5  ;;  %345 = vst.msk [vmem:[#allocation2 + $0x120] sm:$0xff] %vm307_vm1, %v7432_v5  ;;  %v395_v52 = vld [vmem:[%s7671_s20 + $0x70] sm:$0xff]  ;;  %v532_v53 = vld [vmem:[#allocation2 + $0x40] sm:$0xff]  ;;  %v466_v54 = vadd.f32 %v7676_v8, %v427_v43  ;;  %v467_v55 = vadd.f32 %v7676_v8, %v428_v44  ;;  %v430_v56 = vmul.f32 %v7664_v7, %v391_v40  ;;  %v650_v1 = vrot.slane %v528_v47, 7 }
  0x1d   : > { %346 = vst.msk [vmem:[#allocation2 + $0x128] sm:$0xff] %vm307_vm1, %v7432_v5  ;;  %347 = vst.msk [vmem:[#allocation2 + $0x130] sm:$0xff] %vm307_vm1, %v7432_v5  ;;  %6755 = vmatprep.mubr.msk.bf16.mxu0 %vm307_vm1, %v922_v32  ;;  %v431_v57 = vmul.f32 %v7664_v7, %v392_v41  ;;  %v396_v58 = vld [vmem:[%s7671_s20 + $0x78] sm:$0xff]  ;;  %v7737_v59 = vld [vmem:[#allocation2 + $0x60] sm:$0xff]  ;;  %v468_v61 = vadd.f32 %v7676_v8, %v429_v51  ;;  %v432_v62 = vmul.f32 %v7664_v7, %v393_v45 }
  0x1e   : > { %349 = vst.msk [vmem:[#allocation2 + $0x140] sm:$0xff] %vm307_vm1, %v7432_v5  ;;  %350 = vst.msk [vmem:[#allocation2 + $0x148] sm:$0xff] %vm307_vm1, %v7432_v5  ;;  %v7740_v60 = vld [vmem:[#allocation2 + $0x80] sm:$0xff]  ;;  %v433_v63 = vmul.f32 %v7664_v7, %v394_v46  ;;  %v469_v2 = vadd.f32 %v7676_v8, %v430_v56  ;;  %v434_v4 = vmul.f32 %v7664_v7, %v395_v52  ;;  %v655_v11 = vrot.slane %v532_v53, 7  ;;  %v398_v16 = vld [vmem:[%s7671_s20 + $0x88] sm:$0xff] }
  0x1f   : > { %351 = vst.msk [vmem:[#allocation2 + $0x150] sm:$0xff] %vm307_vm1, %v7432_v5  ;;  %353 = vst.msk [vmem:[#allocation2 + $0x160] sm:$0xff] %vm307_vm1, %v7432_v5  ;;  %v470_v3 = vadd.f32 %v7676_v8, %v431_v57  ;;  %v471_v6 = vadd.f32 %v7676_v8, %v432_v62  ;;  %v435_v15 = vmul.f32 %v7664_v7, %v396_v58  ;;  %v660_v19 = vrot.slane %v7737_v59, 7  ;;  %v7802_v36 = vld [vmem:[%s11045_s1 + $0x8] sm:$0x3]  ;;  %v544_v41 = vld [vmem:[#allocation2 + $0xa0] sm:$0xff] }
  0x20   : > { %354 = vst.msk [vmem:[#allocation2 + $0x168] sm:$0xff] %vm307_vm1, %v7432_v5  ;;  %355 = vst.msk [vmem:[#allocation2 + $0x170] sm:$0xff] %vm307_vm1, %v7432_v5  ;;  %v472_v12 = vadd.f32 %v7676_v8, %v433_v63  ;;  %v665_v20 = vrot.slane %v7740_v60, 7  ;;  %v437_v30 = vmul.f32 %v7664_v7, %v398_v16  ;;  %v670_v56 = vrot.slane %v544_v41, 7 }
  0x21   : > { %357 = vst.msk [vmem:[#allocation2 + $0x180] sm:$0xff] %vm307_vm1, %v7432_v5  ;;  %358 = vst.msk [vmem:[#allocation2 + $0x188] sm:$0xff] %vm307_vm1, %v7432_v5 }
  0x22   : > { %359 = vst.msk [vmem:[#allocation2 + $0x190] sm:$0xff] %vm307_vm1, %v7432_v5  ;;  %361 = vst.msk [vmem:[#allocation2 + $0x1a0] sm:$0xff] %vm307_vm1, %v7432_v5 }
  0x23   : > { %362 = vst.msk [vmem:[#allocation2 + $0x1a8] sm:$0xff] %vm307_vm1, %v7432_v5  ;;  %363 = vst.msk [vmem:[#allocation2 + $0x1b0] sm:$0xff] %vm307_vm1, %v7432_v5 }
  0x24   : > { %365 = vst.msk [vmem:[#allocation2 + $0x1c0] sm:$0xff] %vm307_vm1, %v7432_v5  ;;  %366 = vst.msk [vmem:[#allocation2 + $0x1c8] sm:$0xff] %vm307_vm1, %v7432_v5 }
  0x25   : > { %367 = vst.msk [vmem:[#allocation2 + $0x1d0] sm:$0xff] %vm307_vm1, %v7432_v5  ;;  %369 = vst.msk [vmem:[#allocation2 + $0x1e0] sm:$0xff] %vm307_vm1, %v7432_v5 }
  0x26   : > { %370 = vst.msk [vmem:[#allocation2 + $0x1e8] sm:$0xff] %vm307_vm1, %v7432_v5  ;;  %371 = vst.msk [vmem:[#allocation2 + $0x1f0] sm:$0xff] %vm307_vm1, %v7432_v5 }
  0x27   : > { %373 = vst.msk [vmem:[#allocation2 + $0x200] sm:$0xff] %vm307_vm1, %v7432_v5  ;;  %374 = vst.msk [vmem:[#allocation2 + $0x208] sm:$0xff] %vm307_vm1, %v7432_v5 }
  0x28   : > { %375 = vst.msk [vmem:[#allocation2 + $0x210] sm:$0xff] %vm307_vm1, %v7432_v5  ;;  %377 = vst.msk [vmem:[#allocation2 + $0x220] sm:$0xff] %vm307_vm1, %v7432_v5 }
  0x29   : > { %378 = vst.msk [vmem:[#allocation2 + $0x228] sm:$0xff] %vm307_vm1, %v7432_v5  ;;  %379 = vst.msk [vmem:[#allocation2 + $0x230] sm:$0xff] %vm307_vm1, %v7432_v5 }
  0x2a   : > { %312 = vst.msk [vmem:[#allocation2 + $0x18] sm:$0x1] %vm311_vm2, %v7432_v5  ;;  %316 = vst.msk [vmem:[#allocation2 + $0x38] sm:$0x1] %vm311_vm2, %v7432_v5 }
  0x2b   : > { %320 = vst.msk [vmem:[#allocation2 + $0x58] sm:$0x1] %vm311_vm2, %v7432_v5  ;;  %324 = vst.msk [vmem:[#allocation2 + $0x78] sm:$0x1] %vm311_vm2, %v7432_v5 }
  0x2c   : > { %328 = vst.msk [vmem:[#allocation2 + $0x98] sm:$0x1] %vm311_vm2, %v7432_v5  ;;  %332 = vst.msk [vmem:[#allocation2 + $0xb8] sm:$0x1] %vm311_vm2, %v7432_v5 }
  0x2d   : > { %336 = vst.msk [vmem:[#allocation2 + $0xd8] sm:$0x1] %vm311_vm2, %v7432_v5  ;;  %340 = vst.msk [vmem:[#allocation2 + $0xf8] sm:$0x1] %vm311_vm2, %v7432_v5 }
  0x2e   : > { %344 = vst.msk [vmem:[#allocation2 + $0x118] sm:$0x1] %vm311_vm2, %v7432_v5  ;;  %348 = vst.msk [vmem:[#allocation2 + $0x138] sm:$0x1] %vm311_vm2, %v7432_v5 }
  0x2f   : > { %352 = vst.msk [vmem:[#allocation2 + $0x158] sm:$0x1] %vm311_vm2, %v7432_v5  ;;  %356 = vst.msk [vmem:[#allocation2 + $0x178] sm:$0x1] %vm311_vm2, %v7432_v5 }
  0x30   : > { %360 = vst.msk [vmem:[#allocation2 + $0x198] sm:$0x1] %vm311_vm2, %v7432_v5  ;;  %364 = vst.msk [vmem:[#allocation2 + $0x1b8] sm:$0x1] %vm311_vm2, %v7432_v5 }
  0x31   : > { %368 = vst.msk [vmem:[#allocation2 + $0x1d8] sm:$0x1] %vm311_vm2, %v7432_v5  ;;  %372 = vst.msk [vmem:[#allocation2 + $0x1f8] sm:$0x1] %vm311_vm2, %v7432_v5 }
  0x32   : > { %376 = vst.msk [vmem:[#allocation2 + $0x218] sm:$0x1] %vm311_vm2, %v7432_v5  ;;  %380 = vst.msk [vmem:[#allocation2 + $0x238] sm:$0x1] %vm311_vm2, %v7432_v5  ;;  %v397_v5 = vld [vmem:[%s7671_s20 + $0x80] sm:$0xff] }
  0x33   : > { %492 = vst.msk [vmem:[#allocation2 + $0x28] sm:$0xff] %vm307_vm1, %v459_v23  ;;  %493 = vst.msk [vmem:[#allocation2 + $0x30] sm:$0xff] %vm307_vm1, %v460_v24  ;;  %v473_v23 = vadd.f32 %v7676_v8, %v434_v4  ;;  %v474_v24 = vadd.f32 %v7676_v8, %v435_v15  ;;  %v436_v25 = vmul.f32 %v7664_v7, %v397_v5  ;;  %v552_v4 = vld [vmem:[#allocation2 + $0xe0] sm:$0xff] }
  0x34   : > { %494 = vst.msk [vmem:[#allocation2 + $0x48] sm:$0xff] %vm307_vm1, %v461_v33  ;;  %495 = vst.msk [vmem:[#allocation2 + $0x50] sm:$0xff] %vm307_vm1, %v462_v37  ;;  %v7858_v5 = vld [vmem:[#allocation2 + $0x100] sm:$0xff] }
  0x35   : > { %496 = vst.msk [vmem:[#allocation2 + $0x68] sm:$0xff] %vm307_vm1, %v463_v42  ;;  %497 = vst.msk [vmem:[#allocation2 + $0x70] sm:$0xff] %vm307_vm1, %v464_v49  ;;  %v475_v35 = vadd.f32 %v7676_v8, %v436_v25  ;;  %v476_v42 = vadd.f32 %v7676_v8, %v437_v30  ;;  %v401_v25 = vld [vmem:[%s7671_s20 + $0xa0] sm:$0xff] }
  0x36   : > { %498 = vst.msk [vmem:[#allocation2 + $0x88] sm:$0xff] %vm307_vm1, %v465_v50  ;;  %499 = vst.msk [vmem:[#allocation2 + $0x90] sm:$0xff] %vm307_vm1, %v466_v54 }
  0x37   : > { %500 = vst.msk [vmem:[#allocation2 + $0xa8] sm:$0xff] %vm307_vm1, %v467_v55  ;;  %501 = vst.msk [vmem:[#allocation2 + $0xb0] sm:$0xff] %vm307_vm1, %v468_v61 }
  0x38   : > { %502 = vst.msk [vmem:[#allocation2 + $0xc8] sm:$0xff] %vm307_vm1, %v469_v2  ;;  %503 = vst.msk [vmem:[#allocation2 + $0xd0] sm:$0xff] %vm307_vm1, %v470_v3 }
  0x39   : > { %504 = vst.msk [vmem:[#allocation2 + $0xe8] sm:$0xff] %vm307_vm1, %v471_v6  ;;  %505 = vst.msk [vmem:[#allocation2 + $0xf0] sm:$0xff] %vm307_vm1, %v472_v12  ;;  %v774_v12 = vrot.slane %v7681_v13, 1 }
  0x3a   : > { %v7753_v9 = vld [vmem:[#allocation2 + $0x28] sm:$0xff]  ;;  %v7755_v10 = vld [vmem:[#allocation2 + $0x30] sm:$0xff]  ;;  %506 = vst.msk [vmem:[#allocation2 + $0x108] sm:$0xff] %vm307_vm1, %v473_v23  ;;  %507 = vst.msk [vmem:[#allocation2 + $0x110] sm:$0xff] %vm307_vm1, %v474_v24  ;;  %v685_v23 = vrot.slane %v7858_v5, 7 }
  0x3b   : > { %v651_v17 = vrot.slane %v7753_v9, 7  ;;  %v653_v18 = vrot.slane %v7755_v10, 7  ;;  %v7770_v21 = vpack.c.bf16 %v7755_v10, %v7753_v9  ;;  %v7772_v22 = vld [vmem:[#allocation2 + $0x48] sm:$0xff]  ;;  %v7781_v28 = vld [vmem:[#allocation2 + $0x50] sm:$0xff]  ;;  %508 = vst.msk [vmem:[#allocation2 + $0x128] sm:$0xff] %vm307_vm1, %v475_v35  ;;  %509 = vst.msk [vmem:[#allocation2 + $0x130] sm:$0xff] %vm307_vm1, %v476_v42 }
  0x3c   : > { %v656_v29 = vrot.slane %v7772_v22, 7  ;;  %v658_v32 = vrot.slane %v7781_v28, 7  ;;  %v7792_v33 = vpack.c.bf16 %v7781_v28, %v7772_v22  ;;  %v7794_v34 = vld [vmem:[#allocation2 + $0x68] sm:$0xff]  ;;  %v7805_v38 = vld [vmem:[#allocation2 + $0x70] sm:$0xff] }
  0x3d   : > { %11123 = vst [vmem:[#allocation3_spill] sm:$0xff] %v7770_v21  ;;  %v652_v26 = vsel %vm644_vm3, %v650_v1, %v651_v17  ;;  %v654_v27 = vsel %vm644_vm3, %v651_v17, %v653_v18  ;;  %6790 = vmatmul.mubr.msk.bf16.vlgmr.msra.gmra.mrb[0].mxu1 %vm307_vm1, %v7770_v21  ;;  %v661_v39 = vrot.slane %v7794_v34, 7  ;;  %v7808_v40 = vld [vmem:[#allocation2 + $0x88] sm:$0xff]  ;;  %v663_v44 = vrot.slane %v7805_v38, 7  ;;  %v7817_v45 = vld [vmem:[#allocation2 + $0x90] sm:$0xff]  ;;  %v400_v17 = vld [vmem:[%s7671_s20 + $0x98] sm:$0xff] }
  0x3e   : > { %v7785_v31 = vpack.c.bf16 %v654_v27, %v652_v26  ;;  %11124 = vst [vmem:[#allocation4_spill] sm:$0xff] %v7792_v33  ;;  %v657_v37 = vsel %vm644_vm3, %v655_v11, %v656_v29  ;;  %6856 = vmatpush3.bf16.msra.mxu1 %v1626_v0  ;;  %v659_v43 = vsel %vm644_vm3, %v656_v29, %v658_v32  ;;  %v666_v46 = vrot.slane %v7808_v40, 7  ;;  %v7820_v47 = vld [vmem:[#allocation2 + $0xa8] sm:$0xff]  ;;  %v7828_v52 = vld [vmem:[#allocation2 + $0xb0] sm:$0xff] }
  0x3f   : > { %6793 = vmatprep.mubr.msk.bf16.mxu1 %vm307_vm1, %v7792_v33  ;;  %v7824_v49 = vpack.c.bf16 %v659_v43, %v657_v37  ;;  %v662_v50 = vsel %vm644_vm3, %v660_v19, %v661_v39  ;;  %v668_v51 = vrot.slane %v7817_v45, 7  ;;  %v664_v53 = vsel %vm644_vm3, %v661_v39, %v663_v44  ;;  %v7837_v57 = vld [vmem:[#allocation2 + $0xc8] sm:$0xff]  ;;  %v7839_v58 = vld [vmem:[#allocation2 + $0xd0] sm:$0xff]  ;;  %v404_v44 = vld [vmem:[%s7671_s20 + $0xb8] sm:$0xff] }
  0x40   : > { %6756 = vmatmul.mubr.msk.bf16.vlgmr.msra.gmra.mrb[0].mxu0 %vm307_vm1, %v7785_v31  ;;  %v7834_v54 = vpack.c.bf16 %v7805_v38, %v7794_v34  ;;  %v667_v55 = vsel %vm644_vm3, %v665_v20, %v666_v46  ;;  %v7848_v60 = vpack.c.bf16 %v7817_v45, %v7808_v40  ;;  %v671_v61 = vrot.slane %v7820_v47, 7  ;;  %v399_v11 = vld [vmem:[%s7671_s20 + $0x90] sm:$0xff]  ;;  %v7863_v6 = vld [vmem:[#allocation2 + $0xe8] sm:$0xff] }
  0x41   : > { %6822 = vmatpush3.bf16.msra.mxu0 %v7723_v48  ;;  %v548_v48 = vld [vmem:[#allocation2 + $0xc0] sm:$0xff]  ;;  %6759 = vmatprep.mubr.msk.bf16.mxu0 %vm307_vm1, %v7824_v49  ;;  %v669_v59 = vsel %vm644_vm3, %v666_v46, %v668_v51  ;;  %v673_v62 = vrot.slane %v7828_v52, 7  ;;  %v7852_v63 = vpack.c.bf16 %v664_v53, %v662_v50  ;;  %v676_v2 = vrot.slane %v7837_v57, 7  ;;  %v7874_v19 = vld [vmem:[#allocation2 + $0xf0] sm:$0xff]  ;;  %v402_v26 = vld [vmem:[%s7671_s20 + $0xa8] sm:$0xff] }
  0x42   : > { %11125 = vst [vmem:[#allocation5_spill] sm:$0xff] %v7834_v54  ;;  %7369 = vmatprep.subr.msk.bf16.mxu0 %vm1033_vm0, %v7802_v36  ;;  %11126 = vst [vmem:[#allocation6_spill] sm:$0xff] %v7848_v60  ;;  %v7854_v0 = vpack.c.bf16 %v669_v59, %v667_v55  ;;  %v675_v1 = vrot.slane %v548_v48, 7  ;;  %v678_v3 = vrot.slane %v7839_v58, 7  ;;  %v672_v15 = vsel %vm644_vm3, %v670_v56, %v671_v61  ;;  %v7889_v35 = vld [vmem:[#allocation2 + $0x108] sm:$0xff]  ;;  %v403_v37 = vld [vmem:[%s7671_s20 + $0xb0] sm:$0xff] }
  0x43   : > { %v674_v16 = vsel %vm644_vm3, %v671_v61, %v673_v62  ;;  %v775_v18 = vrot.slane %v7683_v14, 1  ;;  %v680_v20 = vrot.slane %v552_v4, 7  ;;  %v438_v24 = vmul.f32 %v7664_v7, %v399_v11  ;;  %v405_v46 = vld [vmem:[%s7671_s20 + $0xc0] sm:$0xff]  ;;  %v7907_v53 = vld [vmem:[#allocation2 + $0x110] sm:$0xff]  ;;  %v406_v48 = vld [vmem:[%s7671_s20 + $0xc8] sm:$0xff] }
  0x44   : > { %v7884_v27 = vpack.c.bf16 %v7828_v52, %v7820_v47  ;;  %v677_v29 = vsel %vm644_vm3, %v675_v1, %v676_v2  ;;  %v679_v30 = vsel %vm644_vm3, %v676_v2, %v678_v3  ;;  %v681_v32 = vrot.slane %v7863_v6, 7  ;;  %v7915_v59 = vld [vmem:[%s11045_s1 + $0xa] sm:$0x3]  ;;  %v407_v3 = vld [vmem:[%s7671_s20 + $0xd0] sm:$0xff]  ;;  %v408_v4 = vld [vmem:[%s7671_s20 + $0xd8] sm:$0xff] }
  0x45   : > { %6794 = vmatmul.mubr.msk.bf16.gmra.mrb[4].mxu1 %vm307_vm1, %v7834_v54  ;;  %v7892_v39 = vpack.c.bf16 %v674_v16, %v672_v15  ;;  %v7896_v41 = vpack.c.bf16 %v7839_v58, %v7837_v57  ;;  %v439_v42 = vmul.f32 %v7664_v7, %v400_v17  ;;  %v477_v43 = vadd.f32 %v7676_v8, %v438_v24  ;;  %v409_v17 = vld [vmem:[%s7671_s20 + $0xe0] sm:$0xff]  ;;  %v410_v24 = vld [vmem:[%s7671_s20 + $0xe8] sm:$0xff]  ;;  %v411_v33 = vld [vmem:[%s7671_s20 + $0xf0] sm:$0xff] }
  0x46   : > { %6797 = vmatprep.mubr.msk.bf16.mxu1 %vm307_vm1, %v7848_v60  ;;  %11127 = vst [vmem:[#allocation7_spill] sm:$0xff] %v7884_v27  ;;  %v683_v50 = vrot.slane %v7874_v19, 7  ;;  %v7905_v51 = vpack.c.bf16 %v7874_v19, %v7863_v6  ;;  %v440_v55 = vmul.f32 %v7664_v7, %v401_v25  ;;  %v441_v56 = vmul.f32 %v7664_v7, %v402_v26 }
  0x47   : > { %11128 = vst [vmem:[#allocation8_spill] sm:$0xff] %v7896_v41  ;;  %v7917_v61 = vpack.c.bf16 %v679_v30, %v677_v29  ;;  %v686_v62 = vrot.slane %v7889_v35, 7  ;;  %v478_v1 = vadd.f32 %v7676_v8, %v439_v42  ;;  %510 = vst.msk [vmem:[#allocation2 + $0x148] sm:$0xff] %vm307_vm1, %v477_v43  ;;  %v442_v2 = vmul.f32 %v7664_v7, %v403_v37 }
  0x48   : > { %6760 = vmatmul.mubr.msk.bf16.gmra.mrb[4].mxu0 %vm307_vm1, %v7852_v63  ;;  %11129 = vst [vmem:[#allocation9_spill] sm:$0xff] %v7905_v51  ;;  %7370 = vmatprep.subr.msk.bf16.mxu1 %vm1033_vm0, %v7915_v59  ;;  %v682_v5 = vsel %vm644_vm3, %v680_v20, %v681_v32  ;;  %v479_v11 = vadd.f32 %v7676_v8, %v440_v55  ;;  %v688_v25 = vrot.slane %v7907_v53, 7 }
  0x49   : > { %6763 = vmatprep.mubr.msk.bf16.mxu0 %vm307_vm1, %v7854_v0  ;;  %v480_v15 = vadd.f32 %v7676_v8, %v441_v56  ;;  %v443_v16 = vmul.f32 %v7664_v7, %v404_v44  ;;  %511 = vst.msk [vmem:[#allocation2 + $0x150] sm:$0xff] %vm307_vm1, %v478_v1  ;;  %v481_v26 = vadd.f32 %v7676_v8, %v442_v2  ;;  %v527_v44 = vld [vmem:[#allocation2 + $0x18] sm:$0x1] }
  0x4a   : > { %v444_v29 = vmul.f32 %v7664_v7, %v405_v46  ;;  %v445_v20 = vmul.f32 %v7664_v7, %v406_v48  ;;  %v684_v30 = vsel %vm644_vm3, %v681_v32, %v683_v50  ;;  %512 = vst.msk [vmem:[#allocation2 + $0x168] sm:$0xff] %vm307_vm1, %v479_v11  ;;  %v446_v42 = vmul.f32 %v7664_v7, %v407_v3  ;;  %v560_v48 = vld [vmem:[#allocation2 + $0x120] sm:$0xff]  ;;  %v7969_v11 = vld [vmem:[#allocation2 + $0x128] sm:$0xff] }
  0x4b   : > { %513 = vst.msk [vmem:[#allocation2 + $0x170] sm:$0xff] %vm307_vm1, %v480_v15  ;;  %v482_v37 = vadd.f32 %v7676_v8, %v443_v16  ;;  %v447_v43 = vmul.f32 %v7664_v7, %v408_v4  ;;  %514 = vst.msk [vmem:[#allocation2 + $0x188] sm:$0xff] %vm307_vm1, %v481_v26  ;;  %v448_v50 = vmul.f32 %v7664_v7, %v409_v17  ;;  %v7971_v15 = vld [vmem:[#allocation2 + $0x130] sm:$0xff]  ;;  %v777_v17 = vrot.slane %v527_v44, 1 }
  0x4c   : > { %v483_v46 = vadd.f32 %v7676_v8, %v444_v29  ;;  %v484_v32 = vadd.f32 %v7676_v8, %v445_v20  ;;  %v449_v55 = vmul.f32 %v7664_v7, %v410_v24  ;;  %v687_v56 = vsel %vm644_vm3, %v685_v23, %v686_v62 }
  0x4d   : > { %6798 = vmatmul.mubr.msk.bf16.gmra.mrb[8].mxu1 %vm307_vm1, %v7884_v27  ;;  %515 = vst.msk [vmem:[#allocation2 + $0x190] sm:$0xff] %vm307_vm1, %v482_v37  ;;  %v485_v1 = vadd.f32 %v7676_v8, %v446_v42  ;;  %v486_v2 = vadd.f32 %v7676_v8, %v447_v43  ;;  %v7966_v3 = vsel %vm773_vm4, %v774_v12, %v775_v18  ;;  %v564_v12 = vld [vmem:[#allocation2 + $0x140] sm:$0xff]  ;;  %v691_v20 = vrot.slane %v7969_v11, 7 }
  0x4e   : > { %6801 = vmatprep.mubr.msk.bf16.mxu1 %vm307_vm1, %v7896_v41  ;;  %v689_v4 = vsel %vm644_vm3, %v686_v62, %v688_v25  ;;  %516 = vst.msk [vmem:[#allocation2 + $0x1a8] sm:$0xff] %vm307_vm1, %v483_v46  ;;  %517 = vst.msk [vmem:[#allocation2 + $0x1b0] sm:$0xff] %vm307_vm1, %v484_v32  ;;  %v487_v23 = vadd.f32 %v7676_v8, %v448_v50  ;;  %v488_v16 = vadd.f32 %v7676_v8, %v449_v55  ;;  %v7981_v24 = vld [vmem:[#allocation2 + $0x148] sm:$0xff]  ;;  %v568_v55 = vld [vmem:[#allocation2 + $0x160] sm:$0xff] }
  0x4f   : > { %v7979_v13 = vpack.c.bf16 %v7907_v53, %v7889_v35  ;;  %518 = vst.msk [vmem:[#allocation2 + $0x1c8] sm:$0xff] %vm307_vm1, %v485_v1  ;;  %519 = vst.msk [vmem:[#allocation2 + $0x1d0] sm:$0xff] %vm307_vm1, %v486_v2  ;;  %v7985_v62 = vpack.c.bf16 %v684_v30, %v682_v5  ;;  %v690_v25 = vrot.slane %v560_v48, 7  ;;  %v7992_v26 = vsel %vm773_vm4, %v775_v18, %v777_v17  ;;  %v572_v2 = vld [vmem:[#allocation2 + $0x180] sm:$0xff] }
  0x50   : > { %6764 = vmatmul.mubr.msk.bf16.gmra.mrb[8].mxu0 %vm307_vm1, %v7892_v39  ;;  %520 = vst.msk [vmem:[#allocation2 + $0x1e8] sm:$0xff] %vm307_vm1, %v487_v23  ;;  %521 = vst.msk [vmem:[#allocation2 + $0x1f0] sm:$0xff] %vm307_vm1, %v488_v16  ;;  %v7994_v29 = vpack.c.bf16 %v689_v4, %v687_v56  ;;  %v693_v37 = vrot.slane %v7971_v15, 7  ;;  %v7998_v42 = vld [vmem:[#allocation2 + $0x150] sm:$0xff]  ;;  %v695_v30 = vrot.slane %v564_v12, 7  ;;  %v696_v14 = vrot.slane %v7981_v24, 7 }
  0x51   : > { %6767 = vmatprep.mubr.msk.bf16.mxu0 %vm307_vm1, %v7917_v61  ;;  %11130 = vst [vmem:[#allocation10_spill] sm:$0xff] %v7979_v13  ;;  %v698_v18 = vrot.slane %v7998_v42, 7  ;;  %v692_v43 = vsel %vm644_vm3, %v690_v25, %v691_v20  ;;  %v8016_v46 = vpack.c.bf16 %v7971_v15, %v7969_v11  ;;  %v8020_v56 = vld [vmem:[#allocation2 + $0x168] sm:$0xff]  ;;  %v8026_v1 = vpack.c.bf16 %v7998_v42, %v7981_v24 }
  0x52   : > { %v694_v44 = vsel %vm644_vm3, %v691_v20, %v693_v37  ;;  %v697_v32 = vsel %vm644_vm3, %v695_v30, %v696_v14  ;;  %v8022_v48 = vld [vmem:[#allocation2 + $0x170] sm:$0xff]  ;;  %v8028_v4 = vld [vmem:[#allocation2 + $0x188] sm:$0xff]  ;;  %v700_v12 = vrot.slane %v568_v55, 7  ;;  %v701_v25 = vrot.slane %v8020_v56, 7  ;;  %v576_v55 = vld [vmem:[#allocation2 + $0x1a0] sm:$0xff] }
  0x53   : > { %11131 = vst [vmem:[#allocation11_spill] sm:$0xff] %v8016_v46  ;;  %v699_v50 = vsel %vm644_vm3, %v696_v14, %v698_v18  ;;  %11132 = vst [vmem:[#allocation12_spill] sm:$0xff] %v8026_v1  ;;  %v8032_v16 = vpack.c.bf16 %v694_v44, %v692_v43  ;;  %v703_v20 = vrot.slane %v8022_v48, 7  ;;  %v705_v37 = vrot.slane %v572_v2, 7 }
  0x54   : > { %v8030_v23 = vld [vmem:[#allocation2 + $0x190] sm:$0xff]  ;;  %v8034_v17 = vpack.c.bf16 %v699_v50, %v697_v32  ;;  %v706_v30 = vrot.slane %v8028_v4, 7  ;;  %v702_v18 = vsel %vm644_vm3, %v700_v12, %v701_v25  ;;  %v8052_v44 = vpack.c.bf16 %v8022_v48, %v8020_v56  ;;  %v580_v12 = vld [vmem:[#allocation2 + $0x1c0] sm:$0xff] }
  0x55   : > { %6802 = vmatmul.mubr.msk.bf16.gmra.mrb[12].mxu1 %vm307_vm1, %v7905_v51  ;;  %v708_v14 = vrot.slane %v8030_v23, 7  ;;  %v704_v43 = vsel %vm644_vm3, %v701_v25, %v703_v20  ;;  %v8056_v2 = vld [vmem:[#allocation2 + $0x1a8] sm:$0xff]  ;;  %v8058_v5 = vld [vmem:[#allocation2 + $0x1b0] sm:$0xff]  ;;  %v715_v51 = vrot.slane %v580_v12, 7  ;;  %v584_v12 = vld [vmem:[#allocation2 + $0x1e0] sm:$0xff] }
  0x56   : > { %6805 = vmatprep.mubr.msk.bf16.mxu1 %vm307_vm1, %v7979_v13  ;;  %11133 = vst [vmem:[#allocation13_spill] sm:$0xff] %v8052_v44  ;;  %v707_v32 = vsel %vm644_vm3, %v705_v37, %v706_v30  ;;  %v8066_v25 = vld [vmem:[#allocation2 + $0x1d0] sm:$0xff]  ;;  %v8068_v20 = vpack.c.bf16 %v704_v43, %v702_v18  ;;  %v710_v37 = vrot.slane %v576_v55, 7 }
  0x57   : > { %v709_v50 = vsel %vm644_vm3, %v706_v30, %v708_v14  ;;  %v711_v30 = vrot.slane %v8056_v2, 7  ;;  %v713_v14 = vrot.slane %v8058_v5, 7  ;;  %v718_v27 = vrot.slane %v8066_v25, 7 }
  0x58   : > { %6768 = vmatmul.mubr.msk.bf16.gmra.mrb[12].mxu0 %vm307_vm1, %v7985_v62  ;;  %v8070_v13 = vpack.c.bf16 %v709_v50, %v707_v32  ;;  %v8088_v32 = vpack.c.bf16 %v8058_v5, %v8056_v2 }
  0x59   : > { %6771 = vmatprep.mubr.msk.bf16.mxu0 %vm307_vm1, %v7994_v29  ;;  %v712_v18 = vsel %vm644_vm3, %v710_v37, %v711_v30  ;;  %v714_v43 = vsel %vm644_vm3, %v711_v30, %v713_v14  ;;  %v720_v14 = vrot.slane %v584_v12, 7  ;;  %v531_v12 = vld [vmem:[#allocation2 + $0x38] sm:$0x1] }
  0x5a   : > { %11135 = vst [vmem:[#allocation15_spill] sm:$0xff] %v8088_v32  ;;  %v8100_v37 = vpack.c.bf16 %v714_v43, %v712_v18 }
  0x5d   : > { %6806 = vmatmul.mubr.msk.bf16.gmra.mrb[16].mxu1 %vm307_vm1, %v8016_v46  ;;  %v8064_v46 = vld [vmem:[#allocation2 + $0x1c8] sm:$0xff] }
  0x5e   : > { %6809 = vmatprep.mubr.msk.bf16.mxu1 %vm307_vm1, %v8026_v1  ;;  %v8062_v1 = vpack.c.bf16 %v8030_v23, %v8028_v4  ;;  %v716_v41 = vrot.slane %v8064_v46, 7  ;;  %v8098_v60 = vpack.c.bf16 %v8066_v25, %v8064_v46 }
  0x60   : > { %6772 = vmatmul.mubr.msk.bf16.gmra.mrb[16].mxu0 %vm307_vm1, %v8032_v16  ;;  %11134 = vst [vmem:[#allocation14_spill] sm:$0xff] %v8062_v1  ;;  %v717_v50 = vsel %vm644_vm3, %v715_v51, %v716_v41  ;;  %v719_v55 = vsel %vm644_vm3, %v716_v41, %v718_v27  ;;  %11136 = vst [vmem:[#allocation16_spill] sm:$0xff] %v8098_v60  ;;  %v412_v27 = vld [vmem:[%s7671_s20 + $0xf8] sm:$0xff]  ;;  %v450_v41 = vmul.f32 %v7664_v7, %v411_v33 }
  0x61   : > { %6775 = vmatprep.mubr.msk.bf16.mxu0 %vm307_vm1, %v8034_v17  ;;  %v8102_v30 = vpack.c.bf16 %v719_v55, %v717_v50  ;;  %v451_v50 = vmul.f32 %v7664_v7, %v412_v27  ;;  %v784_v7 = vrot.slane %v7772_v22, 1  ;;  %v785_v27 = vrot.slane %v7781_v28, 1  ;;  %v539_v28 = vld [vmem:[#allocation2 + $0x78] sm:$0x1] }
  0x63   : > { %v490_v21 = vadd.f32 %v7676_v8, %v451_v50  ;;  %v8159_v50 = vld [vmem:[%s11045_s1 + $0xe] sm:$0x3] }
  0x65   : > { %6810 = vmatmul.mubr.msk.bf16.gmra.mrb[20].mxu1 %vm307_vm1, %v8052_v44  ;;  %v8094_v44 = vld [vmem:[#allocation2 + $0x1f0] sm:$0xff]  ;;  %523 = vst.msk [vmem:[#allocation2 + $0x210] sm:$0xff] %vm307_vm1, %v490_v21  ;;  %v786_v21 = vsel %vm773_vm4, %v784_v7, %v785_v27  ;;  %v551_v7 = vld [vmem:[#allocation2 + $0xd8] sm:$0x1] }
  0x66   : > { %6813 = vmatprep.mubr.msk.bf16.mxu1 %vm307_vm1, %v8062_v1  ;;  %v8092_v1 = vld [vmem:[#allocation2 + $0x1e8] sm:$0xff]  ;;  %v723_v51 = vrot.slane %v8094_v44, 7 }
  0x67   : > { %v721_v54 = vrot.slane %v8092_v1, 7  ;;  %v8122_v55 = vpack.c.bf16 %v8094_v44, %v8092_v1 }
  0x68   : > { %6776 = vmatmul.mubr.msk.bf16.gmra.mrb[20].mxu0 %vm307_vm1, %v8068_v20 }
  0x69   : > { %6779 = vmatprep.mubr.msk.bf16.mxu0 %vm307_vm1, %v8070_v13  ;;  %v722_v18 = vsel %vm644_vm3, %v720_v14, %v721_v54  ;;  %v724_v43 = vsel %vm644_vm3, %v721_v54, %v723_v51  ;;  %v779_v14 = vrot.slane %v7753_v9, 1  ;;  %v780_v54 = vrot.slane %v7755_v10, 1 }
  0x6a   : > { %v8126_v33 = vpack.c.bf16 %v724_v43, %v722_v18  ;;  %v782_v51 = vrot.slane %v531_v12, 1  ;;  %v792_v43 = vrot.slane %v539_v28, 1  ;;  %v1793_v12 = vsel %vm1033_vm0, %v7802_v36, 0 }
  0x6b   : > { %v781_v9 = vsel %vm773_vm4, %v779_v14, %v780_v54  ;;  %v795_v14 = vrot.slane %v7817_v45, 1  ;;  %v807_v28 = vrot.slane %v551_v7, 1  ;;  %v819_v7 = vrot.slane %v7969_v11, 1 }
  0x6c   : > { %v783_v10 = vsel %vm773_vm4, %v780_v54, %v782_v51  ;;  %v547_v51 = vld [vmem:[#allocation2 + $0xb8] sm:$0x1] }
  0x6d   : > { %6814 = vmatmul.mubr.msk.bf16.gmra.mrb[24].mxu1 %vm307_vm1, %v8088_v32  ;;  %v535_v32 = vld [vmem:[#allocation2 + $0x58] sm:$0x1] }
  0x6e   : > { %6817 = vmatprep.mubr.msk.bf16.mxu1 %vm307_vm1, %v8098_v60  ;;  %v489_v60 = vadd.f32 %v7676_v8, %v450_v41  ;;  %v787_v41 = vrot.slane %v535_v32, 1  ;;  %v11137_v8 = vpack.c.bf16 %v7992_v26, %v7966_v3  ;;  %v8148_v32 = vpack.c.bf16 %v783_v10, %v781_v9 }
  0x6f   : > { %v789_v3 = vrot.slane %v7794_v34, 1  ;;  %v790_v26 = vrot.slane %v7805_v38, 1  ;;  %v8172_v34 = vld [vmem:[%s11045_s1 + $0xc] sm:$0x3]  ;;  %v800_v9 = vrot.slane %v7828_v52, 1  ;;  %v802_v10 = vrot.slane %v547_v51, 1 }
  0x70   : > { %6780 = vmatmul.mubr.msk.bf16.gmra.mrb[24].mxu0 %vm307_vm1, %v8100_v37  ;;  %522 = vst.msk [vmem:[#allocation2 + $0x208] sm:$0xff] %vm307_vm1, %v489_v60  ;;  %v788_v22 = vsel %vm773_vm4, %v785_v27, %v787_v41  ;;  %v543_v60 = vld [vmem:[#allocation2 + $0x98] sm:$0x1] }
  0x71   : > { %6783 = vmatprep.mubr.msk.bf16.mxu0 %vm307_vm1, %v8102_v30  ;;  %v8152_v18 = vpack.c.bf16 %v788_v22, %v786_v21  ;;  %v797_v54 = vrot.slane %v543_v60, 1  ;;  %v791_v36 = vsel %vm773_vm4, %v789_v3, %v790_v26  ;;  %v793_v38 = vsel %vm773_vm4, %v790_v26, %v792_v43 }
  0x72   : > { %v8186_v27 = vpack.c.bf16 %v793_v38, %v791_v36  ;;  %v804_v21 = vrot.slane %v7837_v57, 1  ;;  %v805_v22 = vrot.slane %v7839_v58, 1  ;;  %v803_v52 = vsel %vm773_vm4, %v800_v9, %v802_v10  ;;  %v559_v58 = vld [vmem:[#allocation2 + $0x118] sm:$0x1] }
  0x73   : > { %v798_v45 = vsel %vm773_vm4, %v795_v14, %v797_v54  ;;  %v809_v43 = vrot.slane %v7863_v6, 1  ;;  %v815_v54 = vrot.slane %v7907_v53, 1  ;;  %v817_v36 = vrot.slane %v559_v58, 1  ;;  %v567_v53 = vld [vmem:[#allocation2 + $0x158] sm:$0x1] }
  0x74   : > { %v806_v60 = vsel %vm773_vm4, %v804_v21, %v805_v22  ;;  %v808_v57 = vsel %vm773_vm4, %v805_v22, %v807_v28  ;;  %v824_v10 = vrot.slane %v7981_v24, 1  ;;  %v825_v21 = vrot.slane %v7998_v42, 1  ;;  %v575_v42 = vld [vmem:[#allocation2 + $0x198] sm:$0x1] }
  0x75   : > { %6818 = vmatmul.mubr.msk.bf16.gmra.mrb[28].mxu1 %vm307_vm1, %v8122_v55  ;;  %v8208_v26 = vpack.c.bf16 %v808_v57, %v806_v60  ;;  %v827_v22 = vrot.slane %v567_v53, 1  ;;  %v829_v57 = vrot.slane %v8020_v56, 1  ;;  %v845_v53 = vrot.slane %v8066_v25, 1 }
  0x76   : > { %6857 = vmatprep.mubr.msk.bf16.mxu1 %vm307_vm1, %v7785_v31  ;;  %v1960_v31 = vsel %vm1033_vm0, %v7915_v59, 0  ;;  %v794_v59 = vrot.slane %v7808_v40, 1  ;;  %v826_v28 = vsel %vm773_vm4, %v824_v10, %v825_v21 }
  0x77   : > { %v828_v24 = vsel %vm773_vm4, %v825_v21, %v827_v22  ;;  %v587_v21 = vld [vmem:[#allocation2 + $0x1f8] sm:$0x1] }
  0x78   : > { %6784 = vmatmul.mubr.msk.bf16.gmra.mrb[28].mxu0 %vm307_vm1, %v8126_v33  ;;  %v796_v40 = vsel %vm773_vm4, %v794_v59, %v795_v14  ;;  %v814_v14 = vrot.slane %v7889_v35, 1  ;;  %v818_v35 = vsel %vm773_vm4, %v815_v54, %v817_v36  ;;  %v8248_v60 = vpack.c.bf16 %v828_v24, %v826_v28 }
  0x79   : > { %6823 = vmatprep.mubr.msk.bf16.mxu0 %vm307_vm1, %v11137_v8  ;;  %v8188_v41 = vpack.c.bf16 %v798_v45, %v796_v40  ;;  %v799_v8 = vrot.slane %v7820_v47, 1  ;;  %v563_v40 = vld [vmem:[#allocation2 + $0x138] sm:$0x1] }
  0x7a   : > { %v816_v38 = vsel %vm773_vm4, %v814_v14, %v815_v54  ;;  %v579_v54 = vld [vmem:[#allocation2 + $0x1b8] sm:$0x1] }
  0x7b   : > { %v801_v47 = vsel %vm773_vm4, %v799_v8, %v800_v9  ;;  %v8228_v51 = vpack.c.bf16 %v818_v35, %v816_v38  ;;  %v820_v8 = vrot.slane %v7971_v15, 1  ;;  %v822_v9 = vrot.slane %v563_v40, 1 }
  0x7c   : > { %v8206_v3 = vpack.c.bf16 %v803_v52, %v801_v47  ;;  %v571_v47 = vld [vmem:[#allocation2 + $0x178] sm:$0x1]  ;;  %v840_v38 = vrot.slane %v8058_v5, 1  ;;  %v842_v35 = vrot.slane %v579_v54, 1  ;;  %v844_v40 = vrot.slane %v8064_v46, 1  ;;  %v11143_v54 = vld [vmem:[#allocation8_spill] sm:$0xff] }
  0x7d   : > { %6858 = vmatmul.mubr.msk.bf16.vlgmr.msra.gmra.mrb[32].mxu1 %vm307_vm1, %v7824_v49  ;;  %v821_v11 = vsel %vm773_vm4, %v819_v7, %v820_v8  ;;  %v823_v15 = vsel %vm773_vm4, %v820_v8, %v822_v9  ;;  %v832_v58 = vrot.slane %v571_v47, 1  ;;  %v588_v8 = vld [vmem:[#allocation2 + $0x200] sm:$0xff]  ;;  %v8280_v9 = vld [vmem:[#allocation2 + $0x208] sm:$0xff]  ;;  %v849_v47 = vrot.slane %v8092_v1, 1 }
  0x7e   : > { %6861 = vmatprep.mubr.msk.bf16.mxu1 %vm307_vm1, %v7852_v63  ;;  %6924 = vmatpush3.bf16.msra.mxu1 %v1960_v31  ;;  %v555_v31 = vld [vmem:[#allocation2 + $0xf8] sm:$0x1]  ;;  %v8246_v52 = vpack.c.bf16 %v823_v15, %v821_v11  ;;  %v843_v46 = vsel %vm773_vm4, %v840_v38, %v842_v35  ;;  %v846_v25 = vsel %vm773_vm4, %v844_v40, %v845_v53  ;;  %v889_v22 = vrot.slane %v588_v8, 7  ;;  %v11147_v35 = vld [vmem:[#allocation12_spill] sm:$0xff]  ;;  %v11148_v40 = vld [vmem:[#allocation13_spill] sm:$0xff] }
  0x7f   : > { %7372 = vmatprep.subr.msk.bf16.mxu1 %vm1033_vm0, %v8159_v50  ;;  %v812_v59 = vrot.slane %v555_v31, 1  ;;  %v830_v31 = vrot.slane %v8022_v48, 1  ;;  %v890_v11 = vrot.slane %v8280_v9, 7  ;;  %v11150_v8 = vld [vmem:[#allocation15_spill] sm:$0xff] }
  0x80   : > { %6824 = vmatmul.mubr.msk.bf16.vlgmr.msra.gmra.mrb[32].mxu0 %vm307_vm1, %v8148_v32 }
  0x81   : > { %6890 = vmatpush3.bf16.msra.mxu0 %v1793_v12  ;;  %6827 = vmatprep.mubr.msk.bf16.mxu0 %vm307_vm1, %v8152_v18  ;;  %v810_v12 = vrot.slane %v7874_v19, 1  ;;  %v831_v56 = vsel %vm773_vm4, %v829_v57, %v830_v31  ;;  %v833_v48 = vsel %vm773_vm4, %v830_v31, %v832_v58  ;;  %v852_v57 = vrot.slane %v587_v21, 1 }
  0x82   : > { %7371 = vmatprep.subr.msk.bf16.mxu0 %vm1033_vm0, %v8172_v34  ;;  %v8266_v36 = vpack.c.bf16 %v833_v48, %v831_v56  ;;  %v891_v31 = vsel %vm644_vm3, %v889_v22, %v890_v11  ;;  %v2294_v56 = vsel %vm1033_vm0, %v8159_v50, 0  ;;  %v2127_v48 = vsel %vm1033_vm0, %v8172_v34, 0  ;;  %v11141_v50 = vld [vmem:[#allocation6_spill] sm:$0xff]  ;;  %v11142_v34 = vld [vmem:[#allocation7_spill] sm:$0xff]  ;;  %v11151_v22 = vld [vmem:[#allocation16_spill] sm:$0xff] }
  0x83   : > { %v811_v6 = vsel %vm773_vm4, %v809_v43, %v810_v12  ;;  %v813_v19 = vsel %vm773_vm4, %v810_v12, %v812_v59  ;;  %v834_v43 = vrot.slane %v8028_v4, 1  ;;  %v835_v12 = vrot.slane %v8030_v23, 1  ;;  %v583_v23 = vld [vmem:[#allocation2 + $0x1d8] sm:$0x1] }
  0x84   : > { %v8226_v45 = vpack.c.bf16 %v813_v19, %v811_v6  ;;  %v837_v59 = vrot.slane %v575_v42, 1  ;;  %v839_v19 = vrot.slane %v8056_v2, 1  ;;  %v847_v7 = vrot.slane %v583_v23, 1  ;;  %v8282_v2 = vld [vmem:[#allocation2 + $0x210] sm:$0xff] }
  0x85   : > { %6862 = vmatmul.mubr.msk.bf16.gmra.mrb[36].mxu1 %vm307_vm1, %v7854_v0  ;;  %v836_v14 = vsel %vm773_vm4, %v834_v43, %v835_v12  ;;  %v892_v15 = vrot.slane %v8282_v2, 7  ;;  %v850_v42 = vrot.slane %v8094_v44, 1  ;;  %v11144_v23 = vld [vmem:[#allocation9_spill] sm:$0xff] }
  0x86   : > { %6865 = vmatprep.mubr.msk.bf16.mxu1 %vm307_vm1, %v7892_v39  ;;  %v838_v4 = vsel %vm773_vm4, %v835_v12, %v837_v59  ;;  %v841_v5 = vsel %vm773_vm4, %v839_v19, %v840_v38  ;;  %v848_v10 = vsel %vm773_vm4, %v845_v53, %v847_v7  ;;  %v11138_v59 = vld [vmem:[#allocation3_spill] sm:$0xff]  ;;  %v11145_v19 = vld [vmem:[#allocation10_spill] sm:$0xff] }
  0x87   : > { %v8268_v6 = vpack.c.bf16 %v838_v4, %v836_v14  ;;  %v8292_v28 = vpack.c.bf16 %v843_v46, %v841_v5  ;;  %v8294_v24 = vpack.c.bf16 %v848_v10, %v846_v25  ;;  %v893_v58 = vsel %vm644_vm3, %v890_v11, %v892_v15  ;;  %v11139_v14 = vld [vmem:[#allocation4_spill] sm:$0xff]  ;;  %v11140_v4 = vld [vmem:[#allocation5_spill] sm:$0xff]  ;;  %v11146_v38 = vld [vmem:[#allocation11_spill] sm:$0xff] }
  0x88   : > { %6828 = vmatmul.mubr.msk.bf16.gmra.mrb[36].mxu0 %vm307_vm1, %v8186_v27  ;;  %v851_v1 = vsel %vm773_vm4, %v849_v47, %v850_v42  ;;  %v853_v44 = vsel %vm773_vm4, %v850_v42, %v852_v57  ;;  %v8310_v43 = vpack.c.bf16 %v893_v58, %v891_v31  ;;  %v11149_v53 = vld [vmem:[#allocation14_spill] sm:$0xff]  ;;  %v897_v5 = vrot.slane %v8280_v9, 1  ;;  %v8392_v15 = vld [vmem:[#allocation2 + $0x228] sm:$0xff]  ;;  %v8394_v47 = vld [vmem:[#allocation2 + $0x230] sm:$0xff] }
  0x89   : > { %6831 = vmatprep.mubr.msk.bf16.mxu0 %vm307_vm1, %v8188_v41  ;;  %v8312_v12 = vpack.c.bf16 %v853_v44, %v851_v1  ;;  %v591_v7 = vld [vmem:[#allocation2 + $0x218] sm:$0x1]  ;;  %v898_v46 = vrot.slane %v8282_v2, 1  ;;  %v915_v57 = vrot.slane %v8392_v15, 1  ;;  %v916_v31 = vrot.slane %v8394_v47, 1 }
  0x8a   : > { %v900_v25 = vrot.slane %v591_v7, 1  ;;  %v595_v42 = vld [vmem:[#allocation2 + $0x238] sm:$0x1]  ;;  %v8400_v1 = vpack.c.bf16 %v8282_v2, %v8280_v9 }
  0x8b   : > { %v899_v10 = vsel %vm773_vm4, %v897_v5, %v898_v46  ;;  %v918_v58 = vrot.slane %v595_v42, 1  ;;  %v8403_v44 = vsel %vm773_vm4, %v915_v57, %v916_v31 }
  0x8c   : > { %v901_v21 = vsel %vm773_vm4, %v898_v46, %v900_v25 }
  0x8d   : > { %6866 = vmatmul.mubr.msk.bf16.gmra.mrb[40].mxu1 %vm307_vm1, %v7917_v61  ;;  %v8390_v11 = vpack.c.bf16 %v901_v21, %v899_v10 }
  0x8e   : > { %6869 = vmatprep.mubr.msk.bf16.mxu1 %vm307_vm1, %v7985_v62 }
  0x90   : > { %6832 = vmatmul.mubr.msk.bf16.gmra.mrb[40].mxu0 %vm307_vm1, %v8206_v3 }
  0x91   : > { %6835 = vmatprep.mubr.msk.bf16.mxu0 %vm307_vm1, %v8208_v26 }
  0x95   : > { %6870 = vmatmul.mubr.msk.bf16.gmra.mrb[44].mxu1 %vm307_vm1, %v7994_v29 }
  0x96   : > { %6873 = vmatprep.mubr.msk.bf16.mxu1 %vm307_vm1, %v8032_v16 }
  0x98   : > { %6836 = vmatmul.mubr.msk.bf16.gmra.mrb[44].mxu0 %vm307_vm1, %v8226_v45 }
  0x99   : > { %6839 = vmatprep.mubr.msk.bf16.mxu0 %vm307_vm1, %v8228_v51 }
  0x9d   : > { %6874 = vmatmul.mubr.msk.bf16.gmra.mrb[48].mxu1 %vm307_vm1, %v8034_v17 }
  0x9e   : > { %6877 = vmatprep.mubr.msk.bf16.mxu1 %vm307_vm1, %v8068_v20 }
  0xa0   : > { %6840 = vmatmul.mubr.msk.bf16.gmra.mrb[48].mxu0 %vm307_vm1, %v8246_v52 }
  0xa1   : > { %6843 = vmatprep.mubr.msk.bf16.mxu0 %vm307_vm1, %v8248_v60 }
  0xa5   : > { %6878 = vmatmul.mubr.msk.bf16.gmra.mrb[52].mxu1 %vm307_vm1, %v8070_v13 }
  0xa6   : > { %6881 = vmatprep.mubr.msk.bf16.mxu1 %vm307_vm1, %v8100_v37 }
  0xa8   : > { %6844 = vmatmul.mubr.msk.bf16.gmra.mrb[52].mxu0 %vm307_vm1, %v8266_v36 }
  0xa9   : > { %6847 = vmatprep.mubr.msk.bf16.mxu0 %vm307_vm1, %v8268_v6 }
  0xad   : > { %6882 = vmatmul.mubr.msk.bf16.gmra.mrb[56].mxu1 %vm307_vm1, %v8102_v30 }
  0xae   : > { %6885 = vmatprep.mubr.msk.bf16.mxu1 %vm307_vm1, %v8126_v33 }
  0xb0   : > { %6848 = vmatmul.mubr.msk.bf16.gmra.mrb[56].mxu0 %vm307_vm1, %v8292_v28 }
  0xb1   : > { %6851 = vmatprep.mubr.msk.bf16.mxu0 %vm307_vm1, %v8294_v24 }
  0xb5   : > { %6886 = vmatmul.mubr.msk.bf16.gmra.mrb[60].mxu1 %vm307_vm1, %v8310_v43 }
  0xb6   : > { %6925 = vmatprep.mubr.msk.bf16.mxu1 %vm307_vm1, %v8148_v32  ;;  %v984_v32 = vld [vmem:[%s11045_s1 + $0x10] sm:$0x3] }
  0xb7   : > { %v2461_v9 = vsel %vm1033_vm0, %v984_v32, 0 }
  0xb8   : > { %6852 = vmatmul.mubr.msk.bf16.gmra.mrb[60].mxu0 %vm307_vm1, %v8312_v12 }
  0xb9   : > { %6891 = vmatprep.mubr.msk.bf16.mxu0 %vm307_vm1, %v11138_v59  ;;  %v8406_v59 = vsel %vm773_vm4, %v916_v31, %v918_v58 }
  0xbd   : > { %6926 = vmatmul.mubr.msk.bf16.vlgmr.msra.gmra.mrb[64].mxu1 %vm307_vm1, %v8152_v18 }
  0xbe   : > { %6929 = vmatprep.mubr.msk.bf16.mxu1 %vm307_vm1, %v8186_v27  ;;  %6992 = vmatpush3.bf16.msra.mxu1 %v2294_v56  ;;  %v975_v56 = vpack.c.bf16 %v8406_v59, %v8403_v44 }
  0xc0   : > { %6892 = vmatmul.mubr.msk.bf16.vlgmr.msra.gmra.mrb[64].mxu0 %vm307_vm1, %v11139_v14 }
  0xc1   : > { %6958 = vmatpush3.bf16.msra.mxu0 %v2127_v48  ;;  %6895 = vmatprep.mubr.msk.bf16.mxu0 %vm307_vm1, %v11140_v4 }
  0xc2   : > { %7373 = vmatprep.subr.msk.bf16.mxu0 %vm1033_vm0, %v984_v32 }
  0xc5   : > { %6930 = vmatmul.mubr.msk.bf16.gmra.mrb[68].mxu1 %vm307_vm1, %v8188_v41 }
  0xc6   : > { %6933 = vmatprep.mubr.msk.bf16.mxu1 %vm307_vm1, %v8206_v3 }
  0xc8   : > { %6896 = vmatmul.mubr.msk.bf16.gmra.mrb[68].mxu0 %vm307_vm1, %v11141_v50 }
  0xc9   : > { %6899 = vmatprep.mubr.msk.bf16.mxu0 %vm307_vm1, %v11142_v34 }
  0xcd   : > { %6934 = vmatmul.mubr.msk.bf16.gmra.mrb[72].mxu1 %vm307_vm1, %v8208_v26 }
  0xce   : > { %6937 = vmatprep.mubr.msk.bf16.mxu1 %vm307_vm1, %v8226_v45 }
  0xd0   : > { %6900 = vmatmul.mubr.msk.bf16.gmra.mrb[72].mxu0 %vm307_vm1, %v11143_v54 }
  0xd1   : > { %6903 = vmatprep.mubr.msk.bf16.mxu0 %vm307_vm1, %v11144_v23 }
  0xd5   : > { %6938 = vmatmul.mubr.msk.bf16.gmra.mrb[76].mxu1 %vm307_vm1, %v8228_v51 }
  0xd6   : > { %6941 = vmatprep.mubr.msk.bf16.mxu1 %vm307_vm1, %v8246_v52 }
  0xd8   : > { %6904 = vmatmul.mubr.msk.bf16.gmra.mrb[76].mxu0 %vm307_vm1, %v11145_v19 }
  0xd9   : > { %6907 = vmatprep.mubr.msk.bf16.mxu0 %vm307_vm1, %v11146_v38 }
  0xdd   : > { %6942 = vmatmul.mubr.msk.bf16.gmra.mrb[80].mxu1 %vm307_vm1, %v8248_v60 }
  0xde   : > { %6945 = vmatprep.mubr.msk.bf16.mxu1 %vm307_vm1, %v8266_v36 }
  0xe0   : > { %6908 = vmatmul.mubr.msk.bf16.gmra.mrb[80].mxu0 %vm307_vm1, %v11147_v35 }
  0xe1   : > { %6911 = vmatprep.mubr.msk.bf16.mxu0 %vm307_vm1, %v11148_v40 }
  0xe5   : > { %6946 = vmatmul.mubr.msk.bf16.gmra.mrb[84].mxu1 %vm307_vm1, %v8268_v6 }
  0xe6   : > { %6949 = vmatprep.mubr.msk.bf16.mxu1 %vm307_vm1, %v8292_v28 }
  0xe8   : > { %6912 = vmatmul.mubr.msk.bf16.gmra.mrb[84].mxu0 %vm307_vm1, %v11149_v53 }
  0xe9   : > { %6915 = vmatprep.mubr.msk.bf16.mxu0 %vm307_vm1, %v11150_v8 }
  0xed   : > { %6950 = vmatmul.mubr.msk.bf16.gmra.mrb[88].mxu1 %vm307_vm1, %v8294_v24 }
  0xee   : > { %6953 = vmatprep.mubr.msk.bf16.mxu1 %vm307_vm1, %v8312_v12 }
  0xf0   : > { %6916 = vmatmul.mubr.msk.bf16.gmra.mrb[88].mxu0 %vm307_vm1, %v11151_v22 }
  0xf1   : > { %6919 = vmatprep.mubr.msk.bf16.mxu0 %vm307_vm1, %v8122_v55 }
  0xf5   : > { %6954 = vmatmul.mubr.msk.bf16.gmra.mrb[92].mxu1 %vm307_vm1, %v8390_v11 }
  0xf6   : > { %6993 = vmatprep.mubr.msk.bf16.mxu1 %vm307_vm1, %v11139_v14 }
  0xf8   : > { %6920 = vmatmul.mubr.msk.bf16.gmra.mrb[92].mxu0 %vm307_vm1, %v8400_v1 }
  0xf9   : > { %6959 = vmatprep.mubr.msk.bf16.mxu0 %vm307_vm1, %v7824_v49 }
  0xfd   : > { %6994 = vmatmul.mubr.msk.bf16.vlgmr.msra.gmra.mrb[96].mxu1 %vm307_vm1, %v11140_v4 }
  0xfe   : > { %6997 = vmatprep.mubr.msk.bf16.mxu1 %vm307_vm1, %v11141_v50 }
 0x100   : > { %6960 = vmatmul.mubr.msk.bf16.vlgmr.msra.gmra.mrb[96].mxu0 %vm307_vm1, %v7852_v63 }
 0x101   : > { %7026 = vmatpush3.bf16.msra.mxu0 %v2461_v9  ;;  %6963 = vmatprep.mubr.msk.bf16.mxu0 %vm307_vm1, %v7854_v0 }
 0x105   : > { %6998 = vmatmul.mubr.msk.bf16.gmra.mrb[100].mxu1 %vm307_vm1, %v11142_v34 }
 0x106   : > { %7001 = vmatprep.mubr.msk.bf16.mxu1 %vm307_vm1, %v11143_v54 }
 0x108   : > { %6964 = vmatmul.mubr.msk.bf16.gmra.mrb[100].mxu0 %vm307_vm1, %v7892_v39 }
 0x109   : > { %6967 = vmatprep.mubr.msk.bf16.mxu0 %vm307_vm1, %v7917_v61 }
 0x10d   : > { %7002 = vmatmul.mubr.msk.bf16.gmra.mrb[104].mxu1 %vm307_vm1, %v11144_v23 }
 0x10e   : > { %7005 = vmatprep.mubr.msk.bf16.mxu1 %vm307_vm1, %v11145_v19 }
 0x110   : > { %6968 = vmatmul.mubr.msk.bf16.gmra.mrb[104].mxu0 %vm307_vm1, %v7985_v62  ;;  %v6791_v49 = vpop.f32.mrb[0].mxu1 }
 0x111   : > { %6971 = vmatprep.mubr.msk.bf16.mxu0 %vm307_vm1, %v7994_v29  ;;  %v2659_v63 = vsel %vm307_vm1, %v6791_v49, 0.0  ;;  %v1283_v0 = vpop.f32.mrb[1].mxu1 }
 0x112   : > { %v2625_v2 = vsel %vm307_vm1, %v1283_v0, 0.0  ;;  %v6792_v61 = vpop.f32.mrb[2].mxu1 }
 0x113   : > { %v6757_v39 = vpop.f32.mrb[0].mxu0  ;;  %v2676_v14 = vsel %vm307_vm1, %v6792_v61, 0.0  ;;  %v1286_v4 = vpop.f32.mrb[3].mxu1 }
 0x114   : > { %v2658_v48 = vsel %vm307_vm1, %v6757_v39, 0.0  ;;  %v1071_v32 = vpop.f32.mrb[1].mxu0  ;;  %v2642_v34 = vsel %vm307_vm1, %v1286_v4, 0.0 }
 0x115   : > { %v2624_v50 = vsel %vm307_vm1, %v1071_v32, 0.0  ;;  %v6758_v62 = vpop.f32.mrb[2].mxu0  ;;  %v8449_v54 = vadd.f32 %v2659_v63, %v2658_v48  ;;  %7006 = vmatmul.mubr.msk.bf16.gmra.mrb[108].mxu1 %vm307_vm1, %v11146_v38 }
 0x116   : > { %v2675_v29 = vsel %vm307_vm1, %v6758_v62, 0.0  ;;  %v1074_v23 = vpop.f32.mrb[3].mxu0  ;;  %v8454_v19 = vadd.f32 %v2625_v2, %v2624_v50  ;;  %7009 = vmatprep.mubr.msk.bf16.mxu1 %vm307_vm1, %v11147_v35 }
 0x117   : > { %v2641_v7 = vsel %vm307_vm1, %v1074_v23, 0.0  ;;  %v8459_v5 = vadd.f32 %v2676_v14, %v2675_v29 }
 0x118   : > { %6972 = vmatmul.mubr.msk.bf16.gmra.mrb[108].mxu0 %vm307_vm1, %v8032_v16  ;;  %v8463_v46 = vadd.f32 %v2642_v34, %v2641_v7  ;;  %v6795_v25 = vpop.f32.mrb[4].mxu1 }
 0x119   : > { %6975 = vmatprep.mubr.msk.bf16.mxu0 %vm307_vm1, %v8034_v17  ;;  %v2727_v38 = vsel %vm307_vm1, %v6795_v25, 0.0  ;;  %v1299_v10 = vpop.f32.mrb[5].mxu1 }
 0x11a   : > { %v2693_v42 = vsel %vm307_vm1, %v1299_v10, 0.0  ;;  %v6796_v57 = vpop.f32.mrb[6].mxu1 }
 0x11b   : > { %v6761_v21 = vpop.f32.mrb[4].mxu0  ;;  %v2744_v58 = vsel %vm307_vm1, %v6796_v57, 0.0  ;;  %v1302_v9 = vpop.f32.mrb[7].mxu1 }
 0x11c   : > { %v2726_v35 = vsel %vm307_vm1, %v6761_v21, 0.0  ;;  %v1087_v31 = vpop.f32.mrb[5].mxu0  ;;  %v2710_v63 = vsel %vm307_vm1, %v1302_v9, 0.0  ;;  %v592_v9 = vld [vmem:[#allocation2 + $0x220] sm:$0xff] }
 0x11d   : > { %v2692_v16 = vsel %vm307_vm1, %v1087_v31, 0.0  ;;  %v6762_v49 = vpop.f32.mrb[6].mxu0  ;;  %v8473_v0 = vadd.f32 %v2727_v38, %v2726_v35  ;;  %7010 = vmatmul.mubr.msk.bf16.gmra.mrb[112].mxu1 %vm307_vm1, %v11148_v40 }
 0x11e   : > { %v2743_v17 = vsel %vm307_vm1, %v6762_v49, 0.0  ;;  %v1090_v39 = vpop.f32.mrb[7].mxu0  ;;  %v8478_v2 = vadd.f32 %v2693_v42, %v2692_v16  ;;  %7013 = vmatprep.mubr.msk.bf16.mxu1 %vm307_vm1, %v11149_v53 }
 0x11f   : > { %v2709_v61 = vsel %vm307_vm1, %v1090_v39, 0.0  ;;  %v8483_v48 = vadd.f32 %v2744_v58, %v2743_v17 }
 0x120   : > { %6976 = vmatmul.mubr.msk.bf16.gmra.mrb[112].mxu0 %vm307_vm1, %v8068_v20  ;;  %v8487_v32 = vadd.f32 %v2710_v63, %v2709_v61  ;;  %v6799_v14 = vpop.f32.mrb[8].mxu1 }
 0x121   : > { %6979 = vmatprep.mubr.msk.bf16.mxu0 %vm307_vm1, %v8070_v13  ;;  %v2795_v40 = vsel %vm307_vm1, %v6799_v14, 0.0  ;;  %v1315_v4 = vpop.f32.mrb[9].mxu1  ;;  %v907_v14 = vrot.slane %v592_v9, 7 }
 0x122   : > { %v2761_v62 = vsel %vm307_vm1, %v1315_v4, 0.0  ;;  %v6800_v34 = vpop.f32.mrb[10].mxu1 }
 0x123   : > { %v6765_v50 = vpop.f32.mrb[8].mxu0  ;;  %v2812_v23 = vsel %vm307_vm1, %v6800_v34, 0.0  ;;  %v1318_v7 = vpop.f32.mrb[11].mxu1 }
 0x124   : > { %v2794_v53 = vsel %vm307_vm1, %v6765_v50, 0.0  ;;  %v1103_v29 = vpop.f32.mrb[9].mxu0  ;;  %v2778_v38 = vsel %vm307_vm1, %v1318_v7, 0.0 }
 0x125   : > { %v2760_v20 = vsel %vm307_vm1, %v1103_v29, 0.0  ;;  %v6766_v25 = vpop.f32.mrb[10].mxu0  ;;  %v8497_v10 = vadd.f32 %v2795_v40, %v2794_v53  ;;  %7014 = vmatmul.mubr.msk.bf16.gmra.mrb[116].mxu1 %vm307_vm1, %v11150_v8  ;;  %v908_v40 = vrot.slane %v8392_v15, 7 }
 0x126   : > { %v2811_v13 = vsel %vm307_vm1, %v6766_v25, 0.0  ;;  %v1106_v21 = vpop.f32.mrb[11].mxu0  ;;  %v8502_v42 = vadd.f32 %v2761_v62, %v2760_v20  ;;  %7017 = vmatprep.mubr.msk.bf16.mxu1 %vm307_vm1, %v11151_v22  ;;  %v910_v62 = vrot.slane %v8394_v47, 7 }
 0x127   : > { %v2777_v57 = vsel %vm307_vm1, %v1106_v21, 0.0  ;;  %v8507_v35 = vadd.f32 %v2812_v23, %v2811_v13 }
 0x128   : > { %6980 = vmatmul.mubr.msk.bf16.gmra.mrb[116].mxu0 %vm307_vm1, %v8100_v37  ;;  %v8511_v31 = vadd.f32 %v2778_v38, %v2777_v57  ;;  %v6803_v58 = vpop.f32.mrb[12].mxu1  ;;  %v911_v13 = vsel %vm644_vm3, %v908_v40, %v910_v62 }
 0x129   : > { %6983 = vmatprep.mubr.msk.bf16.mxu0 %vm307_vm1, %v8102_v30  ;;  %v2863_v8 = vsel %vm307_vm1, %v6803_v58, 0.0  ;;  %v1331_v16 = vpop.f32.mrb[13].mxu1 }
 0x12a   : > { %v2829_v63 = vsel %vm307_vm1, %v1331_v16, 0.0  ;;  %v6804_v17 = vpop.f32.mrb[14].mxu1 }
 0x12b   : > { %v6769_v49 = vpop.f32.mrb[12].mxu0  ;;  %v2880_v61 = vsel %vm307_vm1, %v6804_v17, 0.0  ;;  %v1334_v37 = vpop.f32.mrb[15].mxu1 }
 0x12c   : > { %v2862_v22 = vsel %vm307_vm1, %v6769_v49, 0.0  ;;  %v1119_v39 = vpop.f32.mrb[13].mxu0  ;;  %v2846_v50 = vsel %vm307_vm1, %v1334_v37, 0.0 }
 0x12d   : > { %v2828_v4 = vsel %vm307_vm1, %v1119_v39, 0.0  ;;  %v6770_v30 = vpop.f32.mrb[14].mxu0  ;;  %v8523_v34 = vadd.f32 %v2863_v8, %v2862_v22  ;;  %7018 = vmatmul.mubr.msk.bf16.gmra.mrb[120].mxu1 %vm307_vm1, %v8122_v55  ;;  %v909_v55 = vsel %vm644_vm3, %v907_v14, %v908_v40 }
 0x12e   : > { %v2879_v53 = vsel %vm307_vm1, %v6770_v30, 0.0  ;;  %v1122_v29 = vpop.f32.mrb[15].mxu0  ;;  %v8528_v23 = vadd.f32 %v2829_v63, %v2828_v4  ;;  %7021 = vmatprep.mubr.msk.bf16.mxu1 %vm307_vm1, %v8400_v1  ;;  %v974_v1 = vpack.c.bf16 %v8394_v47, %v8392_v15  ;;  %v973_v63 = vpack.c.bf16 %v911_v13, %v909_v55 }
 0x12f   : > { %v2845_v7 = vsel %vm307_vm1, %v1122_v29, 0.0  ;;  %v8533_v20 = vadd.f32 %v2880_v61, %v2879_v53 }
 0x130   : > { %6984 = vmatmul.mubr.msk.bf16.gmra.mrb[120].mxu0 %vm307_vm1, %v8126_v33  ;;  %v8537_v25 = vadd.f32 %v2846_v50, %v2845_v7  ;;  %v6807_v38 = vpop.f32.mrb[16].mxu1 }
 0x131   : > { %6987 = vmatprep.mubr.msk.bf16.mxu0 %vm307_vm1, %v8310_v43  ;;  %v2931_v21 = vsel %vm307_vm1, %v6807_v38, 0.0  ;;  %v1347_v57 = vpop.f32.mrb[17].mxu1 }
 0x132   : > { %v2897_v9 = vsel %vm307_vm1, %v1347_v57, 0.0  ;;  %v6808_v33 = vpop.f32.mrb[18].mxu1 }
 0x133   : > { %v6773_v58 = vpop.f32.mrb[16].mxu0  ;;  %v2948_v49 = vsel %vm307_vm1, %v6808_v33, 0.0  ;;  %v1350_v43 = vpop.f32.mrb[19].mxu1 }
 0x134   : > { %v2930_v8 = vsel %vm307_vm1, %v6773_v58, 0.0  ;;  %v1135_v16 = vpop.f32.mrb[17].mxu0  ;;  %v2914_v39 = vsel %vm307_vm1, %v1350_v43, 0.0 }
 0x135   : > { %v2896_v17 = vsel %vm307_vm1, %v1135_v16, 0.0  ;;  %v6774_v22 = vpop.f32.mrb[18].mxu0  ;;  %v8551_v61 = vadd.f32 %v2931_v21, %v2930_v8  ;;  %7022 = vmatmul.mubr.msk.bf16.gmra.mrb[124].mxu1 %vm307_vm1, %v974_v1 }
 0x136   : > { %v2947_v15 = vsel %vm307_vm1, %v6774_v22, 0.0  ;;  %v1138_v47 = vpop.f32.mrb[19].mxu0  ;;  %v8555_v37 = vadd.f32 %v2897_v9, %v2896_v17 }
 0x137   : > { %v2913_v14 = vsel %vm307_vm1, %v1138_v47, 0.0  ;;  %v8558_v40 = vadd.f32 %v2948_v49, %v2947_v15 }
 0x138   : > { %6988 = vmatmul.mubr.msk.bf16.gmra.mrb[124].mxu0 %vm307_vm1, %v973_v63  ;;  %v8561_v4 = vadd.f32 %v2914_v39, %v2913_v14  ;;  %v6811_v30 = vpop.f32.mrb[20].mxu1 }
 0x139   : > { %7027 = vmatprep.mubr.msk.bf16.mxu0 %vm307_vm1, %v8152_v18  ;;  %v2999_v50 = vsel %vm307_vm1, %v6811_v30, 0.0  ;;  %v1363_v62 = vpop.f32.mrb[21].mxu1 }
 0x13a   : > { %v2965_v29 = vsel %vm307_vm1, %v1363_v62, 0.0  ;;  %v6812_v7 = vpop.f32.mrb[22].mxu1 }
 0x13b   : > { %v6777_v53 = vpop.f32.mrb[20].mxu0  ;;  %v3016_v13 = vsel %vm307_vm1, %v6812_v7, 0.0  ;;  %v1366_v21 = vpop.f32.mrb[23].mxu1 }
 0x13c   : > { %v2998_v38 = vsel %vm307_vm1, %v6777_v53, 0.0  ;;  %v1151_v55 = vpop.f32.mrb[21].mxu0  ;;  %v2982_v58 = vsel %vm307_vm1, %v1366_v21, 0.0 }
 0x13d   : > { %v2964_v57 = vsel %vm307_vm1, %v1151_v55, 0.0  ;;  %v6778_v1 = vpop.f32.mrb[22].mxu0  ;;  %v8571_v9 = vadd.f32 %v2999_v50, %v2998_v38 }
 0x13e   : > { %v3015_v18 = vsel %vm307_vm1, %v6778_v1, 0.0  ;;  %v1154_v33 = vpop.f32.mrb[23].mxu0  ;;  %v8574_v8 = vadd.f32 %v2965_v29, %v2964_v57 }
 0x13f   : > { %v2981_v16 = vsel %vm307_vm1, %v1154_v33, 0.0  ;;  %v8577_v49 = vadd.f32 %v3016_v13, %v3015_v18 }
 0x140   : > { %7028 = vmatmul.mubr.msk.bf16.vlgmr.msra.gmra.mrb[128].mxu0 %vm307_vm1, %v8186_v27  ;;  %v8581_v43 = vadd.f32 %v2982_v58, %v2981_v16  ;;  %v6815_v63 = vpop.f32.mrb[24].mxu1 }
 0x141   : > { %7031 = vmatprep.mubr.msk.bf16.mxu0 %vm307_vm1, %v8188_v41  ;;  %v3067_v17 = vsel %vm307_vm1, %v6815_v63, 0.0  ;;  %v1379_v22 = vpop.f32.mrb[25].mxu1 }
 0x142   : > { %v3033_v15 = vsel %vm307_vm1, %v1379_v22, 0.0  ;;  %v6816_v47 = vpop.f32.mrb[26].mxu1 }
 0x143   : > { %v6781_v39 = vpop.f32.mrb[24].mxu0  ;;  %v3084_v50 = vsel %vm307_vm1, %v6816_v47, 0.0  ;;  %v1382_v62 = vpop.f32.mrb[27].mxu1 }
 0x144   : > { %v3066_v14 = vsel %vm307_vm1, %v6781_v39, 0.0  ;;  %v1167_v30 = vpop.f32.mrb[25].mxu0  ;;  %v3050_v29 = vsel %vm307_vm1, %v1382_v62, 0.0 }
 0x145   : > { %v3032_v27 = vsel %vm307_vm1, %v1167_v30, 0.0  ;;  %v6782_v53 = vpop.f32.mrb[26].mxu0  ;;  %v8591_v7 = vadd.f32 %v3067_v17, %v3066_v14 }
 0x146   : > { %v3083_v41 = vsel %vm307_vm1, %v6782_v53, 0.0  ;;  %v1170_v38 = vpop.f32.mrb[27].mxu0  ;;  %v8594_v55 = vadd.f32 %v3033_v15, %v3032_v27 }
 0x147   : > { %v3049_v13 = vsel %vm307_vm1, %v1170_v38, 0.0  ;;  %v8597_v21 = vadd.f32 %v3084_v50, %v3083_v41 }
 0x148   : > { %7032 = vmatmul.mubr.msk.bf16.gmra.mrb[132].mxu0 %vm307_vm1, %v8206_v3  ;;  %v8601_v57 = vadd.f32 %v3050_v29, %v3049_v13  ;;  %v6819_v1 = vpop.f32.mrb[28].mxu1 }
 0x149   : > { %7035 = vmatprep.mubr.msk.bf16.mxu0 %vm307_vm1, %v8208_v26  ;;  %v3135_v58 = vsel %vm307_vm1, %v6819_v1, 0.0  ;;  %v1395_v18 = vpop.f32.mrb[29].mxu1 }
 0x14a   : > { %v3101_v16 = vsel %vm307_vm1, %v1395_v18, 0.0  ;;  %v6820_v63 = vpop.f32.mrb[30].mxu1 }
 0x14b   : > { %v6785_v33 = vpop.f32.mrb[28].mxu0  ;;  %v3152_v39 = vsel %vm307_vm1, %v6820_v63, 0.0  ;;  %v1398_v15 = vpop.f32.mrb[31].mxu1 }
 0x14c   : > { %v3134_v17 = vsel %vm307_vm1, %v6785_v33, 0.0  ;;  %v1183_v22 = vpop.f32.mrb[29].mxu0  ;;  %v3118_v14 = vsel %vm307_vm1, %v1398_v15, 0.0 }
 0x14d   : > { %v3100_v3 = vsel %vm307_vm1, %v1183_v22, 0.0  ;;  %v6786_v47 = vpop.f32.mrb[30].mxu0  ;;  %v8611_v30 = vadd.f32 %v3135_v58, %v3134_v17 }
 0x14e   : > { %v3151_v26 = vsel %vm307_vm1, %v6786_v47, 0.0  ;;  %v1186_v50 = vpop.f32.mrb[31].mxu0  ;;  %v8614_v62 = vadd.f32 %v3101_v16, %v3100_v3 }
 0x14f   : > { %v3117_v27 = vsel %vm307_vm1, %v1186_v50, 0.0  ;;  %v8617_v53 = vadd.f32 %v3152_v39, %v3151_v26 }
 0x150   : > { %7036 = vmatmul.mubr.msk.bf16.gmra.mrb[136].mxu0 %vm307_vm1, %v8226_v45  ;;  %v8621_v29 = vadd.f32 %v3118_v14, %v3117_v27  ;;  %v6859_v41 = vpop.f32.mrb[32].mxu1 }
 0x151   : > { %7039 = vmatprep.mubr.msk.bf16.mxu0 %vm307_vm1, %v8228_v51  ;;  %v1662_v38 = vpop.f32.mrb[33].mxu1  ;;  %v2663_v33 = vsel %vm307_vm1, %v6859_v41, 0.0 }
 0x152   : > { %v6860_v1 = vpop.f32.mrb[34].mxu1  ;;  %v2629_v22 = vsel %vm307_vm1, %v1662_v38, 0.0 }
 0x153   : > { %v6825_v13 = vpop.f32.mrb[32].mxu0  ;;  %v1665_v16 = vpop.f32.mrb[35].mxu1  ;;  %v2680_v3 = vsel %vm307_vm1, %v6860_v1, 0.0 }
 0x154   : > { %v2661_v58 = vsel %vm307_vm1, %v6825_v13, 0.0  ;;  %v1495_v18 = vpop.f32.mrb[33].mxu0 }
 0x155   : > { %v2662_v63 = vadd.f32 %v2661_v58, %v8449_v54  ;;  %v2627_v17 = vsel %vm307_vm1, %v1495_v18, 0.0  ;;  %v6826_v45 = vpop.f32.mrb[34].mxu0  ;;  %v2646_v54 = vsel %vm307_vm1, %v1665_v16, 0.0 }
 0x156   : > { %v2628_v39 = vadd.f32 %v2627_v17, %v8454_v19  ;;  %v2678_v51 = vsel %vm307_vm1, %v6826_v45, 0.0  ;;  %v1498_v15 = vpop.f32.mrb[35].mxu0 }
 0x157   : > { %v2679_v47 = vadd.f32 %v2678_v51, %v8459_v5  ;;  %v8634_v14 = vadd.f32 %v2663_v33, %v2662_v63  ;;  %v2644_v26 = vsel %vm307_vm1, %v1498_v15, 0.0 }
 0x158   : > { %v2645_v50 = vadd.f32 %v2644_v26, %v8463_v46  ;;  %v8639_v27 = vadd.f32 %v2629_v22, %v2628_v39  ;;  %7040 = vmatmul.mubr.msk.bf16.gmra.mrb[140].mxu0 %vm307_vm1, %v8246_v52  ;;  %v6863_v41 = vpop.f32.mrb[36].mxu1 }
 0x159   : > { %v8643_v19 = vadd.f32 %v2680_v3, %v2679_v47  ;;  %7043 = vmatprep.mubr.msk.bf16.mxu0 %vm307_vm1, %v8248_v60  ;;  %v1678_v38 = vpop.f32.mrb[37].mxu1  ;;  %v2731_v46 = vsel %vm307_vm1, %v6863_v41, 0.0 }
 0x15a   : > { %v8647_v5 = vadd.f32 %v2646_v54, %v2645_v50  ;;  %v6864_v1 = vpop.f32.mrb[38].mxu1  ;;  %v2697_v17 = vsel %vm307_vm1, %v1678_v38, 0.0 }
 0x15b   : > { %v6829_v13 = vpop.f32.mrb[36].mxu0  ;;  %v1681_v33 = vpop.f32.mrb[39].mxu1  ;;  %v2748_v39 = vsel %vm307_vm1, %v6864_v1, 0.0 }
 0x15c   : > { %v2729_v58 = vsel %vm307_vm1, %v6829_v13, 0.0  ;;  %v1511_v18 = vpop.f32.mrb[37].mxu0 }
 0x15d   : > { %v2730_v16 = vadd.f32 %v2729_v58, %v8473_v0  ;;  %v2695_v52 = vsel %vm307_vm1, %v1511_v18, 0.0  ;;  %v6830_v63 = vpop.f32.mrb[38].mxu0  ;;  %v2714_v0 = vsel %vm307_vm1, %v1681_v33, 0.0 }
 0x15e   : > { %v2696_v60 = vadd.f32 %v2695_v52, %v8478_v2  ;;  %v2746_v45 = vsel %vm307_vm1, %v6830_v63, 0.0  ;;  %v1514_v22 = vpop.f32.mrb[39].mxu0 }
 0x15f   : > { %v2747_v51 = vadd.f32 %v2746_v45, %v8483_v48  ;;  %v8658_v15 = vadd.f32 %v2731_v46, %v2730_v16  ;;  %v2712_v3 = vsel %vm307_vm1, %v1514_v22, 0.0 }
 0x160   : > { %v2713_v47 = vadd.f32 %v2712_v3, %v8487_v32  ;;  %v8663_v26 = vadd.f32 %v2697_v17, %v2696_v60  ;;  %7044 = vmatmul.mubr.msk.bf16.gmra.mrb[144].mxu0 %vm307_vm1, %v8266_v36  ;;  %v6867_v54 = vpop.f32.mrb[40].mxu1 }
 0x161   : > { %v8667_v2 = vadd.f32 %v2748_v39, %v2747_v51  ;;  %7047 = vmatprep.mubr.msk.bf16.mxu0 %vm307_vm1, %v8268_v6  ;;  %v1694_v50 = vpop.f32.mrb[41].mxu1  ;;  %v2799_v32 = vsel %vm307_vm1, %v6867_v54, 0.0 }
 0x162   : > { %v8671_v48 = vadd.f32 %v2714_v0, %v2713_v47  ;;  %v6868_v38 = vpop.f32.mrb[42].mxu1  ;;  %v2765_v33 = vsel %vm307_vm1, %v1694_v50, 0.0 }
 0x163   : > { %v6833_v41 = vpop.f32.mrb[40].mxu0  ;;  %v1697_v58 = vpop.f32.mrb[43].mxu1  ;;  %v2816_v63 = vsel %vm307_vm1, %v6868_v38, 0.0 }
 0x164   : > { %v2797_v13 = vsel %vm307_vm1, %v6833_v41, 0.0  ;;  %v1527_v1 = vpop.f32.mrb[41].mxu0 }
 0x165   : > { %v2798_v18 = vadd.f32 %v2797_v13, %v8497_v10  ;;  %v2763_v36 = vsel %vm307_vm1, %v1527_v1, 0.0  ;;  %v6834_v46 = vpop.f32.mrb[42].mxu0  ;;  %v2782_v10 = vsel %vm307_vm1, %v1697_v58, 0.0 }
 0x166   : > { %v2764_v6 = vadd.f32 %v2763_v36, %v8502_v42  ;;  %v2814_v16 = vsel %vm307_vm1, %v6834_v46, 0.0  ;;  %v1530_v52 = vpop.f32.mrb[43].mxu0 }
 0x167   : > { %v2815_v17 = vadd.f32 %v2814_v16, %v8507_v35  ;;  %v8682_v60 = vadd.f32 %v2799_v32, %v2798_v18  ;;  %v2780_v45 = vsel %vm307_vm1, %v1530_v52, 0.0 }
 0x168   : > { %v2781_v22 = vadd.f32 %v2780_v45, %v8511_v31  ;;  %v8687_v39 = vadd.f32 %v2765_v33, %v2764_v6  ;;  %7048 = vmatmul.mubr.msk.bf16.gmra.mrb[148].mxu0 %vm307_vm1, %v8292_v28  ;;  %v6871_v51 = vpop.f32.mrb[44].mxu1 }
 0x169   : > { %v8691_v42 = vadd.f32 %v2816_v63, %v2815_v17  ;;  %7051 = vmatprep.mubr.msk.bf16.mxu0 %vm307_vm1, %v8294_v24  ;;  %v1710_v3 = vpop.f32.mrb[45].mxu1  ;;  %v2867_v31 = vsel %vm307_vm1, %v6871_v51, 0.0  ;;  %v3792_v24 = vld [vmem:[%s11046_s2] sm:$0x3] }
 0x16a   : > { %v8695_v35 = vadd.f32 %v2782_v10, %v2781_v22  ;;  %v6872_v47 = vpop.f32.mrb[46].mxu1  ;;  %v2833_v1 = vsel %vm307_vm1, %v1710_v3, 0.0  ;;  %7374 = vmatprep.subr.msk.bf16.mxu1 %vm1033_vm0, %v3792_v24 }
 0x16b   : > { %v6837_v0 = vpop.f32.mrb[44].mxu0  ;;  %v1713_v41 = vpop.f32.mrb[47].mxu1  ;;  %v2884_v36 = vsel %vm307_vm1, %v6872_v47, 0.0 }
 0x16c   : > { %v2865_v54 = vsel %vm307_vm1, %v6837_v0, 0.0  ;;  %v1543_v50 = vpop.f32.mrb[45].mxu0  ;;  %v2850_v16 = vsel %vm307_vm1, %v1713_v41, 0.0 }
 0x16d   : > { %v2866_v38 = vadd.f32 %v2865_v54, %v8523_v34  ;;  %v2831_v28 = vsel %vm307_vm1, %v1543_v50, 0.0  ;;  %v6838_v13 = vpop.f32.mrb[46].mxu0  ;;  %v3850_v34 = vsel %vm1033_vm0, %v3792_v24, 0 }
 0x16e   : > { %v2832_v32 = vadd.f32 %v2831_v28, %v8528_v23  ;;  %v2882_v58 = vsel %vm307_vm1, %v6838_v13, 0.0  ;;  %v1546_v18 = vpop.f32.mrb[47].mxu0  ;;  %7060 = vmatpush3.bf16.msra.mxu1 %v3850_v34 }
 0x16f   : > { %v2883_v46 = vadd.f32 %v2882_v58, %v8533_v20  ;;  %v8711_v33 = vadd.f32 %v2867_v31, %v2866_v38  ;;  %v2848_v6 = vsel %vm307_vm1, %v1546_v18, 0.0 }
 0x170   : > { %v2849_v23 = vadd.f32 %v2848_v6, %v8537_v25  ;;  %v8716_v52 = vadd.f32 %v2833_v1, %v2832_v32  ;;  %7052 = vmatmul.mubr.msk.bf16.gmra.mrb[152].mxu0 %vm307_vm1, %v8312_v12  ;;  %v6875_v17 = vpop.f32.mrb[48].mxu1 }
 0x171   : > { %v8720_v63 = vadd.f32 %v2884_v36, %v2883_v46  ;;  %7055 = vmatprep.mubr.msk.bf16.mxu0 %vm307_vm1, %v8390_v11  ;;  %v1726_v45 = vpop.f32.mrb[49].mxu1  ;;  %v2935_v25 = vsel %vm307_vm1, %v6875_v17, 0.0 }
 0x172   : > { %v8724_v20 = vadd.f32 %v2850_v16, %v2849_v23  ;;  %v6876_v22 = vpop.f32.mrb[50].mxu1  ;;  %v2901_v50 = vsel %vm307_vm1, %v1726_v45, 0.0 }
 0x173   : > { %v6841_v10 = vpop.f32.mrb[48].mxu0  ;;  %v1729_v0 = vpop.f32.mrb[51].mxu1  ;;  %v2952_v38 = vsel %vm307_vm1, %v6876_v22, 0.0 }
 0x174   : > { %v2933_v51 = vsel %vm307_vm1, %v6841_v10, 0.0  ;;  %v1559_v3 = vpop.f32.mrb[49].mxu0 }
 0x175   : > { %v2934_v47 = vadd.f32 %v2933_v51, %v8551_v61  ;;  %v2899_v12 = vsel %vm307_vm1, %v1559_v3, 0.0  ;;  %v6842_v54 = vpop.f32.mrb[50].mxu0  ;;  %v2918_v61 = vsel %vm307_vm1, %v1729_v0, 0.0 }
 0x176   : > { %v2900_v11 = vadd.f32 %v2899_v12, %v8555_v37  ;;  %v2950_v31 = vsel %vm307_vm1, %v6842_v54, 0.0  ;;  %v1562_v41 = vpop.f32.mrb[51].mxu0 }
 0x177   : > { %v2951_v28 = vadd.f32 %v2950_v31, %v8558_v40  ;;  %v8735_v13 = vadd.f32 %v2935_v25, %v2934_v47  ;;  %v2916_v1 = vsel %vm307_vm1, %v1562_v41, 0.0 }
 0x178   : > { %v2917_v24 = vadd.f32 %v2916_v1, %v8561_v4  ;;  %v8740_v32 = vadd.f32 %v2901_v50, %v2900_v11  ;;  %7056 = vmatmul.mubr.msk.bf16.gmra.mrb[156].mxu0 %vm307_vm1, %v975_v56  ;;  %v6879_v58 = vpop.f32.mrb[52].mxu1 }
 0x179   : > { %v8746_v37 = vadd.f32 %v2952_v38, %v2951_v28  ;;  %v1742_v40 = vpop.f32.mrb[53].mxu1  ;;  %v3003_v4 = vsel %vm307_vm1, %v6879_v58, 0.0 }
 0x17a   : > { %v8748_v18 = vadd.f32 %v2918_v61, %v2917_v24  ;;  %v6880_v34 = vpop.f32.mrb[54].mxu1  ;;  %v2969_v56 = vsel %vm307_vm1, %v1742_v40, 0.0 }
 0x17b   : > { %v6845_v36 = vpop.f32.mrb[52].mxu0  ;;  %v1745_v16 = vpop.f32.mrb[55].mxu1  ;;  %v3020_v22 = vsel %vm307_vm1, %v6880_v34, 0.0 }
 0x17c   : > { %v3001_v46 = vsel %vm307_vm1, %v6845_v36, 0.0  ;;  %v1575_v6 = vpop.f32.mrb[53].mxu0 }
 0x17d   : > { %v3002_v23 = vadd.f32 %v3001_v46, %v8571_v9  ;;  %v2967_v44 = vsel %vm307_vm1, %v1575_v6, 0.0  ;;  %v6846_v59 = vpop.f32.mrb[54].mxu0  ;;  %v2986_v9 = vsel %vm307_vm1, %v1745_v16, 0.0 }
 0x17e   : > { %v2968_v17 = vadd.f32 %v2967_v44, %v8574_v8  ;;  %v3018_v45 = vsel %vm307_vm1, %v6846_v59, 0.0  ;;  %v1578_v10 = vpop.f32.mrb[55].mxu0 }
 0x17f   : > { %v3019_v51 = vadd.f32 %v3018_v45, %v8577_v49  ;;  %v8759_v3 = vadd.f32 %v3003_v4, %v3002_v23  ;;  %v2984_v25 = vsel %vm307_vm1, %v1578_v10, 0.0 }
 0x180   : > { %v2985_v0 = vadd.f32 %v2984_v25, %v8581_v43  ;;  %v8764_v47 = vadd.f32 %v2969_v56, %v2968_v17  ;;  %v6883_v8 = vpop.f32.mrb[56].mxu1 }
 0x181   : > { %v8766_v12 = vadd.f32 %v3020_v22, %v3019_v51  ;;  %v1758_v50 = vpop.f32.mrb[57].mxu1  ;;  %v3071_v38 = vsel %vm307_vm1, %v6883_v8, 0.0 }
 0x182   : > { %v8768_v54 = vadd.f32 %v2986_v9, %v2985_v0  ;;  %v6884_v31 = vpop.f32.mrb[58].mxu1  ;;  %v3037_v24 = vsel %vm307_vm1, %v1758_v50, 0.0 }
 0x183   : > { %v6849_v11 = vpop.f32.mrb[56].mxu0  ;;  %v1761_v28 = vpop.f32.mrb[59].mxu1  ;;  %v3088_v34 = vsel %vm307_vm1, %v6884_v31, 0.0 }
 0x184   : > { %v3069_v49 = vsel %vm307_vm1, %v6849_v11, 0.0  ;;  %v1591_v41 = vpop.f32.mrb[57].mxu0 }
 0x185   : > { %v3070_v1 = vadd.f32 %v3069_v49, %v8591_v7  ;;  %v3035_v43 = vsel %vm307_vm1, %v1591_v41, 0.0  ;;  %v6850_v61 = vpop.f32.mrb[58].mxu0  ;;  %v3054_v7 = vsel %vm307_vm1, %v1761_v28, 0.0 }
 0x186   : > { %v3036_v58 = vadd.f32 %v3035_v43, %v8594_v55  ;;  %v3086_v40 = vsel %vm307_vm1, %v6850_v61, 0.0  ;;  %v1594_v36 = vpop.f32.mrb[59].mxu0 }
 0x187   : > { %v3087_v46 = vadd.f32 %v3086_v40, %v8597_v21  ;;  %v8779_v6 = vadd.f32 %v3071_v38, %v3070_v1  ;;  %v3052_v4 = vsel %vm307_vm1, %v1594_v36, 0.0 }
 0x188   : > { %v3053_v16 = vadd.f32 %v3052_v4, %v8601_v57  ;;  %v8784_v23 = vadd.f32 %v3037_v24, %v3036_v58  ;;  %v6887_v55 = vpop.f32.mrb[60].mxu1 }
 0x189   : > { %v8786_v44 = vadd.f32 %v3088_v34, %v3087_v46  ;;  %v1774_v56 = vpop.f32.mrb[61].mxu1  ;;  %v3139_v22 = vsel %vm307_vm1, %v6887_v55, 0.0 }
 0x18a   : > { %v8788_v59 = vadd.f32 %v3054_v7, %v3053_v16  ;;  %v6888_v45 = vpop.f32.mrb[62].mxu1  ;;  %v3105_v0 = vsel %vm307_vm1, %v1774_v56, 0.0 }
 0x18b   : > { %v6853_v17 = vpop.f32.mrb[60].mxu0  ;;  %v1777_v51 = vpop.f32.mrb[63].mxu1  ;;  %v3156_v31 = vsel %vm307_vm1, %v6888_v45, 0.0 }
 0x18c   : > { %v3137_v21 = vsel %vm307_vm1, %v6853_v17, 0.0  ;;  %v1607_v10 = vpop.f32.mrb[61].mxu0 }
 0x18d   : > { %v3138_v25 = vadd.f32 %v3137_v21, %v8611_v30  ;;  %v3103_v57 = vsel %vm307_vm1, %v1607_v10, 0.0  ;;  %v6854_v9 = vpop.f32.mrb[62].mxu0  ;;  %v3122_v30 = vsel %vm307_vm1, %v1777_v51, 0.0 }
 0x18e   : > { %v3104_v8 = vadd.f32 %v3103_v57, %v8614_v62  ;;  %v3154_v50 = vsel %vm307_vm1, %v6854_v9, 0.0  ;;  %v1610_v11 = vpop.f32.mrb[63].mxu0 }
 0x18f   : > { %v3155_v49 = vadd.f32 %v3154_v50, %v8617_v53  ;;  %v8799_v41 = vadd.f32 %v3139_v22, %v3138_v25  ;;  %v3120_v38 = vsel %vm307_vm1, %v1610_v11, 0.0 }
 0x190   : > { %v3121_v28 = vadd.f32 %v3120_v38, %v8621_v29  ;;  %v8804_v1 = vadd.f32 %v3105_v0, %v3104_v8  ;;  %v6927_v62 = vpop.f32.mrb[64].mxu1 }
 0x191   : > { %v8806_v43 = vadd.f32 %v3156_v31, %v3155_v49  ;;  %v1996_v24 = vpop.f32.mrb[65].mxu1  ;;  %v2667_v34 = vsel %vm307_vm1, %v6927_v62, 0.0 }
 0x192   : > { %v8808_v61 = vadd.f32 %v3122_v30, %v3121_v28  ;;  %v6928_v40 = vpop.f32.mrb[66].mxu1  ;;  %v2633_v16 = vsel %vm307_vm1, %v1996_v24, 0.0 }
 0x193   : > { %v6893_v58 = vpop.f32.mrb[64].mxu0  ;;  %v1999_v46 = vpop.f32.mrb[67].mxu1  ;;  %v2684_v45 = vsel %vm307_vm1, %v6928_v40, 0.0 }
 0x194   : > { %v2665_v53 = vsel %vm307_vm1, %v6893_v58, 0.0  ;;  %v1829_v36 = vpop.f32.mrb[65].mxu0 }
 0x195   : > { %v2666_v4 = vadd.f32 %v2665_v53, %v8634_v14  ;;  %v2631_v29 = vsel %vm307_vm1, %v1829_v36, 0.0  ;;  %v6894_v7 = vpop.f32.mrb[66].mxu0  ;;  %v2650_v14 = vsel %vm307_vm1, %v1999_v46, 0.0 }
 0x196   : > { %v2632_v55 = vadd.f32 %v2631_v29, %v8639_v27  ;;  %v2682_v56 = vsel %vm307_vm1, %v6894_v7, 0.0  ;;  %v1832_v17 = vpop.f32.mrb[67].mxu0 }
 0x197   : > { %v2683_v21 = vadd.f32 %v2682_v56, %v8643_v19  ;;  %v8819_v10 = vadd.f32 %v2667_v34, %v2666_v4  ;;  %v2648_v22 = vsel %vm307_vm1, %v1832_v17, 0.0 }
 0x198   : > { %v2649_v51 = vadd.f32 %v2648_v22, %v8647_v5  ;;  %v8824_v25 = vadd.f32 %v2633_v16, %v2632_v55  ;;  %v6931_v27 = vpop.f32.mrb[68].mxu1 }
 0x199   : > { %v8826_v57 = vadd.f32 %v2684_v45, %v2683_v21  ;;  %v2012_v0 = vpop.f32.mrb[69].mxu1  ;;  %v2735_v31 = vsel %vm307_vm1, %v6931_v27, 0.0 }
 0x19a   : > { %v8828_v9 = vadd.f32 %v2650_v14, %v2649_v51  ;;  %v6932_v50 = vpop.f32.mrb[70].mxu1  ;;  %v2701_v28 = vsel %vm307_vm1, %v2012_v0, 0.0 }
 0x19b   : > { %v6897_v8 = vpop.f32.mrb[68].mxu0  ;;  %v2015_v49 = vpop.f32.mrb[71].mxu1  ;;  %v2752_v40 = vsel %vm307_vm1, %v6932_v50, 0.0  ;;  %v8862_v50 = vld [vmem:[#allocation2 + $0x10] sm:$0xff] }
 0x19c   : > { %v2733_v19 = vsel %vm307_vm1, %v6897_v8, 0.0  ;;  %v1845_v11 = vpop.f32.mrb[69].mxu0  ;;  %v8860_v8 = vld [vmem:[#allocation2 + $0x8] sm:$0xff] }
 0x19d   : > { %v2734_v38 = vadd.f32 %v2733_v19, %v8658_v15  ;;  %v2699_v5 = vsel %vm307_vm1, %v1845_v11, 0.0  ;;  %v6898_v30 = vpop.f32.mrb[70].mxu0  ;;  %v2718_v15 = vsel %vm307_vm1, %v2015_v49, 0.0 }
 0x19e   : > { %v2700_v62 = vadd.f32 %v2699_v5, %v8663_v26  ;;  %v2750_v24 = vsel %vm307_vm1, %v6898_v30, 0.0  ;;  %v1848_v58 = vpop.f32.mrb[71].mxu0 }
 0x19f   : > { %v2751_v53 = vadd.f32 %v2750_v24, %v8667_v2  ;;  %v8839_v36 = vadd.f32 %v2735_v31, %v2734_v38  ;;  %v2716_v34 = vsel %vm307_vm1, %v1848_v58, 0.0 }
 0x1a0   : > { %v2717_v46 = vadd.f32 %v2716_v34, %v8671_v48  ;;  %v8844_v4 = vadd.f32 %v2701_v28, %v2700_v62  ;;  %v6935_v26 = vpop.f32.mrb[72].mxu1  ;;  %v3793_v48 = vld [vmem:[%s11046_s2 + $0x2] sm:$0x3]  ;;  %v3754_v28 = vpack.c.bf16 %v8862_v50, %v8860_v8 }
 0x1a1   : > { %v8846_v29 = vadd.f32 %v2752_v40, %v2751_v53  ;;  %v2028_v16 = vpop.f32.mrb[73].mxu1  ;;  %v2803_v45 = vsel %vm307_vm1, %v6935_v26, 0.0  ;;  %7375 = vmatprep.subr.msk.bf16.mxu0 %vm1033_vm0, %v3793_v48  ;;  %v4062_v0 = vsel %vm1033_vm0, %v3793_v48, 0 }
 0x1a2   : > { %v8848_v7 = vadd.f32 %v2718_v15, %v2717_v46  ;;  %v6936_v56 = vpop.f32.mrb[74].mxu1  ;;  %v2769_v27 = vsel %vm307_vm1, %v2028_v16, 0.0  ;;  %7094 = vmatpush3.bf16.msra.mxu0 %v4062_v0  ;;  %7095 = vmatprep.mubr.msk.bf16.mxu0 %vm307_vm1, %v3754_v28  ;;  %v3463_v15 = vrot.slane %v8860_v8, 7 }
 0x1a3   : > { %v6901_v55 = vpop.f32.mrb[72].mxu0  ;;  %v2031_v21 = vpop.f32.mrb[75].mxu1 }
 0x1a4   : > { %v2801_v2 = vsel %vm307_vm1, %v6901_v55, 0.0  ;;  %v1861_v17 = vpop.f32.mrb[73].mxu0  ;;  %v2786_v49 = vsel %vm307_vm1, %v2031_v21, 0.0  ;;  %v3465_v55 = vrot.slane %v8862_v50, 7 }
 0x1a5   : > { %v2802_v22 = vadd.f32 %v2801_v2, %v8682_v60  ;;  %v2767_v14 = vsel %vm307_vm1, %v1861_v17, 0.0  ;;  %v6902_v51 = vpop.f32.mrb[74].mxu0  ;;  %v2820_v60 = vsel %vm307_vm1, %v6936_v56, 0.0  ;;  %v3342_v56 = vld [vmem:[#allocation2] sm:$0xff] }
 0x1a6   : > { %v2768_v19 = vadd.f32 %v2767_v14, %v8687_v39  ;;  %v2818_v11 = vsel %vm307_vm1, %v6902_v51, 0.0  ;;  %v1864_v31 = vpop.f32.mrb[75].mxu0  ;;  %v3462_v48 = vrot.slane %v3342_v56, 7 }
 0x1a7   : > { %v2819_v38 = vadd.f32 %v2818_v11, %v8691_v42  ;;  %v8869_v5 = vadd.f32 %v2803_v45, %v2802_v22  ;;  %v2784_v30 = vsel %vm307_vm1, %v1864_v31, 0.0 }
 0x1a8   : > { %v2785_v62 = vadd.f32 %v2784_v30, %v8695_v35  ;;  %v8875_v39 = vadd.f32 %v2769_v27, %v2768_v19  ;;  %v6939_v58 = vpop.f32.mrb[76].mxu1  ;;  %v3466_v30 = vsel %vm644_vm3, %v3463_v15, %v3465_v55  ;;  %v8915_v55 = vld [vmem:[%s11046_s2 + $0x4] sm:$0x3] }
 0x1a9   : > { %v8877_v24 = vadd.f32 %v2820_v60, %v2819_v38  ;;  %v2044_v53 = vpop.f32.mrb[77].mxu1  ;;  %v2871_v16 = vsel %vm307_vm1, %v6939_v58, 0.0  ;;  %7376 = vmatprep.subr.msk.bf16.mxu1 %vm1033_vm0, %v8915_v55 }
 0x1aa   : > { %v8880_v40 = vadd.f32 %v2786_v49, %v2785_v62  ;;  %v6940_v34 = vpop.f32.mrb[78].mxu1  ;;  %v2837_v21 = vsel %vm307_vm1, %v2044_v53, 0.0  ;;  %v3464_v49 = vsel %vm644_vm3, %v3462_v48, %v3463_v15 }
 0x1ab   : > { %v6905_v42 = vpop.f32.mrb[76].mxu0  ;;  %v2047_v35 = vpop.f32.mrb[79].mxu1  ;;  %v2888_v27 = vsel %vm307_vm1, %v6940_v34, 0.0  ;;  %v3738_v62 = vpack.c.bf16 %v3466_v30, %v3464_v49 }
 0x1ac   : > { %v2869_v46 = vsel %vm307_vm1, %v6905_v42, 0.0  ;;  %v1877_v26 = vpop.f32.mrb[77].mxu0 }
 0x1ad   : > { %v2870_v2 = vadd.f32 %v2869_v46, %v8711_v33  ;;  %v2835_v17 = vsel %vm307_vm1, %v1877_v26, 0.0  ;;  %v6906_v45 = vpop.f32.mrb[78].mxu0  ;;  %v2854_v33 = vsel %vm307_vm1, %v2047_v35, 0.0  ;;  %7061 = vmatprep.mubr.msk.bf16.mxu1 %vm307_vm1, %v3738_v62 }
 0x1ae   : > { %v2836_v22 = vadd.f32 %v2835_v17, %v8716_v52  ;;  %v2886_v14 = vsel %vm307_vm1, %v6906_v45, 0.0  ;;  %v1880_v51 = vpop.f32.mrb[79].mxu0 }
 0x1af   : > { %v2887_v0 = vadd.f32 %v2886_v14, %v8720_v63  ;;  %v8893_v19 = vadd.f32 %v2871_v16, %v2870_v2  ;;  %v2852_v11 = vsel %vm307_vm1, %v1880_v51, 0.0 }
 0x1b0   : > { %v2853_v31 = vadd.f32 %v2852_v11, %v8724_v20  ;;  %v8898_v60 = vadd.f32 %v2837_v21, %v2836_v22  ;;  %v6943_v38 = vpop.f32.mrb[80].mxu1 }
 0x1b1   : > { %v8901_v52 = vadd.f32 %v2888_v27, %v2887_v0  ;;  %v2060_v63 = vpop.f32.mrb[81].mxu1  ;;  %v2939_v20 = vsel %vm307_vm1, %v6943_v38, 0.0 }
 0x1b2   : > { %v8904_v28 = vadd.f32 %v2854_v33, %v2853_v31  ;;  %v6944_v53 = vpop.f32.mrb[82].mxu1  ;;  %v2905_v15 = vsel %vm307_vm1, %v2060_v63, 0.0 }
 0x1b3   : > { %v6909_v58 = vpop.f32.mrb[80].mxu0  ;;  %v2063_v46 = vpop.f32.mrb[83].mxu1  ;;  %v2956_v45 = vsel %vm307_vm1, %v6944_v53, 0.0 }
 0x1b4   : > { %v2937_v42 = vsel %vm307_vm1, %v6909_v58, 0.0  ;;  %v1893_v34 = vpop.f32.mrb[81].mxu0  ;;  %v2922_v22 = vsel %vm307_vm1, %v2063_v46, 0.0 }
 0x1b5   : > { %v2938_v26 = vadd.f32 %v2937_v42, %v8735_v13  ;;  %v2903_v16 = vsel %vm307_vm1, %v1893_v34, 0.0  ;;  %v6910_v35 = vpop.f32.mrb[82].mxu0 }
 0x1b6   : > { %v2904_v56 = vadd.f32 %v2903_v16, %v8740_v32  ;;  %v2954_v2 = vsel %vm307_vm1, %v6910_v35, 0.0  ;;  %v1896_v17 = vpop.f32.mrb[83].mxu0 }
 0x1b7   : > { %v2955_v13 = vadd.f32 %v2954_v2, %v8746_v37  ;;  %v8923_v21 = vadd.f32 %v2939_v20, %v2938_v26  ;;  %v2920_v48 = vsel %vm307_vm1, %v1896_v17, 0.0 }
 0x1b8   : > { %v2921_v14 = vadd.f32 %v2920_v48, %v8748_v18  ;;  %v8928_v51 = vadd.f32 %v2905_v15, %v2904_v56  ;;  %v6947_v27 = vpop.f32.mrb[84].mxu1 }
 0x1b9   : > { %v8930_v32 = vadd.f32 %v2956_v45, %v2955_v13  ;;  %v2076_v11 = vpop.f32.mrb[85].mxu1  ;;  %v3007_v38 = vsel %vm307_vm1, %v6947_v27, 0.0 }
 0x1ba   : > { %v8932_v0 = vadd.f32 %v2922_v22, %v2921_v14  ;;  %v6948_v31 = vpop.f32.mrb[86].mxu1  ;;  %v2973_v58 = vsel %vm307_vm1, %v2076_v11, 0.0 }
 0x1bb   : > { %v6913_v33 = vpop.f32.mrb[84].mxu0  ;;  %v2079_v30 = vpop.f32.mrb[87].mxu1  ;;  %v3024_v20 = vsel %vm307_vm1, %v6948_v31, 0.0 }
 0x1bc   : > { %v3005_v37 = vsel %vm307_vm1, %v6913_v33, 0.0  ;;  %v1909_v49 = vpop.f32.mrb[85].mxu0 }
 0x1bd   : > { %v3006_v63 = vadd.f32 %v3005_v37, %v8759_v3  ;;  %v2971_v18 = vsel %vm307_vm1, %v1909_v49, 0.0  ;;  %v6914_v62 = vpop.f32.mrb[86].mxu0  ;;  %v2990_v3 = vsel %vm307_vm1, %v2079_v30, 0.0 }
 0x1be   : > { %v2972_v53 = vadd.f32 %v2971_v18, %v8764_v47  ;;  %v3022_v42 = vsel %vm307_vm1, %v6914_v62, 0.0  ;;  %v1912_v34 = vpop.f32.mrb[87].mxu0 }
 0x1bf   : > { %v3023_v46 = vadd.f32 %v3022_v42, %v8766_v12  ;;  %v8943_v26 = vadd.f32 %v3007_v38, %v3006_v63  ;;  %v2988_v16 = vsel %vm307_vm1, %v1912_v34, 0.0 }
 0x1c0   : > { %v2989_v35 = vadd.f32 %v2988_v16, %v8768_v54  ;;  %v8948_v15 = vadd.f32 %v2973_v58, %v2972_v53  ;;  %v6951_v47 = vpop.f32.mrb[88].mxu1 }
 0x1c1   : > { %v8950_v56 = vadd.f32 %v3024_v20, %v3023_v46  ;;  %v2092_v17 = vpop.f32.mrb[89].mxu1  ;;  %v3075_v22 = vsel %vm307_vm1, %v6951_v47, 0.0 }
 0x1c2   : > { %v8952_v2 = vadd.f32 %v2990_v3, %v2989_v35  ;;  %v6952_v13 = vpop.f32.mrb[90].mxu1  ;;  %v3041_v33 = vsel %vm307_vm1, %v2092_v17, 0.0 }
 0x1c3   : > { %v6917_v45 = vpop.f32.mrb[88].mxu0  ;;  %v2095_v14 = vpop.f32.mrb[91].mxu1  ;;  %v3092_v38 = vsel %vm307_vm1, %v6952_v13, 0.0 }
 0x1c4   : > { %v3073_v12 = vsel %vm307_vm1, %v6917_v45, 0.0  ;;  %v1925_v48 = vpop.f32.mrb[89].mxu0 }
 0x1c5   : > { %v3074_v27 = vadd.f32 %v3073_v12, %v8779_v6  ;;  %v3039_v54 = vsel %vm307_vm1, %v1925_v48, 0.0  ;;  %v6918_v11 = vpop.f32.mrb[90].mxu0  ;;  %v3058_v6 = vsel %vm307_vm1, %v2095_v14, 0.0 }
 0x1c6   : > { %v3040_v31 = vadd.f32 %v3039_v54, %v8784_v23  ;;  %v3090_v37 = vsel %vm307_vm1, %v6918_v11, 0.0  ;;  %v1928_v49 = vpop.f32.mrb[91].mxu0 }
 0x1c7   : > { %v3091_v30 = vadd.f32 %v3090_v37, %v8786_v44  ;;  %v8963_v63 = vadd.f32 %v3075_v22, %v3074_v27  ;;  %v3056_v18 = vsel %vm307_vm1, %v1928_v49, 0.0 }
 0x1c8   : > { %v3057_v62 = vadd.f32 %v3056_v18, %v8788_v59  ;;  %v8968_v58 = vadd.f32 %v3041_v33, %v3040_v31  ;;  %v6955_v23 = vpop.f32.mrb[92].mxu1 }
 0x1c9   : > { %v8970_v53 = vadd.f32 %v3092_v38, %v3091_v30  ;;  %v2108_v34 = vpop.f32.mrb[93].mxu1  ;;  %v3143_v3 = vsel %vm307_vm1, %v6955_v23, 0.0 }
 0x1ca   : > { %v8972_v42 = vadd.f32 %v3058_v6, %v3057_v62  ;;  %v6956_v46 = vpop.f32.mrb[94].mxu1  ;;  %v3109_v45 = vsel %vm307_vm1, %v2108_v34, 0.0 }
 0x1cb   : > { %v6921_v20 = vpop.f32.mrb[92].mxu0  ;;  %v2111_v35 = vpop.f32.mrb[95].mxu1  ;;  %v3160_v22 = vsel %vm307_vm1, %v6956_v46, 0.0 }
 0x1cc   : > { %v3141_v44 = vsel %vm307_vm1, %v6921_v20, 0.0  ;;  %v1941_v16 = vpop.f32.mrb[93].mxu0 }
 0x1cd   : > { %v3142_v47 = vadd.f32 %v3141_v44, %v8799_v41  ;;  %v3107_v59 = vsel %vm307_vm1, %v1941_v16, 0.0  ;;  %v6922_v17 = vpop.f32.mrb[94].mxu0  ;;  %v3126_v41 = vsel %vm307_vm1, %v2111_v35, 0.0 }
 0x1ce   : > { %v3108_v13 = vadd.f32 %v3107_v59, %v8804_v1  ;;  %v3158_v12 = vsel %vm307_vm1, %v6922_v17, 0.0  ;;  %v1944_v48 = vpop.f32.mrb[95].mxu0 }
 0x1cf   : > { %v3159_v14 = vadd.f32 %v3158_v12, %v8806_v43  ;;  %v8983_v27 = vadd.f32 %v3143_v3, %v3142_v47  ;;  %v3124_v54 = vsel %vm307_vm1, %v1944_v48, 0.0 }
 0x1d0   : > { %v3125_v11 = vadd.f32 %v3124_v54, %v8808_v61  ;;  %v8988_v33 = vadd.f32 %v3109_v45, %v3108_v13  ;;  %v6995_v1 = vpop.f32.mrb[96].mxu1 }
 0x1d1   : > { %v8990_v31 = vadd.f32 %v3160_v22, %v3159_v14  ;;  %v2330_v49 = vpop.f32.mrb[97].mxu1  ;;  %v2671_v6 = vsel %vm307_vm1, %v6995_v1, 0.0 }
 0x1d2   : > { %v8992_v37 = vadd.f32 %v3126_v41, %v3125_v11  ;;  %v6996_v30 = vpop.f32.mrb[98].mxu1  ;;  %v2637_v20 = vsel %vm307_vm1, %v2330_v49, 0.0 }
 0x1d3   : > { %v6961_v38 = vpop.f32.mrb[96].mxu0  ;;  %v2333_v62 = vpop.f32.mrb[99].mxu1  ;;  %v2688_v3 = vsel %vm307_vm1, %v6996_v30, 0.0 }
 0x1d4   : > { %v2669_v43 = vsel %vm307_vm1, %v6961_v38, 0.0  ;;  %v2163_v18 = vpop.f32.mrb[97].mxu0 }
 0x1d5   : > { %v2670_v23 = vadd.f32 %v2669_v43, %v8819_v10  ;;  %v2635_v61 = vsel %vm307_vm1, %v2163_v18, 0.0  ;;  %v6962_v34 = vpop.f32.mrb[98].mxu0  ;;  %v2654_v10 = vsel %vm307_vm1, %v2333_v62, 0.0 }
 0x1d6   : > { %v2636_v46 = vadd.f32 %v2635_v61, %v8824_v25  ;;  %v2686_v44 = vsel %vm307_vm1, %v6962_v34, 0.0  ;;  %v2166_v16 = vpop.f32.mrb[99].mxu0 }
 0x1d7   : > { %v2687_v35 = vadd.f32 %v2686_v44, %v8826_v57  ;;  %v9003_v47 = vadd.f32 %v2671_v6, %v2670_v23  ;;  %v2652_v59 = vsel %vm307_vm1, %v2166_v16, 0.0 }
 0x1d8   : > { %v2653_v17 = vadd.f32 %v2652_v59, %v8828_v9  ;;  %v9008_v45 = vadd.f32 %v2637_v20, %v2636_v46  ;;  %v6999_v25 = vpop.f32.mrb[100].mxu1 }
 0x1d9   : > { %v9010_v13 = vadd.f32 %v2688_v3, %v2687_v35  ;;  %v2346_v48 = vpop.f32.mrb[101].mxu1  ;;  %v2739_v41 = vsel %vm307_vm1, %v6999_v25, 0.0 }
 0x1da   : > { %v9012_v12 = vadd.f32 %v2654_v10, %v2653_v17  ;;  %v7000_v14 = vpop.f32.mrb[102].mxu1  ;;  %v2705_v38 = vsel %vm307_vm1, %v2346_v48, 0.0 }
 0x1db   : > { %v6965_v22 = vpop.f32.mrb[100].mxu0  ;;  %v2349_v11 = vpop.f32.mrb[103].mxu1  ;;  %v2756_v6 = vsel %vm307_vm1, %v7000_v14, 0.0 }
 0x1dc   : > { %v2737_v57 = vsel %vm307_vm1, %v6965_v22, 0.0  ;;  %v2179_v54 = vpop.f32.mrb[101].mxu0 }
 0x1dd   : > { %v2738_v1 = vadd.f32 %v2737_v57, %v8839_v36  ;;  %v2703_v9 = vsel %vm307_vm1, %v2179_v54, 0.0  ;;  %v6966_v49 = vpop.f32.mrb[102].mxu0  ;;  %v2722_v36 = vsel %vm307_vm1, %v2349_v11, 0.0 }
 0x1de   : > { %v2704_v30 = vadd.f32 %v2703_v9, %v8844_v4  ;;  %v2754_v43 = vsel %vm307_vm1, %v6966_v49, 0.0  ;;  %v2182_v18 = vpop.f32.mrb[103].mxu0 }
 0x1df   : > { %v2755_v62 = vadd.f32 %v2754_v43, %v8846_v29  ;;  %v9023_v23 = vadd.f32 %v2739_v41, %v2738_v1  ;;  %v2720_v61 = vsel %vm307_vm1, %v2182_v18, 0.0 }
 0x1e0   : > { %v2721_v34 = vadd.f32 %v2720_v61, %v8848_v7  ;;  %v9028_v20 = vadd.f32 %v2705_v38, %v2704_v30  ;;  %v7003_v4 = vpop.f32.mrb[104].mxu1 }
 0x1e1   : > { %v9030_v46 = vadd.f32 %v2756_v6, %v2755_v62  ;;  %v2362_v16 = vpop.f32.mrb[105].mxu1  ;;  %v2807_v10 = vsel %vm307_vm1, %v7003_v4, 0.0 }
 0x1e2   : > { %v9032_v44 = vadd.f32 %v2722_v36, %v2721_v34  ;;  %v7004_v35 = vpop.f32.mrb[106].mxu1  ;;  %v2773_v22 = vsel %vm307_vm1, %v2362_v16, 0.0 }
 0x1e3   : > { %v6969_v3 = vpop.f32.mrb[104].mxu0  ;;  %v2365_v17 = vpop.f32.mrb[107].mxu1  ;;  %v2824_v41 = vsel %vm307_vm1, %v7004_v35, 0.0 }
 0x1e4   : > { %v2805_v29 = vsel %vm307_vm1, %v6969_v3, 0.0  ;;  %v2195_v59 = vpop.f32.mrb[105].mxu0 }
 0x1e5   : > { %v2806_v25 = vadd.f32 %v2805_v29, %v8869_v5  ;;  %v2771_v7 = vsel %vm307_vm1, %v2195_v59, 0.0  ;;  %v6970_v48 = vpop.f32.mrb[106].mxu0  ;;  %v2790_v5 = vsel %vm307_vm1, %v2365_v17, 0.0 }
 0x1e6   : > { %v2772_v14 = vadd.f32 %v2771_v7, %v8875_v39  ;;  %v2822_v57 = vsel %vm307_vm1, %v6970_v48, 0.0  ;;  %v2198_v54 = vpop.f32.mrb[107].mxu0 }
 0x1e7   : > { %v2823_v11 = vadd.f32 %v2822_v57, %v8877_v24  ;;  %v9043_v1 = vadd.f32 %v2807_v10, %v2806_v25  ;;  %v2788_v9 = vsel %vm307_vm1, %v2198_v54, 0.0 }
 0x1e8   : > { %v2789_v49 = vadd.f32 %v2788_v9, %v8880_v40  ;;  %v9048_v38 = vadd.f32 %v2773_v22, %v2772_v14  ;;  %v7007_v39 = vpop.f32.mrb[108].mxu1  ;;  %v3590_v9 = vrot.slane %v8860_v8, 1 }
 0x1e9   : > { %v9050_v30 = vadd.f32 %v2824_v41, %v2823_v11  ;;  %v2378_v18 = vpop.f32.mrb[109].mxu1  ;;  %v2875_v36 = vsel %vm307_vm1, %v7007_v39, 0.0 }
 0x1ea   : > { %v9052_v43 = vadd.f32 %v2790_v5, %v2789_v49  ;;  %v7008_v62 = vpop.f32.mrb[110].mxu1  ;;  %v2841_v3 = vsel %vm307_vm1, %v2378_v18, 0.0  ;;  %v3591_v5 = vrot.slane %v8862_v50, 1 }
 0x1eb   : > { %v6973_v6 = vpop.f32.mrb[108].mxu0  ;;  %v2381_v34 = vpop.f32.mrb[111].mxu1  ;;  %v2892_v10 = vsel %vm307_vm1, %v7008_v62, 0.0 }
 0x1ec   : > { %v2873_v24 = vsel %vm307_vm1, %v6973_v6, 0.0  ;;  %v2211_v61 = vpop.f32.mrb[109].mxu0 }
 0x1ed   : > { %v2874_v4 = vadd.f32 %v2873_v24, %v8893_v19  ;;  %v2839_v40 = vsel %vm307_vm1, %v2211_v61, 0.0  ;;  %v6974_v16 = vpop.f32.mrb[110].mxu0  ;;  %v2858_v19 = vsel %vm307_vm1, %v2381_v34, 0.0 }
 0x1ee   : > { %v2840_v35 = vadd.f32 %v2839_v40, %v8898_v60  ;;  %v2890_v29 = vsel %vm307_vm1, %v6974_v16, 0.0  ;;  %v2214_v59 = vpop.f32.mrb[111].mxu0 }
 0x1ef   : > { %v2891_v17 = vadd.f32 %v2890_v29, %v8901_v52  ;;  %v9063_v25 = vadd.f32 %v2875_v36, %v2874_v4  ;;  %v2856_v7 = vsel %vm307_vm1, %v2214_v59, 0.0  ;;  %v9077_v52 = vld [vmem:[%s11046_s2 + $0x6] sm:$0x3] }
 0x1f0   : > { %v2857_v48 = vadd.f32 %v2856_v7, %v8904_v28  ;;  %v9068_v22 = vadd.f32 %v2841_v3, %v2840_v35  ;;  %v7011_v60 = vpop.f32.mrb[112].mxu1  ;;  %7377 = vmatprep.subr.msk.bf16.mxu0 %vm1033_vm0, %v9077_v52  ;;  %v3345_v3 = vld [vmem:[#allocation2 + $0x18] sm:$0x1]  ;;  %v9097_v35 = vsel %vm773_vm4, %v3590_v9, %v3591_v5 }
 0x1f1   : > { %v9070_v14 = vadd.f32 %v2892_v10, %v2891_v17  ;;  %v2394_v54 = vpop.f32.mrb[113].mxu1  ;;  %v2943_v39 = vsel %vm307_vm1, %v7011_v60, 0.0  ;;  %11152 = vst [vmem:[#allocation3_spill] sm:$0xff] %v9097_v35  ;;  %v3593_v59 = vrot.slane %v3345_v3, 1 }
 0x1f2   : > { %v9072_v57 = vadd.f32 %v2858_v19, %v2857_v48  ;;  %v7012_v11 = vpop.f32.mrb[114].mxu1  ;;  %v2909_v61 = vsel %vm307_vm1, %v2394_v54, 0.0  ;;  %v9218_v54 = vld [vmem:[#allocation2 + $0x1a0] sm:$0xff] }
 0x1f3   : > { %v6977_v41 = vpop.f32.mrb[112].mxu0  ;;  %v2397_v18 = vpop.f32.mrb[115].mxu1  ;;  %v2960_v34 = vsel %vm307_vm1, %v7012_v11, 0.0 }
 0x1f4   : > { %v2941_v28 = vsel %vm307_vm1, %v6977_v41, 0.0  ;;  %v2227_v49 = vpop.f32.mrb[113].mxu0  ;;  %v2926_v4 = vsel %vm307_vm1, %v2397_v18, 0.0 }
 0x1f5   : > { %v2942_v6 = vadd.f32 %v2941_v28, %v8923_v21  ;;  %v2907_v62 = vsel %vm307_vm1, %v2227_v49, 0.0  ;;  %v6978_v24 = vpop.f32.mrb[114].mxu0 }
 0x1f6   : > { %v2908_v8 = vadd.f32 %v2907_v62, %v8928_v51  ;;  %v2958_v50 = vsel %vm307_vm1, %v6978_v24, 0.0  ;;  %v2230_v36 = vpop.f32.mrb[115].mxu0 }
 0x1f7   : > { %v2959_v40 = vadd.f32 %v2958_v50, %v8930_v32  ;;  %v9093_v16 = vadd.f32 %v2943_v39, %v2942_v6  ;;  %v2924_v21 = vsel %vm307_vm1, %v2230_v36, 0.0  ;;  %v9107_v32 = vsel %vm773_vm4, %v3591_v5, %v3593_v59 }
 0x1f8   : > { %v2925_v29 = vadd.f32 %v2924_v21, %v8932_v0  ;;  %v9100_v51 = vadd.f32 %v2909_v61, %v2908_v8  ;;  %v7015_v17 = vpop.f32.mrb[116].mxu1  ;;  %11153 = vst [vmem:[#allocation4_spill] sm:$0xff] %v9107_v32 }
 0x1f9   : > { %v9102_v10 = vadd.f32 %v2960_v34, %v2959_v40  ;;  %v2410_v19 = vpop.f32.mrb[117].mxu1  ;;  %v3011_v11 = vsel %vm307_vm1, %v7015_v17, 0.0 }
 0x1fa   : > { %v9104_v7 = vadd.f32 %v2926_v4, %v2925_v29  ;;  %v7016_v60 = vpop.f32.mrb[118].mxu1  ;;  %v2977_v18 = vsel %vm307_vm1, %v2410_v19, 0.0 }
 0x1fb   : > { %v6981_v48 = vpop.f32.mrb[116].mxu0  ;;  %v2413_v9 = vpop.f32.mrb[119].mxu1  ;;  %v3028_v24 = vsel %vm307_vm1, %v7016_v60, 0.0 }
 0x1fc   : > { %v3009_v41 = vsel %vm307_vm1, %v6981_v48, 0.0  ;;  %v2243_v0 = vpop.f32.mrb[117].mxu0 }
 0x1fd   : > { %v3010_v28 = vadd.f32 %v3009_v41, %v8943_v26  ;;  %v2975_v49 = vsel %vm307_vm1, %v2243_v0, 0.0  ;;  %v6982_v39 = vpop.f32.mrb[118].mxu0  ;;  %v2994_v26 = vsel %vm307_vm1, %v2413_v9, 0.0 }
 0x1fe   : > { %v2976_v5 = vadd.f32 %v2975_v49, %v8948_v15  ;;  %v3026_v6 = vsel %vm307_vm1, %v6982_v39, 0.0  ;;  %v2246_v62 = vpop.f32.mrb[119].mxu0 }
 0x1ff   : > { %v3027_v61 = vadd.f32 %v3026_v6, %v8950_v56  ;;  %v9120_v8 = vadd.f32 %v3011_v11, %v3010_v28  ;;  %v2992_v50 = vsel %vm307_vm1, %v2246_v62, 0.0 }
 0x200   : > { %v2993_v36 = vadd.f32 %v2992_v50, %v8952_v2  ;;  %v9125_v34 = vadd.f32 %v2977_v18, %v2976_v5  ;;  %v7019_v15 = vpop.f32.mrb[120].mxu1 }
 0x201   : > { %v9127_v4 = vadd.f32 %v3028_v24, %v3027_v61  ;;  %v2426_v21 = vpop.f32.mrb[121].mxu1  ;;  %v3079_v17 = vsel %vm307_vm1, %v7019_v15, 0.0  ;;  %v9149_v24 = vld [vmem:[#allocation2 + $0x20] sm:$0xff] }
 0x202   : > { %v9129_v40 = vadd.f32 %v2994_v26, %v2993_v36  ;;  %v7020_v29 = vpop.f32.mrb[122].mxu1  ;;  %v3045_v41 = vsel %vm307_vm1, %v2426_v21, 0.0  ;;  %v9151_v61 = vld [vmem:[#allocation2 + $0x40] sm:$0xff] }
 0x203   : > { %v6985_v3 = vpop.f32.mrb[120].mxu0  ;;  %v2429_v19 = vpop.f32.mrb[123].mxu1  ;;  %v3096_v28 = vsel %vm307_vm1, %v7020_v29, 0.0 }
 0x204   : > { %v3077_v56 = vsel %vm307_vm1, %v6985_v3, 0.0  ;;  %v2259_v59 = vpop.f32.mrb[121].mxu0 }
 0x205   : > { %v3078_v48 = vadd.f32 %v3077_v56, %v8963_v63  ;;  %v3043_v2 = vsel %vm307_vm1, %v2259_v59, 0.0  ;;  %v6986_v60 = vpop.f32.mrb[122].mxu0  ;;  %v3062_v63 = vsel %vm307_vm1, %v2429_v19, 0.0  ;;  %v9263_v56 = vld [vmem:[#allocation2 + $0x118] sm:$0x1] }
 0x206   : > { %v3044_v0 = vadd.f32 %v3043_v2, %v8968_v58  ;;  %v3094_v11 = vsel %vm307_vm1, %v6986_v60, 0.0  ;;  %v2262_v9 = vpop.f32.mrb[123].mxu0  ;;  %v9164_v2 = vsel %vm1033_vm0, %v8915_v55, 0  ;;  %v9166_v60 = vld [vmem:[#allocation2 + $0x60] sm:$0xff]  ;;  %11163 = vst [vmem:[#allocation14_spill] sm:$0xff] %v9263_v56 }
 0x207   : > { %v3095_v49 = vadd.f32 %v3094_v11, %v8970_v53  ;;  %v9140_v39 = vadd.f32 %v3079_v17, %v3078_v48  ;;  %v3060_v18 = vsel %vm307_vm1, %v2262_v9, 0.0  ;;  %v9283_v56 = vld [vmem:[#allocation2 + $0x178] sm:$0x1] }
 0x208   : > { %v3061_v5 = vadd.f32 %v3060_v18, %v8972_v42  ;;  %v9145_v6 = vadd.f32 %v3045_v41, %v3044_v0  ;;  %v7023_v58 = vpop.f32.mrb[124].mxu1  ;;  %v9168_v41 = vld [vmem:[#allocation2 + $0x80] sm:$0xff] }
 0x209   : > { %v9147_v62 = vadd.f32 %v3096_v28, %v3095_v49  ;;  %v2442_v53 = vpop.f32.mrb[125].mxu1  ;;  %v3147_v3 = vsel %vm307_vm1, %v7023_v58, 0.0  ;;  %v9173_v28 = vld [vmem:[#allocation2 + $0xa0] sm:$0xff] }
 0x20a   : > { %v9153_v50 = vadd.f32 %v3062_v63, %v3061_v5  ;;  %v7024_v36 = vpop.f32.mrb[126].mxu1  ;;  %v3113_v48 = vsel %vm307_vm1, %v2442_v53, 0.0  ;;  %v9175_v49 = vld [vmem:[#allocation2 + $0xc0] sm:$0xff] }
 0x20b   : > { %v6989_v26 = vpop.f32.mrb[124].mxu0  ;;  %v2445_v42 = vpop.f32.mrb[127].mxu1  ;;  %v9177_v18 = vld [vmem:[#allocation2 + $0x100] sm:$0xff] }
 0x20c   : > { %v3145_v15 = vsel %vm307_vm1, %v6989_v26, 0.0  ;;  %v2275_v21 = vpop.f32.mrb[125].mxu0  ;;  %v3130_v58 = vsel %vm307_vm1, %v2445_v42, 0.0  ;;  %v9186_v53 = vld [vmem:[#allocation2 + $0x120] sm:$0xff] }
 0x20d   : > { %v3146_v59 = vadd.f32 %v3145_v15, %v8983_v27  ;;  %v3111_v17 = vsel %vm307_vm1, %v2275_v21, 0.0  ;;  %v6990_v19 = vpop.f32.mrb[126].mxu0  ;;  %v3164_v27 = vsel %vm307_vm1, %v7024_v36, 0.0  ;;  %v9188_v26 = vld [vmem:[#allocation2 + $0x140] sm:$0xff] }
 0x20e   : > { %v3112_v0 = vadd.f32 %v3111_v17, %v8988_v33  ;;  %v3162_v11 = vsel %vm307_vm1, %v6990_v19, 0.0  ;;  %v2278_v9 = vpop.f32.mrb[127].mxu0  ;;  %v9184_v33 = vld [vmem:[#allocation2 + $0xe0] sm:$0xff] }
 0x20f   : > { %v3163_v55 = vadd.f32 %v3162_v11, %v8990_v31  ;;  %v9180_v63 = vadd.f32 %v3147_v3, %v3146_v59  ;;  %v3128_v5 = vsel %vm307_vm1, %v2278_v9, 0.0  ;;  %v9195_v3 = vld [vmem:[#allocation2 + $0x180] sm:$0xff]  ;;  %v9197_v59 = vld [vmem:[#allocation2 + $0x38] sm:$0x1] }
 0x210   : > { %v3129_v36 = vadd.f32 %v3128_v5, %v8992_v37  ;;  %v9191_v15 = vadd.f32 %v3113_v48, %v3112_v0  ;;  %11154 = vst [vmem:[#allocation5_spill] sm:$0xff] %v9195_v3  ;;  %v9204_v9 = vld [vmem:[#allocation2 + $0x160] sm:$0xff]  ;;  %v9206_v37 = vld [vmem:[#allocation2 + $0x58] sm:$0x1] }
 0x211   : > { %v9199_v17 = vadd.f32 %v3164_v27, %v3163_v55  ;;  %11156 = vst [vmem:[#allocation7_spill] sm:$0xff] %v9204_v9  ;;  %11157 = vst [vmem:[#allocation8_spill] sm:$0xff] %v9206_v37  ;;  %v9213_v0 = vld [vmem:[%s11049_s5] ss:$0 sm:$0xff]  ;;  %v9248_v37 = vld [vmem:[#allocation2 + $0xd8] sm:$0x1] }
 0x212   : > { %v9208_v48 = vadd.f32 %v3130_v58, %v3129_v36  ;;  %v9220_v11 = vld [vmem:[#allocation2 + $0x1c0] sm:$0xff]  ;;  %v9223_v58 = vld [vmem:[#allocation2 + $0x78] sm:$0x1]  ;;  %11161 = vst [vmem:[#allocation12_spill] sm:$0xff] %v9248_v37 }
 0x213   : > { %11155 = vst [vmem:[#allocation6_spill] sm:$0xff] %v9199_v17  ;;  %v7029_v19 = vpop.f32.mrb[128].mxu0  ;;  %v9225_v36 = vld [vmem:[#allocation2 + $0x98] sm:$0x1]  ;;  %v9231_v27 = vld [vmem:[%s11050_s6] ss:$0 sm:$0xff] }
 0x214   : > { %11158 = vst [vmem:[#allocation9_spill] sm:$0xff] %v9208_v48  ;;  %11159 = vst [vmem:[#allocation10_spill] sm:$0xff] %v9225_v36  ;;  %v2673_v31 = vsel %vm307_vm1, %v7029_v19, 0.0  ;;  %v2497_v55 = vpop.f32.mrb[129].mxu0  ;;  %v9234_v21 = vld [vmem:[#allocation2 + $0x1e0] sm:$0xff] }
 0x215   : > { %v2674_v29 = vadd.f32 %v2673_v31, %v9003_v47  ;;  %v2639_v35 = vsel %vm307_vm1, %v2497_v55, 0.0  ;;  %v7030_v32 = vpop.f32.mrb[130].mxu0  ;;  %v9242_v48 = vld [vmem:[#allocation2 + $0xb8] sm:$0x1] }
 0x216   : > { %11160 = vst [vmem:[#allocation11_spill] sm:$0xff] %v9242_v48  ;;  %v2640_v17 = vadd.f32 %v2639_v35, %v9008_v45  ;;  %v2690_v5 = vsel %vm307_vm1, %v7030_v32, 0.0  ;;  %v2500_v9 = vpop.f32.mrb[131].mxu0  ;;  %v9254_v19 = vld [vmem:[#allocation2 + $0xf8] sm:$0x1]  ;;  %v9260_v32 = vsel %vm1033_vm0, %v9077_v52, 0 }
 0x217   : > { %v3177_v47 = vadd.f32 %v9213_v0, %v2674_v29  ;;  %v2691_v31 = vadd.f32 %v2690_v5, %v9010_v13  ;;  %v2656_v55 = vsel %vm307_vm1, %v2500_v9, 0.0  ;;  %11162 = vst [vmem:[#allocation13_spill] sm:$0xff] %v9254_v19  ;;  %v9273_v48 = vld [vmem:[#allocation2 + $0x138] sm:$0x1] }
 0x218   : > { %v3175_v45 = vadd.f32 %v9213_v0, %v2640_v17  ;;  %v2657_v35 = vadd.f32 %v2656_v55, %v9012_v12  ;;  %v9278_v36 = vld [vmem:[#allocation2 + $0x158] sm:$0x1] }
 0x219   : > { %vm3209_vm5 = vcmp.gt.f32.partialorder %v3177_v47, 0.0  ;;  %v3248_v13 = vmul.f32 %v9231_v27, %v3177_v47  ;;  %v3178_v29 = vadd.f32 %v9213_v0, %v2691_v31 }
 0x21a   : > { %vm3207_vm6 = vcmp.gt.f32.partialorder %v3175_v45, 0.0  ;;  %v3246_v17 = vmul.f32 %v9231_v27, %v3175_v45  ;;  %v3176_v12 = vadd.f32 %v9213_v0, %v2657_v35 }
 0x21b   : > { %v3280_v52 = vsel %vm3209_vm5, %v3177_v47, %v3248_v13  ;;  %vm3210_vm7 = vcmp.gt.f32.partialorder %v3178_v29, 0.0  ;;  %v3249_v55 = vmul.f32 %v9231_v27, %v3178_v29  ;;  %v7033_v42 = vpop.f32.mrb[132].mxu0 }
 0x21c   : > { %3312 = vst.msk [vmem:[#allocation2 + $0x48] sm:$0xff] %vm307_vm1, %v3280_v52  ;;  %v3278_v31 = vsel %vm3207_vm6, %v3175_v45, %v3246_v17  ;;  %vm3208_vm8 = vcmp.gt.f32.partialorder %v3176_v12, 0.0  ;;  %v3247_v9 = vmul.f32 %v9231_v27, %v3176_v12  ;;  %v2741_v37 = vsel %vm307_vm1, %v7033_v42, 0.0  ;;  %v2513_v35 = vpop.f32.mrb[133].mxu0  ;;  %v9285_v52 = vld [vmem:[#allocation2 + $0x198] sm:$0x1] }
 0x21d   : > { %3310 = vst.msk [vmem:[#allocation2 + $0x28] sm:$0xff] %vm307_vm1, %v3278_v31  ;;  %v3281_v47 = vsel %vm3210_vm7, %v3178_v29, %v3249_v55  ;;  %v2742_v13 = vadd.f32 %v2741_v37, %v9023_v23  ;;  %v2707_v3 = vsel %vm307_vm1, %v2513_v35, 0.0  ;;  %v7034_v5 = vpop.f32.mrb[134].mxu0  ;;  %11164 = vst [vmem:[#allocation15_spill] sm:$0xff] %v9285_v52  ;;  %v9291_v29 = vld [vmem:[#allocation2 + $0x1d8] sm:$0x1] }
 0x21e   : > { %3313 = vst.msk [vmem:[#allocation2 + $0x50] sm:$0xff] %vm307_vm1, %v3281_v47  ;;  %v3279_v45 = vsel %vm3208_vm8, %v3176_v12, %v3247_v9  ;;  %v2708_v42 = vadd.f32 %v2707_v3, %v9028_v20  ;;  %v2758_v17 = vsel %vm307_vm1, %v7034_v5, 0.0  ;;  %v2516_v19 = vpop.f32.mrb[135].mxu0  ;;  %11165 = vst [vmem:[#allocation16_spill] sm:$0xff] %v9291_v29  ;;  %v9298_v9 = vld [vmem:[#allocation2 + $0x1b8] sm:$0x1] }
 0x21f   : > { %3311 = vst.msk [vmem:[#allocation2 + $0x30] sm:$0xff] %vm307_vm1, %v3279_v45  ;;  %v3181_v23 = vadd.f32 %v9213_v0, %v2742_v13  ;;  %v2759_v37 = vadd.f32 %v2758_v17, %v9030_v46  ;;  %v2724_v55 = vsel %vm307_vm1, %v2516_v19, 0.0  ;;  %11166 = vst [vmem:[#allocation17_spill] sm:$0xff] %v9298_v9  ;;  %v9304_v47 = vld [vmem:[#allocation2 + $0x1f8] sm:$0x1] }
 0x220   : > { %v3179_v20 = vadd.f32 %v9213_v0, %v2708_v42  ;;  %v2725_v3 = vadd.f32 %v2724_v55, %v9032_v44  ;;  %11167 = vst [vmem:[#allocation18_spill] sm:$0xff] %v9304_v47 }
 0x221   : > { %vm3213_vm9 = vcmp.gt.f32.partialorder %v3181_v23, 0.0  ;;  %v3252_v13 = vmul.f32 %v9231_v27, %v3181_v23  ;;  %v3182_v46 = vadd.f32 %v9213_v0, %v2759_v37 }
 0x222   : > { %vm3211_vm10 = vcmp.gt.f32.partialorder %v3179_v20, 0.0  ;;  %v3250_v45 = vmul.f32 %v9231_v27, %v3179_v20  ;;  %v3180_v42 = vadd.f32 %v9213_v0, %v2725_v3 }
 0x223   : > { %v3284_v17 = vsel %vm3213_vm9, %v3181_v23, %v3252_v13  ;;  %vm3214_vm11 = vcmp.gt.f32.partialorder %v3182_v46, 0.0  ;;  %v3253_v55 = vmul.f32 %v9231_v27, %v3182_v46  ;;  %v7037_v5 = vpop.f32.mrb[136].mxu0 }
 0x224   : > { %3316 = vst.msk [vmem:[#allocation2 + $0x88] sm:$0xff] %vm307_vm1, %v3284_v17  ;;  %v3282_v35 = vsel %vm3211_vm10, %v3179_v20, %v3250_v45  ;;  %vm3212_vm12 = vcmp.gt.f32.partialorder %v3180_v42, 0.0  ;;  %v3251_v37 = vmul.f32 %v9231_v27, %v3180_v42  ;;  %v2809_v19 = vsel %vm307_vm1, %v7037_v5, 0.0  ;;  %v2529_v31 = vpop.f32.mrb[137].mxu0  ;;  %v9317_v29 = vld [vmem:[#allocation2 + $0x28] sm:$0xff] }
 0x225   : > { %3314 = vst.msk [vmem:[#allocation2 + $0x68] sm:$0xff] %vm307_vm1, %v3282_v35  ;;  %v3285_v23 = vsel %vm3214_vm11, %v3182_v46, %v3253_v55  ;;  %v2810_v3 = vadd.f32 %v2809_v19, %v9043_v1  ;;  %v2775_v13 = vsel %vm307_vm1, %v2529_v31, 0.0  ;;  %v7038_v44 = vpop.f32.mrb[138].mxu0  ;;  %v3468_v12 = vrot.slane %v9317_v29, 7  ;;  %v9329_v46 = vld [vmem:[#allocation2 + $0x48] sm:$0xff] }
 0x226   : > { %3317 = vst.msk [vmem:[#allocation2 + $0x90] sm:$0xff] %vm307_vm1, %v3285_v23  ;;  %v3283_v20 = vsel %vm3212_vm12, %v3180_v42, %v3251_v37  ;;  %v2776_v45 = vadd.f32 %v2775_v13, %v9048_v38  ;;  %v2826_v5 = vsel %vm307_vm1, %v7038_v44, 0.0  ;;  %v2532_v17 = vpop.f32.mrb[139].mxu0  ;;  %v9326_v47 = vld [vmem:[#allocation2 + $0x30] sm:$0xff]  ;;  %v3473_v13 = vrot.slane %v9329_v46, 7 }
 0x227   : > { %3315 = vst.msk [vmem:[#allocation2 + $0x70] sm:$0xff] %vm307_vm1, %v3283_v20  ;;  %v3185_v1 = vadd.f32 %v9213_v0, %v2810_v3  ;;  %v2827_v31 = vadd.f32 %v2826_v5, %v9050_v30  ;;  %v2792_v19 = vsel %vm307_vm1, %v2532_v17, 0.0  ;;  %v3470_v42 = vrot.slane %v9326_v47, 7  ;;  %v9336_v38 = vld [vmem:[#allocation2 + $0x50] sm:$0xff] }
 0x228   : > { %v3183_v44 = vadd.f32 %v9213_v0, %v2776_v45  ;;  %v2793_v55 = vadd.f32 %v2792_v19, %v9052_v43  ;;  %v9343_v23 = vpack.c.bf16 %v9326_v47, %v9317_v29  ;;  %v3475_v43 = vrot.slane %v9336_v38, 7 }
 0x229   : > { %vm3217_vm13 = vcmp.gt.f32.partialorder %v3185_v1, 0.0  ;;  %v3256_v3 = vmul.f32 %v9231_v27, %v3185_v1  ;;  %v3186_v30 = vadd.f32 %v9213_v0, %v2827_v31  ;;  %v11170_v37 = vrot.slane %v9149_v24, 7 }
 0x22a   : > { %11168 = vst [vmem:[#allocation19_spill] sm:$0xff] %v9343_v23  ;;  %vm3215_vm14 = vcmp.gt.f32.partialorder %v3183_v44, 0.0  ;;  %v3254_v20 = vmul.f32 %v9231_v27, %v3183_v44  ;;  %v3184_v45 = vadd.f32 %v9213_v0, %v2793_v55  ;;  %7096 = vmatmul.mubr.msk.bf16.vlgmr.msra.gmra.mrb[160].mxu0 %vm307_vm1, %v9343_v23 }
 0x22b   : > { %v3288_v5 = vsel %vm3217_vm13, %v3185_v1, %v3256_v3  ;;  %vm3218_vm15 = vcmp.gt.f32.partialorder %v3186_v30, 0.0  ;;  %v3257_v17 = vmul.f32 %v9231_v27, %v3186_v30  ;;  %v7041_v35 = vpop.f32.mrb[140].mxu0  ;;  %7162 = vmatpush3.bf16.msra.mxu0 %v9260_v32  ;;  %v9362_v3 = vpack.c.bf16 %v9336_v38, %v9329_v46 }
 0x22c   : > { %3320 = vst.msk [vmem:[#allocation2 + $0xc8] sm:$0xff] %vm307_vm1, %v3288_v5  ;;  %v3286_v31 = vsel %vm3215_vm14, %v3183_v44, %v3254_v20  ;;  %vm3216_vm2 = vcmp.gt.f32.partialorder %v3184_v45, 0.0  ;;  %v3255_v55 = vmul.f32 %v9231_v27, %v3184_v45  ;;  %v2545_v23 = vpop.f32.mrb[141].mxu0  ;;  %v2877_v19 = vsel %vm307_vm1, %v7041_v35, 0.0 }
 0x22d   : > { %3318 = vst.msk [vmem:[#allocation2 + $0xa8] sm:$0xff] %vm307_vm1, %v3286_v31  ;;  %v3289_v1 = vsel %vm3218_vm15, %v3186_v30, %v3257_v17  ;;  %11169 = vst [vmem:[#allocation20_spill] sm:$0xff] %v9362_v3  ;;  %v2843_v32 = vsel %vm307_vm1, %v2545_v23, 0.0  ;;  %v7042_v9 = vpop.f32.mrb[142].mxu0  ;;  %v2878_v20 = vadd.f32 %v2877_v19, %v9063_v25  ;;  %v3469_v30 = vsel %vm644_vm3, %v11170_v37, %v3468_v12  ;;  %v9372_v31 = vld [vmem:[#allocation2 + $0x68] sm:$0xff] }
 0x22e   : > { %3321 = vst.msk [vmem:[#allocation2 + $0xd0] sm:$0xff] %vm307_vm1, %v3289_v1  ;;  %v3287_v44 = vsel %vm3216_vm2, %v3184_v45, %v3255_v55  ;;  %v2844_v5 = vadd.f32 %v2843_v32, %v9068_v22  ;;  %v2548_v17 = vpop.f32.mrb[143].mxu0  ;;  %v9374_v52 = vld [vmem:[#allocation2 + $0x70] sm:$0xff]  ;;  %7099 = vmatprep.mubr.msk.bf16.mxu0 %vm307_vm1, %v9362_v3  ;;  %v3471_v35 = vsel %vm644_vm3, %v3468_v12, %v3470_v42  ;;  %v2894_v25 = vsel %vm307_vm1, %v7042_v9, 0.0  ;;  %v9395_v42 = vld [vmem:[#allocation2 + $0x88] sm:$0xff] }
 0x22f   : > { %3319 = vst.msk [vmem:[#allocation2 + $0xb0] sm:$0xff] %vm307_vm1, %v3287_v44  ;;  %v11171_v22 = vrot.slane %v9151_v61, 7  ;;  %v3476_v37 = vsel %vm644_vm3, %v3473_v13, %v3475_v43  ;;  %v3189_v23 = vadd.f32 %v9213_v0, %v2878_v20  ;;  %v9387_v19 = vpack.c.bf16 %v3471_v35, %v3469_v30  ;;  %v9406_v32 = vld [vmem:[#allocation2 + $0x90] sm:$0xff]  ;;  %v9418_v35 = vld [vmem:[%s11046_s2 + $0xa] sm:$0x3] }
 0x230   : > { %v3187_v45 = vadd.f32 %v9213_v0, %v2844_v5  ;;  %v2895_v55 = vadd.f32 %v2894_v25, %v9070_v14  ;;  %v2860_v12 = vsel %vm307_vm1, %v2548_v17, 0.0  ;;  %v3478_v9 = vrot.slane %v9372_v31, 7  ;;  %7379 = vmatprep.subr.msk.bf16.mxu0 %vm1033_vm0, %v9418_v35 }
 0x231   : > { %v3474_v24 = vsel %vm644_vm3, %v11171_v22, %v3473_v13  ;;  %v3480_v61 = vrot.slane %v9374_v52, 7  ;;  %v9400_v13 = vld [vmem:[%s11046_s2 + $0x8] sm:$0x3]  ;;  %vm3221_vm5 = vcmp.gt.f32.partialorder %v3189_v23, 0.0  ;;  %v3260_v43 = vmul.f32 %v9231_v27, %v3189_v23  ;;  %7062 = vmatmul.mubr.msk.bf16.vlgmr.msra.gmra.mrb[128].mxu1 %vm307_vm1, %v9387_v19 }
 0x232   : > { %v9390_v1 = vpack.c.bf16 %v3476_v37, %v3474_v24  ;;  %vm3219_vm6 = vcmp.gt.f32.partialorder %v3187_v45, 0.0  ;;  %v3258_v14 = vmul.f32 %v9231_v27, %v3187_v45  ;;  %7128 = vmatpush3.bf16.msra.mxu1 %v9164_v2  ;;  %v3190_v44 = vadd.f32 %v9213_v0, %v2895_v55 }
 0x233   : > { %v2861_v20 = vadd.f32 %v2860_v12, %v9072_v57  ;;  %v7045_v17 = vpop.f32.mrb[144].mxu0  ;;  %v3292_v25 = vsel %vm3221_vm5, %v3189_v23, %v3260_v43  ;;  %v9422_v2 = vpack.c.bf16 %v9374_v52, %v9372_v31  ;;  %v3483_v24 = vrot.slane %v9395_v42, 7  ;;  %7378 = vmatprep.subr.msk.bf16.mxu1 %vm1033_vm0, %v9400_v13 }
 0x234   : > { %7065 = vmatprep.mubr.msk.bf16.mxu1 %vm307_vm1, %v9390_v1  ;;  %v3290_v22 = vsel %vm3219_vm6, %v3187_v45, %v3258_v14  ;;  %v2561_v37 = vpop.f32.mrb[145].mxu0  ;;  %3324 = vst.msk [vmem:[#allocation2 + $0x108] sm:$0xff] %vm307_vm1, %v3292_v25  ;;  %vm3222_vm7 = vcmp.gt.f32.partialorder %v3190_v44, 0.0  ;;  %v3261_v57 = vmul.f32 %v9231_v27, %v3190_v44  ;;  %v3485_v45 = vrot.slane %v9406_v32, 7 }
 0x235   : > { %11172 = vst [vmem:[#allocation21_spill] sm:$0xff] %v9422_v2  ;;  %3322 = vst.msk [vmem:[#allocation2 + $0xe8] sm:$0xff] %vm307_vm1, %v3290_v22  ;;  %v3188_v23 = vadd.f32 %v9213_v0, %v2861_v20  ;;  %v7046_v55 = vpop.f32.mrb[146].mxu0  ;;  %7100 = vmatmul.mubr.msk.bf16.gmra.mrb[164].mxu0 %vm307_vm1, %v9422_v2  ;;  %v9440_v14 = vpack.c.bf16 %v9406_v32, %v9395_v42  ;;  %v2945_v25 = vsel %vm307_vm1, %v7045_v17, 0.0  ;;  %v2911_v12 = vsel %vm307_vm1, %v2561_v37, 0.0 }
 0x236   : > { %v2564_v22 = vpop.f32.mrb[147].mxu0  ;;  %v3293_v5 = vsel %vm3222_vm7, %v3190_v44, %v3261_v57  ;;  %v2946_v30 = vadd.f32 %v2945_v25, %v9093_v16  ;;  %v11174_v43 = vrot.slane %v9166_v60, 7  ;;  %v3481_v17 = vsel %vm644_vm3, %v3478_v9, %v3480_v61 }
 0x237   : > { %11173 = vst [vmem:[#allocation22_spill] sm:$0xff] %v9440_v14  ;;  %vm3220_vm8 = vcmp.gt.f32.partialorder %v3188_v23, 0.0  ;;  %v3259_v20 = vmul.f32 %v9231_v27, %v3188_v23  ;;  %3325 = vst.msk [vmem:[#allocation2 + $0x110] sm:$0xff] %vm307_vm1, %v3293_v5  ;;  %7103 = vmatprep.mubr.msk.bf16.mxu0 %vm307_vm1, %v9440_v14  ;;  %v2962_v44 = vsel %vm307_vm1, %v7046_v55, 0.0  ;;  %v2912_v16 = vadd.f32 %v2911_v12, %v9100_v51  ;;  %v9458_v5 = vld [vmem:[#allocation2 + $0xa8] sm:$0xff]  ;;  %v9460_v14 = vld [vmem:[#allocation2 + $0xb0] sm:$0xff] }
 0x238   : > { %v3479_v2 = vsel %vm644_vm3, %v11174_v43, %v3478_v9  ;;  %v3193_v3 = vadd.f32 %v9213_v0, %v2946_v30  ;;  %v2963_v60 = vadd.f32 %v2962_v44, %v9102_v10  ;;  %v11175_v37 = vrot.slane %v9168_v41, 7  ;;  %v9481_v43 = vld [vmem:[#allocation2 + $0xd0] sm:$0xff] }
 0x239   : > { %v3291_v57 = vsel %vm3220_vm8, %v3188_v23, %v3259_v20  ;;  %v9456_v25 = vpack.c.bf16 %v3481_v17, %v3479_v2  ;;  %v3486_v61 = vsel %vm644_vm3, %v3483_v24, %v3485_v45  ;;  %v2928_v30 = vsel %vm307_vm1, %v2564_v22, 0.0  ;;  %v9479_v45 = vld [vmem:[#allocation2 + $0xc8] sm:$0xff] }
 0x23a   : > { %3323 = vst.msk [vmem:[#allocation2 + $0xf0] sm:$0xff] %vm307_vm1, %v3291_v57  ;;  %v3484_v9 = vsel %vm644_vm3, %v11175_v37, %v3483_v24  ;;  %vm3225_vm9 = vcmp.gt.f32.partialorder %v3193_v3, 0.0  ;;  %v3264_v51 = vmul.f32 %v9231_v27, %v3193_v3  ;;  %v3191_v2 = vadd.f32 %v9213_v0, %v2912_v16 }
 0x23b   : > { %7066 = vmatmul.mubr.msk.bf16.gmra.mrb[132].mxu1 %vm307_vm1, %v9456_v25  ;;  %v9473_v23 = vpack.c.bf16 %v3486_v61, %v3484_v9  ;;  %v7049_v55 = vpop.f32.mrb[148].mxu0  ;;  %v3194_v10 = vadd.f32 %v9213_v0, %v2963_v60  ;;  %v2929_v41 = vadd.f32 %v2928_v30, %v9104_v7  ;;  %v3488_v12 = vrot.slane %v9458_v5, 7 }
 0x23c   : > { %v3490_v24 = vrot.slane %v9460_v14, 7  ;;  %v2577_v22 = vpop.f32.mrb[149].mxu0  ;;  %v3296_v20 = vsel %vm3225_vm9, %v3193_v3, %v3264_v51  ;;  %vm3223_vm10 = vcmp.gt.f32.partialorder %v3191_v2, 0.0  ;;  %v3262_v17 = vmul.f32 %v9231_v27, %v3191_v2 }
 0x23d   : > { %7069 = vmatprep.mubr.msk.bf16.mxu1 %vm307_vm1, %v9473_v23  ;;  %v7050_v57 = vpop.f32.mrb[150].mxu0  ;;  %3328 = vst.msk [vmem:[#allocation2 + $0x148] sm:$0xff] %vm307_vm1, %v3296_v20  ;;  %vm3226_vm11 = vcmp.gt.f32.partialorder %v3194_v10, 0.0  ;;  %v3265_v7 = vmul.f32 %v9231_v27, %v3194_v10  ;;  %v3192_v16 = vadd.f32 %v9213_v0, %v2929_v41  ;;  %v9493_v9 = vpack.c.bf16 %v9460_v14, %v9458_v5 }
 0x23e   : > { %v2580_v37 = vpop.f32.mrb[151].mxu0  ;;  %v3294_v3 = vsel %vm3223_vm10, %v3191_v2, %v3262_v17  ;;  %v3493_v61 = vrot.slane %v9479_v45, 7  ;;  %v3495_v30 = vrot.slane %v9481_v43, 7  ;;  %v9506_v17 = vpack.c.bf16 %v9481_v43, %v9479_v45 }
 0x23f   : > { %11176 = vst [vmem:[#allocation23_spill] sm:$0xff] %v9493_v9  ;;  %3326 = vst.msk [vmem:[#allocation2 + $0x128] sm:$0xff] %vm307_vm1, %v3294_v3  ;;  %v3297_v51 = vsel %vm3226_vm11, %v3194_v10, %v3265_v7  ;;  %vm3224_vm12 = vcmp.gt.f32.partialorder %v3192_v16, 0.0  ;;  %v3263_v20 = vmul.f32 %v9231_v27, %v3192_v16  ;;  %7104 = vmatmul.mubr.msk.bf16.gmra.mrb[168].mxu0 %vm307_vm1, %v9493_v9  ;;  %v3013_v44 = vsel %vm307_vm1, %v7049_v55, 0.0  ;;  %v9515_v9 = vld [vmem:[#allocation2 + $0xe8] sm:$0xff] }
 0x240   : > { %3329 = vst.msk [vmem:[#allocation2 + $0x150] sm:$0xff] %vm307_vm1, %v3297_v51  ;;  %11177 = vst [vmem:[#allocation24_spill] sm:$0xff] %v9506_v17  ;;  %v2979_v10 = vsel %vm307_vm1, %v2577_v22, 0.0  ;;  %v3014_v3 = vadd.f32 %v3013_v44, %v9120_v8  ;;  %v11178_v51 = vrot.slane %v9173_v28, 7  ;;  %7107 = vmatprep.mubr.msk.bf16.mxu0 %vm307_vm1, %v9506_v17  ;;  %v3491_v55 = vsel %vm644_vm3, %v3488_v12, %v3490_v24 }
 0x241   : > { %v3295_v7 = vsel %vm3224_vm12, %v3192_v16, %v3263_v20  ;;  %v2980_v41 = vadd.f32 %v2979_v10, %v9125_v34  ;;  %v9517_v2 = vld [vmem:[#allocation2 + $0xf0] sm:$0xff]  ;;  %v3030_v22 = vsel %vm307_vm1, %v7050_v57, 0.0  ;;  %v11179_v8 = vrot.slane %v9175_v49, 7  ;;  %v9538_v57 = vld [vmem:[#allocation2 + $0x108] sm:$0xff] }
 0x242   : > { %v3489_v60 = vsel %vm644_vm3, %v11178_v51, %v3488_v12  ;;  %3327 = vst.msk [vmem:[#allocation2 + $0x130] sm:$0xff] %vm307_vm1, %v3295_v7  ;;  %v3496_v28 = vsel %vm644_vm3, %v3493_v61, %v3495_v30  ;;  %v3197_v16 = vadd.f32 %v9213_v0, %v3014_v3  ;;  %v3031_v7 = vadd.f32 %v3030_v22, %v9127_v4  ;;  %v9544_v4 = vld [vmem:[#allocation2 + $0x110] sm:$0xff] }
 0x243   : > { %v3494_v34 = vsel %vm644_vm3, %v11179_v8, %v3493_v61  ;;  %v7053_v44 = vpop.f32.mrb[152].mxu0  ;;  %v3195_v20 = vadd.f32 %v9213_v0, %v2980_v41  ;;  %v9530_v10 = vpack.c.bf16 %v3491_v55, %v3489_v60  ;;  %v2996_v12 = vsel %vm307_vm1, %v2580_v37, 0.0 }
 0x244   : > { %v2593_v51 = vpop.f32.mrb[153].mxu0  ;;  %v9533_v17 = vpack.c.bf16 %v3496_v28, %v3494_v34  ;;  %v3498_v49 = vrot.slane %v9515_v9, 7  ;;  %v3500_v24 = vrot.slane %v9517_v2, 7  ;;  %vm3229_vm13 = vcmp.gt.f32.partialorder %v3197_v16, 0.0 }
 0x245   : > { %11180 = vst [vmem:[#allocation25_spill] sm:$0xff] %v9530_v10  ;;  %v7054_v61 = vpop.f32.mrb[154].mxu0  ;;  %v3268_v30 = vmul.f32 %v9231_v27, %v3197_v16  ;;  %vm3227_vm14 = vcmp.gt.f32.partialorder %v3195_v20, 0.0  ;;  %v3266_v60 = vmul.f32 %v9231_v27, %v3195_v20  ;;  %7070 = vmatmul.mubr.msk.bf16.gmra.mrb[136].mxu1 %vm307_vm1, %v9530_v10  ;;  %v3198_v37 = vadd.f32 %v9213_v0, %v3031_v7 }
 0x246   : > { %11181 = vst [vmem:[#allocation26_spill] sm:$0xff] %v9533_v17  ;;  %v2596_v41 = vpop.f32.mrb[155].mxu0  ;;  %7073 = vmatprep.mubr.msk.bf16.mxu1 %vm307_vm1, %v9533_v17  ;;  %v2997_v3 = vadd.f32 %v2996_v12, %v9129_v40  ;;  %v9554_v28 = vpack.c.bf16 %v9517_v2, %v9515_v9  ;;  %v3503_v10 = vrot.slane %v9538_v57, 7  ;;  %v3505_v12 = vrot.slane %v9544_v4, 7  ;;  %v9586_v17 = vld [vmem:[#allocation2 + $0x128] sm:$0xff] }
 0x247   : > { %v3300_v8 = vsel %vm3229_vm13, %v3197_v16, %v3268_v30  ;;  %v3298_v34 = vsel %vm3227_vm14, %v3195_v20, %v3266_v60  ;;  %vm3230_vm15 = vcmp.gt.f32.partialorder %v3198_v37, 0.0  ;;  %v3269_v7 = vmul.f32 %v9231_v27, %v3198_v37 }
 0x248   : > { %11182 = vst [vmem:[#allocation27_spill] sm:$0xff] %v9554_v28  ;;  %3332 = vst.msk [vmem:[#allocation2 + $0x188] sm:$0xff] %vm307_vm1, %v3300_v8  ;;  %v3196_v40 = vadd.f32 %v9213_v0, %v2997_v3  ;;  %7108 = vmatmul.mubr.msk.bf16.gmra.mrb[172].mxu0 %vm307_vm1, %v9554_v28  ;;  %v9568_v30 = vpack.c.bf16 %v9544_v4, %v9538_v57  ;;  %v3081_v60 = vsel %vm307_vm1, %v7053_v44, 0.0  ;;  %v3047_v16 = vsel %vm307_vm1, %v2593_v51, 0.0 }
 0x249   : > { %3330 = vst.msk [vmem:[#allocation2 + $0x168] sm:$0xff] %vm307_vm1, %v3298_v34  ;;  %v3301_v8 = vsel %vm3230_vm15, %v3198_v37, %v3269_v7  ;;  %v3082_v3 = vadd.f32 %v3081_v60, %v9140_v39  ;;  %v11184_v20 = vrot.slane %v9184_v33, 7  ;;  %v3501_v44 = vsel %vm644_vm3, %v3498_v49, %v3500_v24 }
 0x24a   : > { %11183 = vst [vmem:[#allocation28_spill] sm:$0xff] %v9568_v30  ;;  %vm3228_vm2 = vcmp.gt.f32.partialorder %v3196_v40, 0.0  ;;  %v3267_v34 = vmul.f32 %v9231_v27, %v3196_v40  ;;  %3333 = vst.msk [vmem:[#allocation2 + $0x190] sm:$0xff] %vm307_vm1, %v3301_v8  ;;  %7111 = vmatprep.mubr.msk.bf16.mxu0 %vm307_vm1, %v9568_v30  ;;  %v3098_v37 = vsel %vm307_vm1, %v7054_v61, 0.0  ;;  %v3048_v60 = vadd.f32 %v3047_v16, %v9145_v6  ;;  %v9588_v30 = vld [vmem:[#allocation2 + $0x130] sm:$0xff] }
 0x24b   : > { %v7057_v55 = vpop.f32.mrb[156].mxu0  ;;  %v3499_v22 = vsel %vm644_vm3, %v11184_v20, %v3498_v49  ;;  %v3201_v39 = vadd.f32 %v9213_v0, %v3082_v3  ;;  %v3099_v33 = vadd.f32 %v3098_v37, %v9147_v62  ;;  %v11185_v49 = vrot.slane %v9177_v18, 7 }
 0x24c   : > { %v2609_v7 = vpop.f32.mrb[157].mxu0  ;;  %v3299_v28 = vsel %vm3228_vm2, %v3196_v40, %v3267_v34  ;;  %v9584_v8 = vpack.c.bf16 %v3501_v44, %v3499_v22  ;;  %v3506_v61 = vsel %vm644_vm3, %v3503_v10, %v3505_v12  ;;  %v3064_v40 = vsel %vm307_vm1, %v2596_v41, 0.0  ;;  %v9607_v41 = vld [vmem:[#allocation2 + $0x148] sm:$0xff]  ;;  %v9609_v12 = vld [vmem:[#allocation2 + $0x150] sm:$0xff] }
 0x24d   : > { %v7058_v51 = vpop.f32.mrb[158].mxu0  ;;  %3331 = vst.msk [vmem:[#allocation2 + $0x170] sm:$0xff] %vm307_vm1, %v3299_v28  ;;  %v3504_v24 = vsel %vm644_vm3, %v11185_v49, %v3503_v10  ;;  %vm3233_vm5 = vcmp.gt.f32.partialorder %v3201_v39, 0.0  ;;  %v3272_v22 = vmul.f32 %v9231_v27, %v3201_v39  ;;  %v3199_v16 = vadd.f32 %v9213_v0, %v3048_v60 }
 0x24e   : > { %v2612_v6 = vpop.f32.mrb[159].mxu0  ;;  %7074 = vmatmul.mubr.msk.bf16.gmra.mrb[140].mxu1 %vm307_vm1, %v9584_v8  ;;  %v9601_v28 = vpack.c.bf16 %v3506_v61, %v3504_v24  ;;  %v3202_v62 = vadd.f32 %v9213_v0, %v3099_v33  ;;  %v3065_v18 = vadd.f32 %v3064_v40, %v9153_v50  ;;  %v3508_v20 = vrot.slane %v9586_v17, 7 }
 0x24f   : > { %v3510_v10 = vrot.slane %v9588_v30, 7  ;;  %v3304_v34 = vsel %vm3233_vm5, %v3201_v39, %v3272_v22  ;;  %vm3231_vm6 = vcmp.gt.f32.partialorder %v3199_v16, 0.0  ;;  %v3270_v3 = vmul.f32 %v9231_v27, %v3199_v16 }
 0x250   : > { %7077 = vmatprep.mubr.msk.bf16.mxu1 %vm307_vm1, %v9601_v28  ;;  %3336 = vst.msk [vmem:[#allocation2 + $0x1c8] sm:$0xff] %vm307_vm1, %v3304_v34  ;;  %vm3234_vm7 = vcmp.gt.f32.partialorder %v3202_v62, 0.0  ;;  %v3273_v50 = vmul.f32 %v9231_v27, %v3202_v62  ;;  %v3200_v37 = vadd.f32 %v9213_v0, %v3065_v18  ;;  %v9621_v39 = vpack.c.bf16 %v9588_v30, %v9586_v17  ;;  %v9643_v44 = vld [vmem:[#allocation2 + $0x168] sm:$0xff] }
 0x251   : > { %v3302_v33 = vsel %vm3231_vm6, %v3199_v16, %v3270_v3  ;;  %v3513_v49 = vrot.slane %v9607_v41, 7  ;;  %v3515_v24 = vrot.slane %v9609_v12, 7  ;;  %v9634_v18 = vpack.c.bf16 %v9609_v12, %v9607_v41 }
 0x252   : > { %11186 = vst [vmem:[#allocation29_spill] sm:$0xff] %v9621_v39  ;;  %3334 = vst.msk [vmem:[#allocation2 + $0x1a8] sm:$0xff] %vm307_vm1, %v3302_v33  ;;  %v3305_v61 = vsel %vm3234_vm7, %v3202_v62, %v3273_v50  ;;  %vm3232_vm8 = vcmp.gt.f32.partialorder %v3200_v37, 0.0  ;;  %v3271_v40 = vmul.f32 %v9231_v27, %v3200_v37  ;;  %7112 = vmatmul.mubr.msk.bf16.gmra.mrb[176].mxu0 %vm307_vm1, %v9621_v39  ;;  %v3149_v34 = vsel %vm307_vm1, %v7057_v55, 0.0 }
 0x253   : > { %3337 = vst.msk [vmem:[#allocation2 + $0x1d0] sm:$0xff] %vm307_vm1, %v3305_v61  ;;  %11187 = vst [vmem:[#allocation30_spill] sm:$0xff] %v9634_v18  ;;  %v3115_v62 = vsel %vm307_vm1, %v2609_v7, 0.0  ;;  %v3150_v50 = vadd.f32 %v3149_v34, %v9180_v63  ;;  %v11188_v61 = vrot.slane %v9186_v53, 7  ;;  %7115 = vmatprep.mubr.msk.bf16.mxu0 %vm307_vm1, %v9634_v18  ;;  %v3511_v55 = vsel %vm644_vm3, %v3508_v20, %v3510_v10  ;;  %v9666_v10 = vld [vmem:[#allocation2 + $0x188] sm:$0xff] }
 0x254   : > { %v3303_v3 = vsel %vm3232_vm8, %v3200_v37, %v3271_v40  ;;  %v3116_v33 = vadd.f32 %v3115_v62, %v9191_v15  ;;  %v9645_v16 = vld [vmem:[#allocation2 + $0x170] sm:$0xff]  ;;  %v3166_v7 = vsel %vm307_vm1, %v7058_v51, 0.0  ;;  %v11189_v63 = vrot.slane %v9188_v26, 7  ;;  %v11190_v62 = vld [vmem:[#allocation6_spill] sm:$0xff] }
 0x255   : > { %v3509_v22 = vsel %vm644_vm3, %v11188_v61, %v3508_v20  ;;  %3335 = vst.msk [vmem:[#allocation2 + $0x1b0] sm:$0xff] %vm307_vm1, %v3303_v3  ;;  %v3516_v53 = vsel %vm644_vm3, %v3513_v49, %v3515_v24  ;;  %v3205_v37 = vadd.f32 %v9213_v0, %v3150_v50  ;;  %v3167_v3 = vadd.f32 %v3166_v7, %v11190_v62 }
 0x256   : > { %v3514_v15 = vsel %vm644_vm3, %v11189_v63, %v3513_v49  ;;  %v3203_v40 = vadd.f32 %v9213_v0, %v3116_v33  ;;  %v9658_v34 = vpack.c.bf16 %v3511_v55, %v3509_v22  ;;  %v3132_v20 = vsel %vm307_vm1, %v2612_v6, 0.0  ;;  %v9672_v22 = vld [vmem:[#allocation2 + $0x190] sm:$0xff] }
 0x257   : > { %v9661_v61 = vpack.c.bf16 %v3516_v53, %v3514_v15  ;;  %v3518_v51 = vrot.slane %v9643_v44, 7  ;;  %v3520_v26 = vrot.slane %v9645_v16, 7  ;;  %vm3237_vm9 = vcmp.gt.f32.partialorder %v3205_v37, 0.0  ;;  %v11191_v6 = vld [vmem:[#allocation9_spill] sm:$0xff] }
 0x258   : > { %v3276_v49 = vmul.f32 %v9231_v27, %v3205_v37  ;;  %vm3235_vm10 = vcmp.gt.f32.partialorder %v3203_v40, 0.0  ;;  %v3274_v24 = vmul.f32 %v9231_v27, %v3203_v40  ;;  %7078 = vmatmul.mubr.msk.bf16.gmra.mrb[144].mxu1 %vm307_vm1, %v9658_v34  ;;  %v3206_v50 = vadd.f32 %v9213_v0, %v3167_v3 }
 0x259   : > { %7081 = vmatprep.mubr.msk.bf16.mxu1 %vm307_vm1, %v9661_v61  ;;  %v3133_v33 = vadd.f32 %v3132_v20, %v11191_v6  ;;  %v9682_v53 = vpack.c.bf16 %v9645_v16, %v9643_v44  ;;  %v3523_v62 = vrot.slane %v9666_v10, 7  ;;  %v3525_v6 = vrot.slane %v9672_v22, 7  ;;  %v9690_v55 = vld [vmem:[#allocation2 + $0x1a8] sm:$0xff] }
 0x25a   : > { %v3308_v63 = vsel %vm3237_vm9, %v3205_v37, %v3276_v49  ;;  %v3306_v15 = vsel %vm3235_vm10, %v3203_v40, %v3274_v24  ;;  %vm3238_vm11 = vcmp.gt.f32.partialorder %v3206_v50, 0.0  ;;  %v3277_v3 = vmul.f32 %v9231_v27, %v3206_v50  ;;  %v11194_v24 = vld [vmem:[#allocation7_spill] sm:$0xff]  ;;  %v9709_v37 = vld [vmem:[#allocation2 + $0x1d0] sm:$0xff] }
 0x25b   : > { %11192 = vst [vmem:[#allocation6_spill] sm:$0xff] %v9682_v53  ;;  %3340 = vst.msk [vmem:[#allocation2 + $0x208] sm:$0xff] %vm307_vm1, %v3308_v63  ;;  %v3204_v20 = vadd.f32 %v9213_v0, %v3133_v33  ;;  %7116 = vmatmul.mubr.msk.bf16.gmra.mrb[180].mxu0 %vm307_vm1, %v9682_v53  ;;  %v9698_v49 = vpack.c.bf16 %v9672_v22, %v9666_v10  ;;  %v11195_v63 = vrot.slane %v11194_v24, 7  ;;  %v9707_v53 = vld [vmem:[#allocation2 + $0x1c8] sm:$0xff] }
 0x25c   : > { %3338 = vst.msk [vmem:[#allocation2 + $0x1e8] sm:$0xff] %vm307_vm1, %v3306_v15  ;;  %v9703_v0 = vld [vmem:[#allocation2 + $0x1b0] sm:$0xff]  ;;  %v3309_v33 = vsel %vm3238_vm11, %v3206_v50, %v3277_v3  ;;  %v3521_v60 = vsel %vm644_vm3, %v3518_v51, %v3520_v26  ;;  %v3526_v3 = vsel %vm644_vm3, %v3523_v62, %v3525_v6  ;;  %v11202_v6 = vrot.slane %v9317_v29, 1 }
 0x25d   : > { %11193 = vst [vmem:[#allocation9_spill] sm:$0xff] %v9698_v49  ;;  %v3519_v15 = vsel %vm644_vm3, %v11195_v63, %v3518_v51  ;;  %vm3236_vm12 = vcmp.gt.f32.partialorder %v3204_v20, 0.0  ;;  %v3275_v7 = vmul.f32 %v9231_v27, %v3204_v20  ;;  %3341 = vst.msk [vmem:[#allocation2 + $0x210] sm:$0xff] %vm307_vm1, %v3309_v33  ;;  %7119 = vmatprep.mubr.msk.bf16.mxu0 %vm307_vm1, %v9698_v49  ;;  %v11196_v63 = vld [vmem:[#allocation5_spill] sm:$0xff]  ;;  %v3528_v27 = vrot.slane %v9690_v55, 7 }
 0x25e   : > { %v9714_v24 = vpack.c.bf16 %v3521_v60, %v3519_v15  ;;  %v11197_v40 = vrot.slane %v11196_v63, 7  ;;  %v3530_v18 = vrot.slane %v9703_v0, 7  ;;  %v9741_v15 = vpack.c.bf16 %v9709_v37, %v9707_v53 }
 0x25f   : > { %v3307_v51 = vsel %vm3236_vm12, %v3204_v20, %v3275_v7  ;;  %v3535_v7 = vrot.slane %v9709_v37, 7  ;;  %v11199_v63 = vrot.slane %v9218_v54, 7  ;;  %v11201_v20 = vrot.slane %v9326_v47, 1 }
 0x260   : > { %v3524_v50 = vsel %vm644_vm3, %v11197_v40, %v3523_v62  ;;  %3339 = vst.msk [vmem:[#allocation2 + $0x1f0] sm:$0xff] %vm307_vm1, %v3307_v51  ;;  %7082 = vmatmul.mubr.msk.bf16.gmra.mrb[148].mxu1 %vm307_vm1, %v9714_v24  ;;  %v9731_v40 = vpack.c.bf16 %v9703_v0, %v9690_v55  ;;  %v3533_v62 = vrot.slane %v9707_v53, 7  ;;  %v11200_v51 = vrot.slane %v9220_v11, 7 }
 0x261   : > { %v9721_v26 = vpack.c.bf16 %v3526_v3, %v3524_v50  ;;  %v3529_v50 = vsel %vm644_vm3, %v11199_v63, %v3528_v27  ;;  %v3531_v3 = vsel %vm644_vm3, %v3528_v27, %v3530_v18  ;;  %v3597_v39 = vsel %vm773_vm4, %v11202_v6, %v11201_v20 }
 0x262   : > { %v3534_v33 = vsel %vm644_vm3, %v11200_v51, %v3533_v62  ;;  %v3536_v60 = vsel %vm644_vm3, %v3533_v62, %v3535_v7  ;;  %v11203_v27 = vrot.slane %v9197_v59, 1  ;;  %v11204_v62 = vmov %v11201_v20 }
 0x263   : > { %11198 = vst [vmem:[#allocation7_spill] sm:$0xff] %v9721_v26  ;;  %7085 = vmatprep.mubr.msk.bf16.mxu1 %vm307_vm1, %v9721_v26  ;;  %v9751_v49 = vld [vmem:[#allocation2 + $0x1e8] sm:$0xff]  ;;  %v9758_v26 = vpack.c.bf16 %v3531_v3, %v3529_v50  ;;  %v9760_v54 = vpack.c.bf16 %v3536_v60, %v3534_v33  ;;  %7120 = vmatmul.mubr.msk.bf16.gmra.mrb[184].mxu0 %vm307_vm1, %v9731_v40  ;;  %v11205_v29 = vrot.slane %v9336_v38, 1  ;;  %v11206_v20 = vrot.slane %v9329_v46, 1 }
 0x264   : > { %v3538_v18 = vrot.slane %v9751_v49, 7  ;;  %v3665_v11 = vrot.slane %v9751_v49, 1  ;;  %v3599_v7 = vsel %vm773_vm4, %v11204_v62, %v11203_v27  ;;  %v11207_v60 = vld [vmem:[#allocation8_spill] sm:$0xff]  ;;  %v11210_v3 = vrot.slane %v9374_v52, 1  ;;  %7123 = vmatprep.mubr.msk.bf16.mxu0 %vm307_vm1, %v9741_v15 }
 0x265   : > { %v3602_v33 = vsel %vm773_vm4, %v11206_v20, %v11205_v29  ;;  %v11208_v6 = vrot.slane %v11207_v60, 1  ;;  %v11209_v63 = vmov %v11205_v29  ;;  %v11211_v59 = vrot.slane %v9372_v31, 1 }
 0x266   : > { %v11212_v51 = vrot.slane %v9234_v21, 7  ;;  %v9791_v27 = vpack.c.bf16 %v3599_v7, %v3597_v39  ;;  %v11213_v38 = vrot.slane %v9223_v58, 1  ;;  %v11214_v29 = vmov %v11210_v3 }
 0x267   : > { %v3604_v50 = vsel %vm773_vm4, %v11209_v63, %v11208_v6  ;;  %v3607_v47 = vsel %vm773_vm4, %v11211_v59, %v11210_v3  ;;  %v11215_v60 = vrot.slane %v9406_v32, 1  ;;  %v11216_v6 = vrot.slane %v9395_v42, 1  ;;  %v11217_v63 = vld [vmem:[#allocation10_spill] sm:$0xff] }
 0x268   : > { %v3539_v46 = vsel %vm644_vm3, %v11212_v51, %v3538_v18  ;;  %v9793_v62 = vpack.c.bf16 %v3604_v50, %v3602_v33  ;;  %v3609_v20 = vsel %vm773_vm4, %v11214_v29, %v11213_v38  ;;  %v11218_v3 = vrot.slane %v11217_v63, 1  ;;  %v3404_v50 = vld [vmem:[#allocation2 + $0x1f0] sm:$0xff]  ;;  %7086 = vmatmul.mubr.msk.bf16.gmra.mrb[152].mxu1 %vm307_vm1, %v9758_v26 }
 0x269   : > { %v9800_v31 = vpack.c.bf16 %v3609_v20, %v3607_v47  ;;  %v3612_v21 = vsel %vm773_vm4, %v11216_v6, %v11215_v60  ;;  %v11219_v39 = vmov %v11215_v60  ;;  %v11220_v58 = vrot.slane %v9460_v14, 1  ;;  %v11222_v47 = vld [vmem:[#allocation11_spill] sm:$0xff]  ;;  %v11227_v60 = vld [vmem:[#allocation12_spill] sm:$0xff]  ;;  %7089 = vmatprep.mubr.msk.bf16.mxu1 %vm307_vm1, %v9760_v54 }
 0x26a   : > { %v3614_v7 = vsel %vm773_vm4, %v11219_v39, %v11218_v3  ;;  %v11221_v52 = vrot.slane %v9458_v5, 1  ;;  %v11223_v51 = vrot.slane %v11222_v47, 1  ;;  %v11225_v29 = vrot.slane %v9481_v43, 1 }
 0x26b   : > { %v9817_v59 = vpack.c.bf16 %v3614_v7, %v3612_v21  ;;  %v11224_v42 = vmov %v11220_v58  ;;  %v11226_v32 = vrot.slane %v9479_v45, 1  ;;  %v11228_v6 = vrot.slane %v11227_v60, 1 }
 0x26c   : > { %v3617_v33 = vsel %vm773_vm4, %v11221_v52, %v11220_v58  ;;  %v3619_v38 = vsel %vm773_vm4, %v11224_v42, %v11223_v51  ;;  %v11229_v5 = vmov %v11225_v29  ;;  %v3540_v21 = vrot.slane %v3404_v50, 7  ;;  %v11232_v52 = vld [vmem:[#allocation13_spill] sm:$0xff] }
 0x26d   : > { %v3622_v20 = vsel %vm773_vm4, %v11226_v32, %v11225_v29  ;;  %v3624_v63 = vsel %vm773_vm4, %v11229_v5, %v11228_v6  ;;  %v3666_v3 = vrot.slane %v3404_v50, 1  ;;  %v9837_v14 = vpack.c.bf16 %v3404_v50, %v9751_v49  ;;  %v11237_v32 = vld [vmem:[#allocation14_spill] sm:$0xff] }
 0x26e   : > { %v9839_v39 = vpack.c.bf16 %v3619_v38, %v3617_v33  ;;  %v9843_v45 = vpack.c.bf16 %v3624_v63, %v3622_v20  ;;  %v11230_v7 = vrot.slane %v9517_v2, 1  ;;  %v11231_v43 = vrot.slane %v9515_v9, 1 }
 0x26f   : > { %v11233_v47 = vrot.slane %v11232_v52, 1  ;;  %v11235_v33 = vrot.slane %v9544_v4, 1  ;;  %v11236_v50 = vrot.slane %v9538_v57, 1  ;;  %v3541_v38 = vsel %vm644_vm3, %v3538_v18, %v3540_v21  ;;  %7124 = vmatmul.mubr.msk.bf16.gmra.mrb[188].mxu0 %vm307_vm1, %v9837_v14 }
 0x270   : > { %v3627_v58 = vsel %vm773_vm4, %v11231_v43, %v11230_v7  ;;  %v11234_v51 = vmov %v11230_v7  ;;  %v11238_v9 = vrot.slane %v11237_v32, 1  ;;  %v11240_v2 = vrot.slane %v9588_v30, 1  ;;  %7163 = vmatprep.mubr.msk.bf16.mxu0 %vm307_vm1, %v9387_v19 }
 0x271   : > { %v3629_v49 = vsel %vm773_vm4, %v11234_v51, %v11233_v47  ;;  %v3632_v42 = vsel %vm773_vm4, %v11236_v50, %v11235_v33  ;;  %v11239_v20 = vmov %v11235_v33  ;;  %v11241_v6 = vrot.slane %v9586_v17, 1 }
 0x272   : > { %v9861_v29 = vpack.c.bf16 %v3629_v49, %v3627_v58  ;;  %v3634_v60 = vsel %vm773_vm4, %v11239_v20, %v11238_v9  ;;  %v9873_v63 = vpack.c.bf16 %v3541_v38, %v3539_v46  ;;  %v11242_v18 = vrot.slane %v9273_v48, 1  ;;  %v11254_v38 = vld [vmem:[#allocation15_spill] sm:$0xff]  ;;  %v3409_v9 = vld [vmem:[#allocation2 + $0x218] sm:$0x1] }
 0x273   : > { %v3637_v5 = vsel %vm773_vm4, %v11241_v6, %v11240_v2  ;;  %v9875_v57 = vpack.c.bf16 %v3634_v60, %v3632_v42  ;;  %v11243_v21 = vmov %v11240_v2  ;;  %v11244_v4 = vrot.slane %v9609_v12, 1  ;;  %v11259_v6 = vld [vmem:[#allocation17_spill] sm:$0xff] }
 0x274   : > { %v3639_v7 = vsel %vm773_vm4, %v11243_v21, %v11242_v18  ;;  %v11245_v43 = vrot.slane %v9607_v41, 1  ;;  %v11246_v46 = vrot.slane %v9278_v36, 1  ;;  %v11248_v30 = vrot.slane %v9645_v16, 1  ;;  %7090 = vmatmul.mubr.msk.bf16.gmra.mrb[156].mxu1 %vm307_vm1, %v9873_v63 }
 0x275   : > { %v9889_v17 = vpack.c.bf16 %v3639_v7, %v3637_v5  ;;  %v11247_v52 = vmov %v11244_v4  ;;  %v11249_v47 = vrot.slane %v9643_v44, 1  ;;  %v11250_v41 = vrot.slane %v9283_v56, 1 }
 0x276   : > { %v3642_v58 = vsel %vm773_vm4, %v11245_v43, %v11244_v4  ;;  %v3644_v48 = vsel %vm773_vm4, %v11247_v52, %v11246_v46  ;;  %v11251_v49 = vmov %v11248_v30  ;;  %v11252_v50 = vrot.slane %v9672_v22, 1  ;;  %v11264_v43 = vld [vmem:[#allocation16_spill] sm:$0xff] }
 0x277   : > { %v3647_v51 = vsel %vm773_vm4, %v11249_v47, %v11248_v30  ;;  %v3649_v33 = vsel %vm773_vm4, %v11251_v49, %v11250_v41  ;;  %v9908_v36 = vpack.c.bf16 %v3644_v48, %v3642_v58  ;;  %v11253_v42 = vrot.slane %v9666_v10, 1  ;;  %v3407_v52 = vld [vmem:[#allocation2 + $0x208] sm:$0xff]  ;;  %v3408_v48 = vld [vmem:[#allocation2 + $0x210] sm:$0xff]  ;;  %7164 = vmatmul.mubr.msk.bf16.vlgmr.msra.gmra.mrb[192].mxu0 %vm307_vm1, %v9390_v1 }
 0x278   : > { %v9910_v12 = vpack.c.bf16 %v3649_v33, %v3647_v51  ;;  %v11255_v32 = vrot.slane %v11254_v38, 1  ;;  %v11256_v56 = vmov %v11252_v50  ;;  %v11257_v19 = vrot.slane %v9703_v0, 1  ;;  %v11269_v49 = vld [vmem:[#allocation4_spill] sm:$0xff]  ;;  %v11270_v33 = vld [vmem:[#allocation3_spill] sm:$0xff]  ;;  %7167 = vmatprep.mubr.msk.bf16.mxu0 %vm307_vm1, %v9456_v25 }
 0x279   : > { %v3652_v44 = vsel %vm773_vm4, %v11253_v42, %v11252_v50  ;;  %v11258_v60 = vrot.slane %v9690_v55, 1  ;;  %v11260_v5 = vrot.slane %v11259_v6, 1  ;;  %v11262_v21 = vrot.slane %v9709_v37, 1 }
 0x27a   : > { %v3654_v16 = vsel %vm773_vm4, %v11256_v56, %v11255_v32  ;;  %v11261_v10 = vmov %v11257_v19  ;;  %v11263_v22 = vrot.slane %v9707_v53, 1  ;;  %v11265_v58 = vrot.slane %v11264_v43, 1  ;;  %v11267_v53 = vld [vmem:[#allocation18_spill] sm:$0xff]  ;;  %v11275_v43 = vld [vmem:[#allocation19_spill] sm:$0xff] }
 0x27b   : > { %v9922_v20 = vpack.c.bf16 %v3654_v16, %v3652_v44  ;;  %v3657_v2 = vsel %vm773_vm4, %v11258_v60, %v11257_v19  ;;  %v3659_v18 = vsel %vm773_vm4, %v11261_v10, %v11260_v5  ;;  %v11266_v55 = vmov %v11262_v21  ;;  %v11272_v19 = vld [vmem:[#allocation25_spill] sm:$0xff]  ;;  %v11274_v60 = vld [vmem:[#allocation7_spill] sm:$0xff] }
 0x27c   : > { %v3662_v7 = vsel %vm773_vm4, %v11263_v22, %v11262_v21  ;;  %v9939_v4 = vpack.c.bf16 %v3659_v18, %v3657_v2  ;;  %v3664_v46 = vsel %vm773_vm4, %v11266_v55, %v11265_v58  ;;  %v3667_v30 = vsel %vm773_vm4, %v3665_v11, %v3666_v3  ;;  %v3799_v11 = vld [vmem:[%s11046_s2 + $0xe] sm:$0x3]  ;;  %v3406_v2 = vld [vmem:[#allocation2 + $0x200] sm:$0xff]  ;;  %v10048_v58 = vld [vmem:[#allocation2 + $0x230] sm:$0xff] }
 0x27d   : > { %v9948_v0 = vpack.c.bf16 %v3664_v46, %v3662_v7  ;;  %v11268_v47 = vrot.slane %v11267_v53, 1  ;;  %v3716_v41 = vrot.slane %v3409_v9, 1  ;;  %v11271_v50 = vpack.c.bf16 %v11269_v49, %v11270_v33  ;;  %v3798_v9 = vld [vmem:[%s11046_s2 + $0xc] sm:$0x3]  ;;  %v3413_v55 = vld [vmem:[#allocation2 + $0x238] sm:$0x1] }
 0x27e   : > { %v4775_v42 = vsel %vm1033_vm0, %v9418_v35, 0  ;;  %v3713_v44 = vrot.slane %v3407_v52, 1  ;;  %v3714_v38 = vrot.slane %v3408_v48, 1  ;;  %v9962_v32 = vpack.c.bf16 %v3408_v48, %v3407_v52  ;;  %v10044_v7 = vld [vmem:[#allocation2 + $0x228] sm:$0xff]  ;;  %v11277_v33 = vld [vmem:[#allocation21_spill] sm:$0xff] }
 0x27f   : > { %v3669_v51 = vsel %vm773_vm4, %v3666_v3, %v11268_v47  ;;  %7129 = vmatprep.mubr.msk.bf16.mxu1 %vm307_vm1, %v11271_v50  ;;  %7230 = vmatpush3.bf16.msra.mxu0 %v4775_v42  ;;  %v4608_v16 = vsel %vm1033_vm0, %v9400_v13, 0  ;;  %v11273_v13 = vld [vmem:[#allocation26_spill] sm:$0xff]  ;;  %v3708_v6 = vrot.slane %v3408_v48, 7  ;;  %v3705_v5 = vrot.slane %v3406_v2, 7  ;;  %v11276_v49 = vld [vmem:[#allocation20_spill] sm:$0xff]  ;;  %v11279_v42 = vld [vmem:[#allocation23_spill] sm:$0xff] }
 0x280   : > { %v9958_v37 = vpack.c.bf16 %v3669_v51, %v3667_v30  ;;  %v3715_v3 = vsel %vm773_vm4, %v3713_v44, %v3714_v38  ;;  %v3717_v56 = vsel %vm773_vm4, %v3714_v38, %v3716_v41  ;;  %7381 = vmatprep.subr.msk.bf16.mxu0 %vm1033_vm0, %v3799_v11  ;;  %7130 = vmatmul.mubr.msk.bf16.vlgmr.msra.gmra.mrb[160].mxu1 %vm307_vm1, %v9791_v27  ;;  %v3706_v10 = vrot.slane %v3407_v52, 7  ;;  %v3800_v41 = vld [vmem:[%s11046_s2 + $0x10] sm:$0x3]  ;;  %v11278_v50 = vld [vmem:[#allocation22_spill] sm:$0xff]  ;;  %v11280_v44 = vld [vmem:[#allocation24_spill] sm:$0xff] }
 0x281   : > { %v9973_v35 = vpack.c.bf16 %v3717_v56, %v3715_v3  ;;  %7196 = vmatpush3.bf16.msra.mxu1 %v4608_v16  ;;  %7133 = vmatprep.mubr.msk.bf16.mxu1 %vm307_vm1, %v9793_v62  ;;  %v3731_v46 = vrot.slane %v10044_v7, 1  ;;  %v5109_v52 = vsel %vm1033_vm0, %v3799_v11, 0  ;;  %v3732_v48 = vrot.slane %v10048_v58, 1  ;;  %v11281_v38 = vld [vmem:[#allocation27_spill] sm:$0xff]  ;;  %v11282_v11 = vld [vmem:[#allocation28_spill] sm:$0xff]  ;;  %v11283_v3 = vld [vmem:[#allocation29_spill] sm:$0xff] }
 0x282   : > { %7380 = vmatprep.subr.msk.bf16.mxu1 %vm1033_vm0, %v3798_v9  ;;  %7168 = vmatmul.mubr.msk.bf16.gmra.mrb[196].mxu0 %vm307_vm1, %v9473_v23  ;;  %v3709_v18 = vsel %vm644_vm3, %v3706_v10, %v3708_v6  ;;  %v3707_v21 = vsel %vm644_vm3, %v3705_v5, %v3706_v10  ;;  %v3734_v30 = vrot.slane %v3413_v55, 1  ;;  %v4942_v51 = vsel %vm1033_vm0, %v3798_v9, 0  ;;  %v11284_v56 = vld [vmem:[#allocation30_spill] sm:$0xff]  ;;  %v11286_v9 = vld [vmem:[#allocation9_spill] sm:$0xff] }
 0x283   : > { %7171 = vmatprep.mubr.msk.bf16.mxu0 %vm307_vm1, %v11272_v19  ;;  %v10036_v22 = vpack.c.bf16 %v3709_v18, %v3707_v21  ;;  %v11285_v16 = vld [vmem:[#allocation6_spill] sm:$0xff]  ;;  %v5276_v2 = vsel %vm1033_vm0, %v3800_v41, 0 }
 0x284   : > { %v10059_v53 = vsel %vm773_vm4, %v3732_v48, %v3734_v30 }
 0x288   : > { %7134 = vmatmul.mubr.msk.bf16.gmra.mrb[164].mxu1 %vm307_vm1, %v9800_v31 }
 0x289   : > { %7137 = vmatprep.mubr.msk.bf16.mxu1 %vm307_vm1, %v9817_v59 }
 0x28a   : > { %7172 = vmatmul.mubr.msk.bf16.gmra.mrb[200].mxu0 %vm307_vm1, %v11273_v13 }
 0x28b   : > { %7175 = vmatprep.mubr.msk.bf16.mxu0 %vm307_vm1, %v9584_v8 }
 0x290   : > { %7138 = vmatmul.mubr.msk.bf16.gmra.mrb[168].mxu1 %vm307_vm1, %v9839_v39 }
 0x291   : > { %7141 = vmatprep.mubr.msk.bf16.mxu1 %vm307_vm1, %v9843_v45 }
 0x292   : > { %7176 = vmatmul.mubr.msk.bf16.gmra.mrb[204].mxu0 %vm307_vm1, %v9601_v28 }
 0x293   : > { %7179 = vmatprep.mubr.msk.bf16.mxu0 %vm307_vm1, %v9658_v34 }
 0x298   : > { %7142 = vmatmul.mubr.msk.bf16.gmra.mrb[172].mxu1 %vm307_vm1, %v9861_v29 }
 0x299   : > { %7145 = vmatprep.mubr.msk.bf16.mxu1 %vm307_vm1, %v9875_v57 }
 0x29a   : > { %7180 = vmatmul.mubr.msk.bf16.gmra.mrb[208].mxu0 %vm307_vm1, %v9661_v61 }
 0x29b   : > { %7183 = vmatprep.mubr.msk.bf16.mxu0 %vm307_vm1, %v9714_v24 }
 0x2a0   : > { %7146 = vmatmul.mubr.msk.bf16.gmra.mrb[176].mxu1 %vm307_vm1, %v9889_v17 }
 0x2a1   : > { %7149 = vmatprep.mubr.msk.bf16.mxu1 %vm307_vm1, %v9908_v36 }
 0x2a2   : > { %7184 = vmatmul.mubr.msk.bf16.gmra.mrb[212].mxu0 %vm307_vm1, %v11274_v60 }
 0x2a3   : > { %7187 = vmatprep.mubr.msk.bf16.mxu0 %vm307_vm1, %v9758_v26 }
 0x2a8   : > { %7150 = vmatmul.mubr.msk.bf16.gmra.mrb[180].mxu1 %vm307_vm1, %v9910_v12 }
 0x2a9   : > { %7153 = vmatprep.mubr.msk.bf16.mxu1 %vm307_vm1, %v9922_v20 }
 0x2aa   : > { %7188 = vmatmul.mubr.msk.bf16.gmra.mrb[216].mxu0 %vm307_vm1, %v9760_v54 }
 0x2ab   : > { %7191 = vmatprep.mubr.msk.bf16.mxu0 %vm307_vm1, %v9873_v63 }
 0x2b0   : > { %7154 = vmatmul.mubr.msk.bf16.gmra.mrb[184].mxu1 %vm307_vm1, %v9939_v4 }
 0x2b1   : > { %7157 = vmatprep.mubr.msk.bf16.mxu1 %vm307_vm1, %v9948_v0 }
 0x2b2   : > { %7192 = vmatmul.mubr.msk.bf16.gmra.mrb[220].mxu0 %vm307_vm1, %v10036_v22 }
 0x2b3   : > { %7231 = vmatprep.mubr.msk.bf16.mxu0 %vm307_vm1, %v9791_v27  ;;  %v10056_v27 = vsel %vm773_vm4, %v3731_v46, %v3732_v48 }
 0x2b4   : > { %v3791_v47 = vpack.c.bf16 %v10059_v53, %v10056_v27 }
 0x2b8   : > { %7158 = vmatmul.mubr.msk.bf16.gmra.mrb[188].mxu1 %vm307_vm1, %v9958_v37 }
 0x2b9   : > { %7197 = vmatprep.mubr.msk.bf16.mxu1 %vm307_vm1, %v11275_v43 }
 0x2ba   : > { %7232 = vmatmul.mubr.msk.bf16.vlgmr.msra.gmra.mrb[224].mxu0 %vm307_vm1, %v9793_v62 }
 0x2bb   : > { %7235 = vmatprep.mubr.msk.bf16.mxu0 %vm307_vm1, %v9800_v31  ;;  %7298 = vmatpush3.bf16.msra.mxu0 %v5109_v52 }
 0x2c0   : > { %7198 = vmatmul.mubr.msk.bf16.vlgmr.msra.gmra.mrb[192].mxu1 %vm307_vm1, %v11276_v49 }
 0x2c1   : > { %7264 = vmatpush3.bf16.msra.mxu1 %v4942_v51  ;;  %7201 = vmatprep.mubr.msk.bf16.mxu1 %vm307_vm1, %v11277_v33 }
 0x2c2   : > { %7382 = vmatprep.subr.msk.bf16.mxu1 %vm1033_vm0, %v3800_v41  ;;  %7236 = vmatmul.mubr.msk.bf16.gmra.mrb[228].mxu0 %vm307_vm1, %v9817_v59 }
 0x2c3   : > { %7239 = vmatprep.mubr.msk.bf16.mxu0 %vm307_vm1, %v9839_v39 }
 0x2c8   : > { %7202 = vmatmul.mubr.msk.bf16.gmra.mrb[196].mxu1 %vm307_vm1, %v11278_v50 }
 0x2c9   : > { %7205 = vmatprep.mubr.msk.bf16.mxu1 %vm307_vm1, %v11279_v42 }
 0x2ca   : > { %7240 = vmatmul.mubr.msk.bf16.gmra.mrb[232].mxu0 %vm307_vm1, %v9843_v45 }
 0x2cb   : > { %7243 = vmatprep.mubr.msk.bf16.mxu0 %vm307_vm1, %v9861_v29 }
 0x2d0   : > { %7206 = vmatmul.mubr.msk.bf16.gmra.mrb[200].mxu1 %vm307_vm1, %v11280_v44 }
 0x2d1   : > { %7209 = vmatprep.mubr.msk.bf16.mxu1 %vm307_vm1, %v11281_v38 }
 0x2d2   : > { %7244 = vmatmul.mubr.msk.bf16.gmra.mrb[236].mxu0 %vm307_vm1, %v9875_v57 }
 0x2d3   : > { %7247 = vmatprep.mubr.msk.bf16.mxu0 %vm307_vm1, %v9889_v17 }
 0x2d8   : > { %7210 = vmatmul.mubr.msk.bf16.gmra.mrb[204].mxu1 %vm307_vm1, %v11282_v11 }
 0x2d9   : > { %7213 = vmatprep.mubr.msk.bf16.mxu1 %vm307_vm1, %v11283_v3 }
 0x2da   : > { %7248 = vmatmul.mubr.msk.bf16.gmra.mrb[240].mxu0 %vm307_vm1, %v9908_v36 }
 0x2db   : > { %7251 = vmatprep.mubr.msk.bf16.mxu0 %vm307_vm1, %v9910_v12 }
 0x2e0   : > { %7214 = vmatmul.mubr.msk.bf16.gmra.mrb[208].mxu1 %vm307_vm1, %v11284_v56 }
 0x2e1   : > { %7217 = vmatprep.mubr.msk.bf16.mxu1 %vm307_vm1, %v11285_v16 }
 0x2e2   : > { %7252 = vmatmul.mubr.msk.bf16.gmra.mrb[244].mxu0 %vm307_vm1, %v9922_v20 }
 0x2e3   : > { %7255 = vmatprep.mubr.msk.bf16.mxu0 %vm307_vm1, %v9939_v4 }
 0x2e8   : > { %7218 = vmatmul.mubr.msk.bf16.gmra.mrb[212].mxu1 %vm307_vm1, %v11286_v9 }
 0x2e9   : > { %7221 = vmatprep.mubr.msk.bf16.mxu1 %vm307_vm1, %v9731_v40 }
 0x2ea   : > { %7256 = vmatmul.mubr.msk.bf16.gmra.mrb[248].mxu0 %vm307_vm1, %v9948_v0 }
 0x2eb   : > { %7259 = vmatprep.mubr.msk.bf16.mxu0 %vm307_vm1, %v9958_v37 }
 0x2f0   : > { %7222 = vmatmul.mubr.msk.bf16.gmra.mrb[216].mxu1 %vm307_vm1, %v9741_v15 }
 0x2f1   : > { %7225 = vmatprep.mubr.msk.bf16.mxu1 %vm307_vm1, %v9837_v14 }
 0x2f2   : > { %7260 = vmatmul.mubr.msk.bf16.gmra.mrb[252].mxu0 %vm307_vm1, %v9973_v35 }
 0x2f3   : > { %7299 = vmatprep.mubr.msk.bf16.mxu0 %vm307_vm1, %v11276_v49 }
 0x2f8   : > { %7226 = vmatmul.mubr.msk.bf16.gmra.mrb[220].mxu1 %vm307_vm1, %v9962_v32 }
 0x2f9   : > { %7265 = vmatprep.mubr.msk.bf16.mxu1 %vm307_vm1, %v9390_v1 }
 0x2fa   : > { %7300 = vmatmul.mubr.msk.bf16.vlgmr.msra.gmra.mrb[0].mxu0 %vm307_vm1, %v11277_v33 }
 0x2fb   : > { %7303 = vmatprep.mubr.msk.bf16.mxu0 %vm307_vm1, %v11278_v50 }
 0x2fd   : > { %v7097_v6 = vpop.f32.mrb[160].mxu0 }
 0x2fe   : > { %v4098_v1 = vpop.f32.mrb[161].mxu0 }
 0x2ff   : > { %v7098_v5 = vpop.f32.mrb[162].mxu0  ;;  %v5440_v43 = vsel %vm307_vm1, %v4098_v1, 0.0 }
 0x300   : > { %7266 = vmatmul.mubr.msk.bf16.vlgmr.msra.gmra.mrb[224].mxu1 %vm307_vm1, %v9456_v25  ;;  %v4101_v10 = vpop.f32.mrb[163].mxu0 }
 0x301   : > { %7332 = vmatpush3.bf16.msra.mxu1 %v5276_v2  ;;  %7269 = vmatprep.mubr.msk.bf16.mxu1 %vm307_vm1, %v9473_v23  ;;  %v5474_v23 = vsel %vm307_vm1, %v7097_v6, 0.0  ;;  %v5457_v51 = vsel %vm307_vm1, %v4101_v10, 0.0 }
 0x302   : > { %7304 = vmatmul.mubr.msk.bf16.gmra.mrb[4].mxu0 %vm307_vm1, %v11279_v42 }
 0x303   : > { %7307 = vmatprep.mubr.msk.bf16.mxu0 %vm307_vm1, %v11280_v44 }
 0x304   : > { %v7063_v25 = vpop.f32.mrb[128].mxu1 }
 0x305   : > { %v5473_v18 = vsel %vm307_vm1, %v7063_v25, 0.0  ;;  %v3886_v21 = vpop.f32.mrb[129].mxu1 }
 0x306   : > { %v10154_v55 = vadd.f32 %v5474_v23, %v5473_v18  ;;  %v7064_v46 = vpop.f32.mrb[130].mxu1 }
 0x307   : > { %v5490_v48 = vsel %vm307_vm1, %v7064_v46, 0.0  ;;  %v3889_v30 = vpop.f32.mrb[131].mxu1 }
 0x308   : > { %7270 = vmatmul.mubr.msk.bf16.gmra.mrb[228].mxu1 %vm307_vm1, %v11272_v19  ;;  %v5439_v19 = vsel %vm307_vm1, %v3886_v21, 0.0  ;;  %v5456_v49 = vsel %vm307_vm1, %v3889_v30, 0.0  ;;  %v7101_v33 = vpop.f32.mrb[164].mxu0 }
 0x309   : > { %7273 = vmatprep.mubr.msk.bf16.mxu1 %vm307_vm1, %v11273_v13  ;;  %v5491_v13 = vsel %vm307_vm1, %v7098_v5, 0.0  ;;  %v10158_v52 = vadd.f32 %v5440_v43, %v5439_v19  ;;  %v10167_v50 = vadd.f32 %v5457_v51, %v5456_v49  ;;  %v4114_v42 = vpop.f32.mrb[165].mxu0  ;;  %v5542_v2 = vsel %vm307_vm1, %v7101_v33, 0.0 }
 0x30a   : > { %7308 = vmatmul.mubr.msk.bf16.gmra.mrb[8].mxu0 %vm307_vm1, %v11281_v38  ;;  %v10162_v41 = vadd.f32 %v5491_v13, %v5490_v48  ;;  %v7102_v44 = vpop.f32.mrb[166].mxu0  ;;  %v5508_v1 = vsel %vm307_vm1, %v4114_v42, 0.0 }
 0x30b   : > { %7311 = vmatprep.mubr.msk.bf16.mxu0 %vm307_vm1, %v11282_v11  ;;  %v4117_v38 = vpop.f32.mrb[167].mxu0  ;;  %v5559_v25 = vsel %vm307_vm1, %v7102_v44, 0.0 }
 0x30e   : > { %v7067_v11 = vpop.f32.mrb[132].mxu1 }
 0x30f   : > { %v5541_v6 = vsel %vm307_vm1, %v7067_v11, 0.0 }
 0x310   : > { %7274 = vmatmul.mubr.msk.bf16.gmra.mrb[232].mxu1 %vm307_vm1, %v9584_v8  ;;  %v3902_v8 = vpop.f32.mrb[133].mxu1  ;;  %v10178_v5 = vadd.f32 %v5542_v2, %v5541_v6 }
 0x311   : > { %7277 = vmatprep.mubr.msk.bf16.mxu1 %vm307_vm1, %v9601_v28  ;;  %v5507_v28 = vsel %vm307_vm1, %v3902_v8, 0.0  ;;  %v7068_v10 = vpop.f32.mrb[134].mxu1 }
 0x312   : > { %7312 = vmatmul.mubr.msk.bf16.gmra.mrb[12].mxu0 %vm307_vm1, %v11283_v3  ;;  %v10182_v23 = vadd.f32 %v5508_v1, %v5507_v28  ;;  %v5558_v3 = vsel %vm307_vm1, %v7068_v10, 0.0  ;;  %v3905_v18 = vpop.f32.mrb[135].mxu1  ;;  %v7105_v46 = vpop.f32.mrb[168].mxu0 }
 0x313   : > { %7315 = vmatprep.mubr.msk.bf16.mxu0 %vm307_vm1, %v11284_v56  ;;  %v5525_v56 = vsel %vm307_vm1, %v4117_v38, 0.0  ;;  %v10188_v21 = vadd.f32 %v5559_v25, %v5558_v3  ;;  %v5524_v43 = vsel %vm307_vm1, %v3905_v18, 0.0  ;;  %v4130_v13 = vpop.f32.mrb[169].mxu0  ;;  %v5610_v51 = vsel %vm307_vm1, %v7105_v46, 0.0 }
 0x314   : > { %v10193_v19 = vadd.f32 %v5525_v56, %v5524_v43  ;;  %v7106_v48 = vpop.f32.mrb[170].mxu0  ;;  %v5576_v33 = vsel %vm307_vm1, %v4130_v13, 0.0 }
 0x315   : > { %v5627_v44 = vsel %vm307_vm1, %v7106_v48, 0.0  ;;  %v3410_v48 = vld [vmem:[#allocation2 + $0x220] sm:$0xff] }
 0x318   : > { %7278 = vmatmul.mubr.msk.bf16.gmra.mrb[236].mxu1 %vm307_vm1, %v9658_v34  ;;  %v4133_v34 = vpop.f32.mrb[171].mxu0  ;;  %v7071_v30 = vpop.f32.mrb[136].mxu1 }
 0x319   : > { %7281 = vmatprep.mubr.msk.bf16.mxu1 %vm307_vm1, %v9661_v61  ;;  %v5609_v61 = vsel %vm307_vm1, %v7071_v30, 0.0  ;;  %v3918_v49 = vpop.f32.mrb[137].mxu1  ;;  %v5593_v2 = vsel %vm307_vm1, %v4133_v34, 0.0 }
 0x31a   : > { %7316 = vmatmul.mubr.msk.bf16.gmra.mrb[16].mxu0 %vm307_vm1, %v11285_v16  ;;  %v10206_v16 = vadd.f32 %v5610_v51, %v5609_v61  ;;  %v5575_v42 = vsel %vm307_vm1, %v3918_v49, 0.0 }
 0x31b   : > { %7319 = vmatprep.mubr.msk.bf16.mxu0 %vm307_vm1, %v11286_v9  ;;  %v7072_v9 = vpop.f32.mrb[138].mxu1  ;;  %v10210_v38 = vadd.f32 %v5576_v33, %v5575_v42  ;;  %v7109_v1 = vpop.f32.mrb[172].mxu0  ;;  %v3723_v42 = vrot.slane %v3410_v48, 7 }
 0x31c   : > { %v5626_v11 = vsel %vm307_vm1, %v7072_v9, 0.0  ;;  %v4146_v28 = vpop.f32.mrb[173].mxu0  ;;  %v5678_v18 = vsel %vm307_vm1, %v7109_v1, 0.0  ;;  %v3724_v9 = vrot.slane %v10044_v7, 7 }
 0x31d   : > { %v10214_v6 = vadd.f32 %v5627_v44, %v5626_v11  ;;  %v7110_v10 = vpop.f32.mrb[174].mxu0  ;;  %v5644_v43 = vsel %vm307_vm1, %v4146_v28, 0.0  ;;  %v3726_v44 = vrot.slane %v10048_v58, 7 }
 0x31e   : > { %v4149_v25 = vpop.f32.mrb[175].mxu0  ;;  %v5695_v34 = vsel %vm307_vm1, %v7110_v10, 0.0 }
 0x31f   : > { %v3727_v1 = vsel %vm644_vm3, %v3724_v9, %v3726_v44 }
 0x320   : > { %7282 = vmatmul.mubr.msk.bf16.gmra.mrb[240].mxu1 %vm307_vm1, %v9714_v24  ;;  %v3921_v24 = vpop.f32.mrb[139].mxu1 }
 0x321   : > { %7285 = vmatprep.mubr.msk.bf16.mxu1 %vm307_vm1, %v11274_v60  ;;  %v5592_v8 = vsel %vm307_vm1, %v3921_v24, 0.0  ;;  %v7075_v3 = vpop.f32.mrb[140].mxu1 }
 0x322   : > { %7320 = vmatmul.mubr.msk.bf16.gmra.mrb[20].mxu0 %vm307_vm1, %v9731_v40  ;;  %v10219_v60 = vadd.f32 %v5593_v2, %v5592_v8  ;;  %v5677_v56 = vsel %vm307_vm1, %v7075_v3, 0.0  ;;  %v3934_v40 = vpop.f32.mrb[141].mxu1 }
 0x323   : > { %7323 = vmatprep.mubr.msk.bf16.mxu0 %vm307_vm1, %v9741_v15  ;;  %v10230_v46 = vadd.f32 %v5678_v18, %v5677_v56  ;;  %v5643_v15 = vsel %vm307_vm1, %v3934_v40, 0.0  ;;  %v7076_v13 = vpop.f32.mrb[142].mxu1 }
 0x324   : > { %v5694_v30 = vsel %vm307_vm1, %v7076_v13, 0.0  ;;  %v3937_v51 = vpop.f32.mrb[143].mxu1 }
 0x325   : > { %v10238_v61 = vadd.f32 %v5695_v34, %v5694_v30  ;;  %v5660_v49 = vsel %vm307_vm1, %v3937_v51, 0.0  ;;  %v7113_v11 = vpop.f32.mrb[176].mxu0 }
 0x326   : > { %v4162_v24 = vpop.f32.mrb[177].mxu0  ;;  %v5746_v10 = vsel %vm307_vm1, %v7113_v11, 0.0 }
 0x327   : > { %v7114_v2 = vpop.f32.mrb[178].mxu0 }
 0x328   : > { %7286 = vmatmul.mubr.msk.bf16.gmra.mrb[244].mxu1 %vm307_vm1, %v9758_v26  ;;  %v10234_v26 = vadd.f32 %v5644_v43, %v5643_v15  ;;  %v4165_v8 = vpop.f32.mrb[179].mxu0  ;;  %v5763_v56 = vsel %vm307_vm1, %v7114_v2, 0.0 }
 0x329   : > { %7289 = vmatprep.mubr.msk.bf16.mxu1 %vm307_vm1, %v9760_v54  ;;  %v5661_v54 = vsel %vm307_vm1, %v4149_v25, 0.0  ;;  %v5729_v13 = vsel %vm307_vm1, %v4165_v8, 0.0 }
 0x32a   : > { %7324 = vmatmul.mubr.msk.bf16.gmra.mrb[24].mxu0 %vm307_vm1, %v9837_v14  ;;  %v10243_v33 = vadd.f32 %v5661_v54, %v5660_v49  ;;  %v3790_v14 = vpack.c.bf16 %v10048_v58, %v10044_v7 }
 0x32b   : > { %7327 = vmatprep.mubr.msk.bf16.mxu0 %vm307_vm1, %v9962_v32  ;;  %v3725_v32 = vsel %vm644_vm3, %v3723_v42, %v3724_v9  ;;  %v7079_v28 = vpop.f32.mrb[144].mxu1 }
 0x32c   : > { %v5745_v25 = vsel %vm307_vm1, %v7079_v28, 0.0  ;;  %v3950_v3 = vpop.f32.mrb[145].mxu1  ;;  %v3789_v18 = vpack.c.bf16 %v3727_v1, %v3725_v32 }
 0x32d   : > { %v10261_v7 = vadd.f32 %v5746_v10, %v5745_v25  ;;  %v7080_v58 = vpop.f32.mrb[146].mxu1 }
 0x32e   : > { %v5762_v43 = vsel %vm307_vm1, %v7080_v58, 0.0  ;;  %v3953_v15 = vpop.f32.mrb[147].mxu1  ;;  %v7117_v30 = vpop.f32.mrb[180].mxu0 }
 0x32f   : > { %v10269_v48 = vadd.f32 %v5763_v56, %v5762_v43  ;;  %v5728_v34 = vsel %vm307_vm1, %v3953_v15, 0.0  ;;  %v4178_v54 = vpop.f32.mrb[181].mxu0  ;;  %v5814_v44 = vsel %vm307_vm1, %v7117_v30, 0.0 }
 0x330   : > { %7290 = vmatmul.mubr.msk.bf16.gmra.mrb[248].mxu1 %vm307_vm1, %v9873_v63  ;;  %v5712_v63 = vsel %vm307_vm1, %v4162_v24, 0.0  ;;  %v10272_v51 = vadd.f32 %v5729_v13, %v5728_v34  ;;  %v7118_v49 = vpop.f32.mrb[182].mxu0  ;;  %v5780_v2 = vsel %vm307_vm1, %v4178_v54, 0.0 }
 0x331   : > { %7293 = vmatprep.mubr.msk.bf16.mxu1 %vm307_vm1, %v10036_v22  ;;  %v5711_v22 = vsel %vm307_vm1, %v3950_v3, 0.0  ;;  %v4181_v42 = vpop.f32.mrb[183].mxu0  ;;  %v5831_v1 = vsel %vm307_vm1, %v7118_v49, 0.0 }
 0x332   : > { %7328 = vmatmul.mubr.msk.bf16.gmra.mrb[28].mxu0 %vm307_vm1, %v3790_v14  ;;  %v10265_v40 = vadd.f32 %v5712_v63, %v5711_v22  ;;  %v5797_v25 = vsel %vm307_vm1, %v4181_v42, 0.0 }
 0x333   : > { %v7083_v9 = vpop.f32.mrb[148].mxu1 }
 0x334   : > { %v5813_v11 = vsel %vm307_vm1, %v7083_v9, 0.0  ;;  %v3966_v24 = vpop.f32.mrb[149].mxu1 }
 0x335   : > { %v10280_v14 = vadd.f32 %v5814_v44, %v5813_v11  ;;  %v5779_v8 = vsel %vm307_vm1, %v3966_v24, 0.0  ;;  %v7084_v32 = vpop.f32.mrb[150].mxu1 }
 0x336   : > { %v10284_v28 = vadd.f32 %v5780_v2, %v5779_v8  ;;  %v3969_v10 = vpop.f32.mrb[151].mxu1  ;;  %v7121_v63 = vpop.f32.mrb[184].mxu0 }
 0x337   : > { %v4194_v58 = vpop.f32.mrb[185].mxu0  ;;  %v5882_v13 = vsel %vm307_vm1, %v7121_v63, 0.0 }
 0x338   : > { %7294 = vmatmul.mubr.msk.bf16.gmra.mrb[252].mxu1 %vm307_vm1, %v3789_v18  ;;  %v5796_v18 = vsel %vm307_vm1, %v3969_v10, 0.0  ;;  %v7122_v56 = vpop.f32.mrb[186].mxu0  ;;  %v5848_v54 = vsel %vm307_vm1, %v4194_v58, 0.0 }
 0x339   : > { %7333 = vmatprep.mubr.msk.bf16.mxu1 %vm307_vm1, %v9793_v62  ;;  %v5830_v62 = vsel %vm307_vm1, %v7084_v32, 0.0  ;;  %v10291_v22 = vadd.f32 %v5797_v25, %v5796_v18  ;;  %v4197_v43 = vpop.f32.mrb[187].mxu0 }
 0x33a   : > { %v10288_v3 = vadd.f32 %v5831_v1, %v5830_v62  ;;  %v5865_v24 = vsel %vm307_vm1, %v4197_v43, 0.0 }
 0x33b   : > { %v7087_v15 = vpop.f32.mrb[152].mxu1 }
 0x33c   : > { %v5881_v34 = vsel %vm307_vm1, %v7087_v15, 0.0  ;;  %v3982_v30 = vpop.f32.mrb[153].mxu1 }
 0x33d   : > { %v10300_v49 = vadd.f32 %v5882_v13, %v5881_v34  ;;  %v5847_v42 = vsel %vm307_vm1, %v3982_v30, 0.0  ;;  %v7088_v9 = vpop.f32.mrb[154].mxu1 }
 0x33e   : > { %v10304_v44 = vadd.f32 %v5848_v54, %v5847_v42  ;;  %v3985_v11 = vpop.f32.mrb[155].mxu1 }
 0x33f   : > { %v5864_v8 = vsel %vm307_vm1, %v3985_v11, 0.0 }
 0x340   : > { %7334 = vmatmul.mubr.msk.bf16.vlgmr.msra.gmra.mrb[0].mxu1 %vm307_vm1, %v9800_v31  ;;  %v5899_v31 = vsel %vm307_vm1, %v7122_v56, 0.0  ;;  %v10311_v1 = vadd.f32 %v5865_v24, %v5864_v8 }
 0x341   : > { %7337 = vmatprep.mubr.msk.bf16.mxu1 %vm307_vm1, %v9817_v59  ;;  %v5898_v59 = vsel %vm307_vm1, %v7088_v9, 0.0 }
 0x342   : > { %v10308_v2 = vadd.f32 %v5899_v31, %v5898_v59  ;;  %v7125_v32 = vpop.f32.mrb[188].mxu0 }
 0x343   : > { %v4210_v62 = vpop.f32.mrb[189].mxu0  ;;  %v5950_v63 = vsel %vm307_vm1, %v7125_v32, 0.0 }
 0x344   : > { %v7126_v10 = vpop.f32.mrb[190].mxu0  ;;  %v5916_v43 = vsel %vm307_vm1, %v4210_v62, 0.0 }
 0x345   : > { %v4213_v25 = vpop.f32.mrb[191].mxu0 }
 0x346   : > { %v5933_v42 = vsel %vm307_vm1, %v4213_v25, 0.0 }
 0x347   : > { %v7091_v18 = vpop.f32.mrb[156].mxu1 }
 0x348   : > { %7338 = vmatmul.mubr.msk.bf16.gmra.mrb[4].mxu1 %vm307_vm1, %v9839_v39  ;;  %v5949_v58 = vsel %vm307_vm1, %v7091_v18, 0.0  ;;  %v3998_v56 = vpop.f32.mrb[157].mxu1  ;;  %v5967_v39 = vsel %vm307_vm1, %v7126_v10, 0.0 }
 0x349   : > { %7341 = vmatprep.mubr.msk.bf16.mxu1 %vm307_vm1, %v9843_v45  ;;  %v10320_v15 = vadd.f32 %v5950_v63, %v5949_v58  ;;  %v5915_v13 = vsel %vm307_vm1, %v3998_v56, 0.0  ;;  %v7092_v34 = vpop.f32.mrb[158].mxu1 }
 0x34a   : > { %v10324_v30 = vadd.f32 %v5916_v43, %v5915_v13  ;;  %v5966_v45 = vsel %vm307_vm1, %v7092_v34, 0.0  ;;  %v4001_v54 = vpop.f32.mrb[159].mxu1  ;;  %v7165_v59 = vpop.f32.mrb[192].mxu0 }
 0x34b   : > { %v10328_v9 = vadd.f32 %v5967_v39, %v5966_v45  ;;  %v5932_v31 = vsel %vm307_vm1, %v4001_v54, 0.0  ;;  %v4477_v24 = vpop.f32.mrb[193].mxu0  ;;  %v5478_v56 = vsel %vm307_vm1, %v7165_v59, 0.0 }
 0x34c   : > { %v10331_v11 = vadd.f32 %v5933_v42, %v5932_v31  ;;  %v7166_v8 = vpop.f32.mrb[194].mxu0 }
 0x34d   : > { %v4480_v32 = vpop.f32.mrb[195].mxu0 }
 0x34e   : > { %v5461_v59 = vsel %vm307_vm1, %v4480_v32, 0.0 }
 0x350   : > { %7342 = vmatmul.mubr.msk.bf16.gmra.mrb[8].mxu1 %vm307_vm1, %v9861_v29 }
 0x351   : > { %7345 = vmatprep.mubr.msk.bf16.mxu1 %vm307_vm1, %v9875_v57  ;;  %v5444_v57 = vsel %vm307_vm1, %v4477_v24, 0.0 }
 0x353   : > { %v7131_v62 = vpop.f32.mrb[160].mxu1 }
 0x354   : > { %v5476_v10 = vsel %vm307_vm1, %v7131_v62, 0.0  ;;  %v4310_v25 = vpop.f32.mrb[161].mxu1 }
 0x355   : > { %v5477_v18 = vadd.f32 %v5476_v10, %v10154_v55  ;;  %v5442_v63 = vsel %vm307_vm1, %v4310_v25, 0.0  ;;  %v7132_v58 = vpop.f32.mrb[162].mxu1  ;;  %v7169_v45 = vpop.f32.mrb[196].mxu0  ;;  %v5495_v55 = vsel %vm307_vm1, %v7166_v8, 0.0 }
 0x356   : > { %v5443_v43 = vadd.f32 %v5442_v63, %v10158_v52  ;;  %v5493_v29 = vsel %vm307_vm1, %v7132_v58, 0.0  ;;  %v4313_v13 = vpop.f32.mrb[163].mxu1  ;;  %v4493_v52 = vpop.f32.mrb[197].mxu0  ;;  %v5546_v32 = vsel %vm307_vm1, %v7169_v45, 0.0 }
 0x357   : > { %v5494_v34 = vadd.f32 %v5493_v29, %v10162_v41  ;;  %v5459_v39 = vsel %vm307_vm1, %v4313_v13, 0.0  ;;  %v10346_v54 = vadd.f32 %v5478_v56, %v5477_v18  ;;  %v7170_v41 = vpop.f32.mrb[198].mxu0 }
 0x358   : > { %v5460_v42 = vadd.f32 %v5459_v39, %v10167_v50  ;;  %7346 = vmatmul.mubr.msk.bf16.gmra.mrb[12].mxu1 %vm307_vm1, %v9889_v17  ;;  %v10352_v31 = vadd.f32 %v5444_v57, %v5443_v43  ;;  %v4496_v62 = vpop.f32.mrb[199].mxu0  ;;  %v5512_v43 = vsel %vm307_vm1, %v4493_v52, 0.0 }
 0x359   : > { %7349 = vmatprep.mubr.msk.bf16.mxu1 %vm307_vm1, %v9908_v36  ;;  %v10357_v24 = vadd.f32 %v5495_v55, %v5494_v34  ;;  %v5529_v55 = vsel %vm307_vm1, %v4496_v62, 0.0 }
 0x35a   : > { %v10359_v10 = vadd.f32 %v5461_v59, %v5460_v42 }
 0x35b   : > { %v7135_v8 = vpop.f32.mrb[164].mxu1 }
 0x35c   : > { %v5544_v50 = vsel %vm307_vm1, %v7135_v8, 0.0  ;;  %v4326_v25 = vpop.f32.mrb[165].mxu1 }
 0x35d   : > { %v5545_v17 = vadd.f32 %v5544_v50, %v10178_v5  ;;  %v5510_v18 = vsel %vm307_vm1, %v4326_v25, 0.0  ;;  %v7136_v63 = vpop.f32.mrb[166].mxu1  ;;  %v7173_v57 = vpop.f32.mrb[200].mxu0  ;;  %v5563_v5 = vsel %vm307_vm1, %v7170_v41, 0.0 }
 0x35e   : > { %v5511_v58 = vadd.f32 %v5510_v18, %v10182_v23  ;;  %v5561_v36 = vsel %vm307_vm1, %v7136_v63, 0.0  ;;  %v4329_v56 = vpop.f32.mrb[167].mxu1  ;;  %v4509_v23 = vpop.f32.mrb[201].mxu0  ;;  %v5614_v62 = vsel %vm307_vm1, %v7173_v57, 0.0 }
 0x35f   : > { %v5562_v29 = vadd.f32 %v5561_v36, %v10188_v21  ;;  %v5527_v13 = vsel %vm307_vm1, %v4329_v56, 0.0  ;;  %v10370_v34 = vadd.f32 %v5546_v32, %v5545_v17  ;;  %v7174_v21 = vpop.f32.mrb[202].mxu0  ;;  %v5580_v63 = vsel %vm307_vm1, %v4509_v23, 0.0 }
 0x360   : > { %v5528_v39 = vadd.f32 %v5527_v13, %v10193_v19  ;;  %7350 = vmatmul.mubr.msk.bf16.gmra.mrb[16].mxu1 %vm307_vm1, %v9910_v12  ;;  %v10376_v45 = vadd.f32 %v5512_v43, %v5511_v58  ;;  %v4512_v52 = vpop.f32.mrb[203].mxu0 }
 0x361   : > { %7353 = vmatprep.mubr.msk.bf16.mxu1 %vm307_vm1, %v9922_v20  ;;  %v10381_v42 = vadd.f32 %v5563_v5, %v5562_v29  ;;  %v5597_v13 = vsel %vm307_vm1, %v4512_v52, 0.0 }
 0x362   : > { %v10383_v59 = vadd.f32 %v5529_v55, %v5528_v39 }
 0x363   : > { %v7139_v41 = vpop.f32.mrb[168].mxu1 }
 0x364   : > { %v5612_v19 = vsel %vm307_vm1, %v7139_v41, 0.0  ;;  %v4342_v8 = vpop.f32.mrb[169].mxu1 }
 0x365   : > { %v5613_v12 = vadd.f32 %v5612_v19, %v10206_v16  ;;  %v5578_v50 = vsel %vm307_vm1, %v4342_v8, 0.0  ;;  %v7140_v25 = vpop.f32.mrb[170].mxu1  ;;  %v7177_v36 = vpop.f32.mrb[204].mxu0  ;;  %v5631_v16 = vsel %vm307_vm1, %v7174_v21, 0.0 }
 0x366   : > { %v5579_v17 = vadd.f32 %v5578_v50, %v10210_v38  ;;  %v5629_v20 = vsel %vm307_vm1, %v7140_v25, 0.0  ;;  %v4345_v18 = vpop.f32.mrb[171].mxu1  ;;  %v4525_v38 = vpop.f32.mrb[205].mxu0  ;;  %v5682_v52 = vsel %vm307_vm1, %v7177_v36, 0.0 }
 0x367   : > { %v5630_v32 = vadd.f32 %v5629_v20, %v10214_v6  ;;  %v5595_v58 = vsel %vm307_vm1, %v4345_v18, 0.0  ;;  %v10394_v56 = vadd.f32 %v5614_v62, %v5613_v12  ;;  %v7178_v6 = vpop.f32.mrb[206].mxu0  ;;  %v5648_v12 = vsel %vm307_vm1, %v4525_v38, 0.0 }
 0x368   : > { %v5596_v43 = vadd.f32 %v5595_v58, %v10219_v60  ;;  %7354 = vmatmul.mubr.msk.bf16.gmra.mrb[20].mxu1 %vm307_vm1, %v9939_v4  ;;  %v10400_v29 = vadd.f32 %v5580_v63, %v5579_v17  ;;  %v4528_v5 = vpop.f32.mrb[207].mxu0 }
 0x369   : > { %7357 = vmatprep.mubr.msk.bf16.mxu1 %vm307_vm1, %v9948_v0  ;;  %v10405_v57 = vadd.f32 %v5631_v16, %v5630_v32  ;;  %v5665_v63 = vsel %vm307_vm1, %v4528_v5, 0.0 }
 0x36a   : > { %v10407_v39 = vadd.f32 %v5597_v13, %v5596_v43 }
 0x36b   : > { %v7143_v23 = vpop.f32.mrb[172].mxu1 }
 0x36c   : > { %v5680_v60 = vsel %vm307_vm1, %v7143_v23, 0.0  ;;  %v4358_v55 = vpop.f32.mrb[173].mxu1 }
 0x36d   : > { %v5681_v4 = vadd.f32 %v5680_v60, %v10230_v46  ;;  %v5646_v21 = vsel %vm307_vm1, %v4358_v55, 0.0  ;;  %v7144_v41 = vpop.f32.mrb[174].mxu1  ;;  %v7181_v62 = vpop.f32.mrb[208].mxu0  ;;  %v5699_v46 = vsel %vm307_vm1, %v7178_v6, 0.0 }
 0x36e   : > { %v5647_v19 = vadd.f32 %v5646_v21, %v10234_v26  ;;  %v5697_v0 = vsel %vm307_vm1, %v7144_v41, 0.0  ;;  %v4361_v8 = vpop.f32.mrb[175].mxu1  ;;  %v4541_v26 = vpop.f32.mrb[209].mxu0  ;;  %v5750_v6 = vsel %vm307_vm1, %v7181_v62, 0.0 }
 0x36f   : > { %v5698_v50 = vadd.f32 %v5697_v0, %v10238_v61  ;;  %v5663_v25 = vsel %vm307_vm1, %v4361_v8, 0.0  ;;  %v10418_v17 = vadd.f32 %v5682_v52, %v5681_v4  ;;  %v7182_v61 = vpop.f32.mrb[210].mxu0  ;;  %v5716_v60 = vsel %vm307_vm1, %v4541_v26, 0.0 }
 0x370   : > { %v5664_v20 = vadd.f32 %v5663_v25, %v10243_v33  ;;  %7358 = vmatmul.mubr.msk.bf16.gmra.mrb[24].mxu1 %vm307_vm1, %v9958_v37  ;;  %v10424_v18 = vadd.f32 %v5648_v12, %v5647_v19  ;;  %v4544_v58 = vpop.f32.mrb[211].mxu0 }
 0x371   : > { %7361 = vmatprep.mubr.msk.bf16.mxu1 %vm307_vm1, %v9973_v35  ;;  %v10429_v32 = vadd.f32 %v5699_v46, %v5698_v50  ;;  %v5733_v0 = vsel %vm307_vm1, %v4544_v58, 0.0 }
 0x372   : > { %v10431_v36 = vadd.f32 %v5665_v63, %v5664_v20 }
 0x373   : > { %v7147_v16 = vpop.f32.mrb[176].mxu1 }
 0x374   : > { %v5748_v33 = vsel %vm307_vm1, %v7147_v16, 0.0  ;;  %v4374_v43 = vpop.f32.mrb[177].mxu1 }
 0x375   : > { %v5749_v37 = vadd.f32 %v5748_v33, %v10261_v7  ;;  %v5714_v38 = vsel %vm307_vm1, %v4374_v43, 0.0  ;;  %v7148_v13 = vpop.f32.mrb[178].mxu1  ;;  %v7185_v21 = vpop.f32.mrb[212].mxu0  ;;  %v5767_v7 = vsel %vm307_vm1, %v7182_v61, 0.0 }
 0x376   : > { %v5715_v5 = vadd.f32 %v5714_v38, %v10265_v40  ;;  %v5765_v35 = vsel %vm307_vm1, %v7148_v13, 0.0  ;;  %v4377_v23 = vpop.f32.mrb[179].mxu1  ;;  %v4557_v40 = vpop.f32.mrb[213].mxu0 }
 0x377   : > { %v5766_v55 = vadd.f32 %v5765_v35, %v10269_v48  ;;  %v5731_v4 = vsel %vm307_vm1, %v4377_v23, 0.0  ;;  %v10442_v41 = vadd.f32 %v5750_v6, %v5749_v37  ;;  %v7186_v48 = vpop.f32.mrb[214].mxu0  ;;  %v5784_v61 = vsel %vm307_vm1, %v4557_v40, 0.0 }
 0x378   : > { %v5732_v52 = vadd.f32 %v5731_v4, %v10272_v51  ;;  %7362 = vmatmul.mubr.msk.bf16.gmra.mrb[28].mxu1 %vm307_vm1, %v3791_v47  ;;  %v10450_v19 = vadd.f32 %v5716_v60, %v5715_v5  ;;  %v4560_v12 = vpop.f32.mrb[215].mxu0  ;;  %v5818_v47 = vsel %vm307_vm1, %v7185_v21, 0.0 }
 0x379   : > { %v10453_v8 = vadd.f32 %v5767_v7, %v5766_v55 }
 0x37a   : > { %v10455_v50 = vadd.f32 %v5733_v0, %v5732_v52 }
 0x37b   : > { %v7151_v25 = vpop.f32.mrb[180].mxu1 }
 0x37c   : > { %v5816_v62 = vsel %vm307_vm1, %v7151_v25, 0.0  ;;  %v4390_v51 = vpop.f32.mrb[181].mxu1 }
 0x37d   : > { %v5817_v46 = vadd.f32 %v5816_v62, %v10280_v14  ;;  %v5782_v27 = vsel %vm307_vm1, %v4390_v51, 0.0  ;;  %v7152_v53 = vpop.f32.mrb[182].mxu1  ;;  %v7189_v33 = vpop.f32.mrb[216].mxu0  ;;  %v5835_v14 = vsel %vm307_vm1, %v7186_v48, 0.0 }
 0x37e   : > { %v5783_v20 = vadd.f32 %v5782_v27, %v10284_v28  ;;  %v5833_v26 = vsel %vm307_vm1, %v7152_v53, 0.0  ;;  %v4393_v63 = vpop.f32.mrb[183].mxu1  ;;  %v4573_v38 = vpop.f32.mrb[217].mxu0  ;;  %v5801_v28 = vsel %vm307_vm1, %v4560_v12, 0.0  ;;  %v5886_v7 = vsel %vm307_vm1, %v7189_v33, 0.0 }
 0x37f   : > { %v5834_v58 = vadd.f32 %v5833_v26, %v10288_v3  ;;  %v5799_v16 = vsel %vm307_vm1, %v4393_v63, 0.0  ;;  %v10466_v43 = vadd.f32 %v5818_v47, %v5817_v46  ;;  %v7190_v6 = vpop.f32.mrb[218].mxu0  ;;  %v5852_v48 = vsel %vm307_vm1, %v4573_v38, 0.0 }
 0x380   : > { %v5800_v37 = vadd.f32 %v5799_v16, %v10291_v22  ;;  %v10470_v13 = vadd.f32 %v5784_v61, %v5783_v20  ;;  %v4576_v35 = vpop.f32.mrb[219].mxu0 }
 0x381   : > { %v10473_v5 = vadd.f32 %v5835_v14, %v5834_v58 }
 0x382   : > { %v10475_v23 = vadd.f32 %v5801_v28, %v5800_v37 }
 0x383   : > { %v7155_v3 = vpop.f32.mrb[184].mxu1 }
 0x384   : > { %v5884_v60 = vsel %vm307_vm1, %v7155_v3, 0.0  ;;  %v4406_v55 = vpop.f32.mrb[185].mxu1 }
 0x385   : > { %v5885_v4 = vadd.f32 %v5884_v60, %v10300_v49  ;;  %v5850_v21 = vsel %vm307_vm1, %v4406_v55, 0.0  ;;  %v7156_v22 = vpop.f32.mrb[186].mxu1  ;;  %v7193_v62 = vpop.f32.mrb[220].mxu0  ;;  %v5903_v49 = vsel %vm307_vm1, %v7190_v6, 0.0 }
 0x386   : > { %v5851_v52 = vadd.f32 %v5850_v21, %v10304_v44  ;;  %v5901_v40 = vsel %vm307_vm1, %v7156_v22, 0.0  ;;  %v4409_v0 = vpop.f32.mrb[187].mxu1  ;;  %v4589_v27 = vpop.f32.mrb[221].mxu0  ;;  %v5869_v44 = vsel %vm307_vm1, %v4576_v35, 0.0  ;;  %v5954_v14 = vsel %vm307_vm1, %v7193_v62, 0.0 }
 0x387   : > { %v5902_v12 = vadd.f32 %v5901_v40, %v10308_v2  ;;  %v5867_v25 = vsel %vm307_vm1, %v4409_v0, 0.0  ;;  %v10486_v51 = vadd.f32 %v5886_v7, %v5885_v4  ;;  %v7194_v47 = vpop.f32.mrb[222].mxu0  ;;  %v5920_v6 = vsel %vm307_vm1, %v4589_v27, 0.0 }
 0x388   : > { %v5868_v46 = vadd.f32 %v5867_v25, %v10311_v1  ;;  %v10490_v53 = vadd.f32 %v5852_v48, %v5851_v52  ;;  %v4592_v26 = vpop.f32.mrb[223].mxu0 }
 0x389   : > { %v10493_v20 = vadd.f32 %v5903_v49, %v5902_v12 }
 0x38a   : > { %v10495_v63 = vadd.f32 %v5869_v44, %v5868_v46 }
 0x38b   : > { %v7159_v2 = vpop.f32.mrb[188].mxu1 }
 0x38c   : > { %v5952_v61 = vsel %vm307_vm1, %v7159_v2, 0.0  ;;  %v4422_v58 = vpop.f32.mrb[189].mxu1 }
 0x38d   : > { %v5953_v16 = vadd.f32 %v5952_v61, %v10320_v15  ;;  %v5918_v33 = vsel %vm307_vm1, %v4422_v58, 0.0  ;;  %v7160_v1 = vpop.f32.mrb[190].mxu1  ;;  %v7233_v60 = vpop.f32.mrb[224].mxu0  ;;  %v5971_v15 = vsel %vm307_vm1, %v7194_v47, 0.0 }
 0x38e   : > { %v5919_v37 = vadd.f32 %v5918_v33, %v10324_v30  ;;  %v5969_v38 = vsel %vm307_vm1, %v7160_v1, 0.0  ;;  %v4425_v28 = vpop.f32.mrb[191].mxu1  ;;  %v4811_v21 = vpop.f32.mrb[225].mxu0  ;;  %v5937_v30 = vsel %vm307_vm1, %v4592_v26, 0.0  ;;  %v5482_v49 = vsel %vm307_vm1, %v7233_v60, 0.0 }
 0x38f   : > { %v5970_v35 = vadd.f32 %v5969_v38, %v10328_v9  ;;  %v5935_v3 = vsel %vm307_vm1, %v4425_v28, 0.0  ;;  %v10506_v55 = vadd.f32 %v5954_v14, %v5953_v16  ;;  %v7234_v7 = vpop.f32.mrb[226].mxu0  ;;  %v5448_v47 = vsel %vm307_vm1, %v4811_v21, 0.0 }
 0x390   : > { %v5936_v4 = vadd.f32 %v5935_v3, %v10331_v11  ;;  %v10510_v22 = vadd.f32 %v5920_v6, %v5919_v37  ;;  %v4814_v40 = vpop.f32.mrb[227].mxu0 }
 0x391   : > { %v10513_v52 = vadd.f32 %v5971_v15, %v5970_v35 }
 0x392   : > { %v10515_v0 = vadd.f32 %v5937_v30, %v5936_v4 }
 0x393   : > { %v7199_v9 = vpop.f32.mrb[192].mxu1 }
 0x394   : > { %v5480_v48 = vsel %vm307_vm1, %v7199_v9, 0.0  ;;  %v4644_v12 = vpop.f32.mrb[193].mxu1 }
 0x395   : > { %v5481_v25 = vadd.f32 %v5480_v48, %v10346_v54  ;;  %v5446_v62 = vsel %vm307_vm1, %v4644_v12, 0.0  ;;  %v7200_v11 = vpop.f32.mrb[194].mxu1  ;;  %v7237_v61 = vpop.f32.mrb[228].mxu0  ;;  %v5499_v54 = vsel %vm307_vm1, %v7234_v7, 0.0 }
 0x396   : > { %v5447_v46 = vadd.f32 %v5446_v62, %v10352_v31  ;;  %v5497_v27 = vsel %vm307_vm1, %v7200_v11, 0.0  ;;  %v4647_v44 = vpop.f32.mrb[195].mxu1  ;;  %v4827_v33 = vpop.f32.mrb[229].mxu0  ;;  %v5465_v31 = vsel %vm307_vm1, %v4814_v40, 0.0  ;;  %v5550_v15 = vsel %vm307_vm1, %v7237_v61, 0.0 }
 0x397   : > { %v5498_v26 = vadd.f32 %v5497_v27, %v10357_v24  ;;  %v5463_v2 = vsel %vm307_vm1, %v4647_v44, 0.0  ;;  %v10526_v58 = vadd.f32 %v5482_v49, %v5481_v25  ;;  %v7238_v14 = vpop.f32.mrb[230].mxu0  ;;  %v5516_v7 = vsel %vm307_vm1, %v4827_v33, 0.0 }
 0x398   : > { %v5464_v16 = vadd.f32 %v5463_v2, %v10359_v10  ;;  %v10530_v1 = vadd.f32 %v5448_v47, %v5447_v46  ;;  %v4830_v38 = vpop.f32.mrb[231].mxu0 }
 0x399   : > { %v10533_v37 = vadd.f32 %v5499_v54, %v5498_v26 }
 0x39a   : > { %v10535_v28 = vadd.f32 %v5465_v31, %v5464_v16 }
 0x39b   : > { %v7203_v24 = vpop.f32.mrb[196].mxu1 }
 0x39c   : > { %v5548_v6 = vsel %vm307_vm1, %v7203_v24, 0.0  ;;  %v4660_v35 = vpop.f32.mrb[197].mxu1 }
 0x39d   : > { %v5549_v3 = vadd.f32 %v5548_v6, %v10370_v34  ;;  %v5514_v60 = vsel %vm307_vm1, %v4660_v35, 0.0  ;;  %v7204_v10 = vpop.f32.mrb[198].mxu1  ;;  %v7241_v48 = vpop.f32.mrb[232].mxu0  ;;  %v5567_v34 = vsel %vm307_vm1, %v7238_v14, 0.0 }
 0x39e   : > { %v5515_v4 = vadd.f32 %v5514_v60, %v10376_v45  ;;  %v5565_v21 = vsel %vm307_vm1, %v7204_v10, 0.0  ;;  %v4663_v30 = vpop.f32.mrb[199].mxu1  ;;  %v4843_v62 = vpop.f32.mrb[233].mxu0  ;;  %v5533_v45 = vsel %vm307_vm1, %v4830_v38, 0.0  ;;  %v5618_v54 = vsel %vm307_vm1, %v7241_v48, 0.0 }
 0x39f   : > { %v5566_v40 = vadd.f32 %v5565_v21, %v10381_v42  ;;  %v5531_v9 = vsel %vm307_vm1, %v4663_v30, 0.0  ;;  %v10546_v12 = vadd.f32 %v5550_v15, %v5549_v3  ;;  %v7242_v49 = vpop.f32.mrb[234].mxu0  ;;  %v5584_v14 = vsel %vm307_vm1, %v4843_v62, 0.0 }
 0x3a0   : > { %v5532_v25 = vadd.f32 %v5531_v9, %v10383_v59  ;;  %v10550_v11 = vadd.f32 %v5516_v7, %v5515_v4  ;;  %v4846_v27 = vpop.f32.mrb[235].mxu0 }
 0x3a1   : > { %v10553_v46 = vadd.f32 %v5567_v34, %v5566_v40 }
 0x3a2   : > { %v10555_v44 = vadd.f32 %v5533_v45, %v5532_v25 }
 0x3a3   : > { %v7207_v42 = vpop.f32.mrb[200].mxu1 }
 0x3a4   : > { %v5616_v47 = vsel %vm307_vm1, %v7207_v42, 0.0  ;;  %v4676_v26 = vpop.f32.mrb[201].mxu1 }
 0x3a5   : > { %v5617_v2 = vadd.f32 %v5616_v47, %v10394_v56  ;;  %v5582_v61 = vsel %vm307_vm1, %v4676_v26, 0.0  ;;  %v7208_v59 = vpop.f32.mrb[202].mxu1  ;;  %v7245_v6 = vpop.f32.mrb[236].mxu0  ;;  %v5635_v56 = vsel %vm307_vm1, %v7242_v49, 0.0 }
 0x3a6   : > { %v5583_v16 = vadd.f32 %v5582_v61, %v10400_v29  ;;  %v5633_v33 = vsel %vm307_vm1, %v7208_v59, 0.0  ;;  %v4679_v31 = vpop.f32.mrb[203].mxu1  ;;  %v4859_v60 = vpop.f32.mrb[237].mxu0  ;;  %v5601_v29 = vsel %vm307_vm1, %v4846_v27, 0.0  ;;  %v5686_v34 = vsel %vm307_vm1, %v7245_v6, 0.0 }
 0x3a7   : > { %v5634_v38 = vadd.f32 %v5633_v33, %v10405_v57  ;;  %v5599_v24 = vsel %vm307_vm1, %v4679_v31, 0.0  ;;  %v10566_v35 = vadd.f32 %v5618_v54, %v5617_v2  ;;  %v7246_v15 = vpop.f32.mrb[238].mxu0  ;;  %v5652_v49 = vsel %vm307_vm1, %v4859_v60, 0.0 }
 0x3a8   : > { %v5600_v3 = vadd.f32 %v5599_v24, %v10407_v39  ;;  %v10570_v10 = vadd.f32 %v5584_v14, %v5583_v16  ;;  %v4862_v21 = vpop.f32.mrb[239].mxu0 }
 0x3a9   : > { %v10573_v4 = vadd.f32 %v5635_v56, %v5634_v38 }
 0x3aa   : > { %v10575_v30 = vadd.f32 %v5601_v29, %v5600_v3 }
 0x3ab   : > { %v7211_v57 = vpop.f32.mrb[204].mxu1 }
 0x3ac   : > { %v5684_v7 = vsel %vm307_vm1, %v7211_v57, 0.0  ;;  %v4692_v40 = vpop.f32.mrb[205].mxu1 }
 0x3ad   : > { %v5685_v9 = vadd.f32 %v5684_v7, %v10418_v17  ;;  %v5650_v48 = vsel %vm307_vm1, %v4692_v40, 0.0  ;;  %v7212_v39 = vpop.f32.mrb[206].mxu1  ;;  %v7249_v47 = vpop.f32.mrb[240].mxu0  ;;  %v5703_v17 = vsel %vm307_vm1, %v7246_v15, 0.0 }
 0x3ae   : > { %v5651_v25 = vadd.f32 %v5650_v48, %v10424_v18  ;;  %v5701_v62 = vsel %vm307_vm1, %v7212_v39, 0.0  ;;  %v4695_v45 = vpop.f32.mrb[207].mxu1  ;;  %v4875_v61 = vpop.f32.mrb[241].mxu0  ;;  %v5669_v18 = vsel %vm307_vm1, %v4862_v21, 0.0  ;;  %v5754_v56 = vsel %vm307_vm1, %v7249_v47, 0.0 }
 0x3af   : > { %v5702_v27 = vadd.f32 %v5701_v62, %v10429_v32  ;;  %v5667_v42 = vsel %vm307_vm1, %v4695_v45, 0.0  ;;  %v10586_v26 = vadd.f32 %v5686_v34, %v5685_v9  ;;  %v7250_v54 = vpop.f32.mrb[242].mxu0  ;;  %v5720_v15 = vsel %vm307_vm1, %v4875_v61, 0.0 }
 0x3b0   : > { %v5668_v2 = vadd.f32 %v5667_v42, %v10431_v36  ;;  %v10590_v59 = vadd.f32 %v5652_v49, %v5651_v25  ;;  %v4878_v33 = vpop.f32.mrb[243].mxu0 }
 0x3b1   : > { %v10593_v16 = vadd.f32 %v5703_v17, %v5702_v27 }
 0x3b2   : > { %v10595_v31 = vadd.f32 %v5669_v18, %v5668_v2 }
 0x3b3   : > { %v7215_v32 = vpop.f32.mrb[208].mxu1 }
 0x3b4   : > { %v5752_v14 = vsel %vm307_vm1, %v7215_v32, 0.0  ;;  %v4708_v38 = vpop.f32.mrb[209].mxu1 }
 0x3b5   : > { %v5753_v24 = vadd.f32 %v5752_v14, %v10442_v41  ;;  %v5718_v6 = vsel %vm307_vm1, %v4708_v38, 0.0  ;;  %v7216_v36 = vpop.f32.mrb[210].mxu1  ;;  %v7253_v7 = vpop.f32.mrb[244].mxu0  ;;  %v5771_v41 = vsel %vm307_vm1, %v7250_v54, 0.0 }
 0x3b6   : > { %v5719_v3 = vadd.f32 %v5718_v6, %v10450_v19  ;;  %v5769_v60 = vsel %vm307_vm1, %v7216_v36, 0.0  ;;  %v4711_v29 = vpop.f32.mrb[211].mxu1  ;;  %v4891_v48 = vpop.f32.mrb[245].mxu0  ;;  %v5737_v19 = vsel %vm307_vm1, %v4878_v33, 0.0  ;;  %v5822_v17 = vsel %vm307_vm1, %v7253_v7, 0.0 }
 0x3b7   : > { %v5770_v21 = vadd.f32 %v5769_v60, %v10453_v8  ;;  %v5735_v57 = vsel %vm307_vm1, %v4711_v29, 0.0  ;;  %v10606_v40 = vadd.f32 %v5754_v56, %v5753_v24  ;;  %v7254_v34 = vpop.f32.mrb[246].mxu0  ;;  %v5788_v54 = vsel %vm307_vm1, %v4891_v48, 0.0 }
 0x3b8   : > { %v5736_v9 = vadd.f32 %v5735_v57, %v10455_v50  ;;  %v10610_v39 = vadd.f32 %v5720_v15, %v5719_v3  ;;  %v4894_v62 = vpop.f32.mrb[247].mxu0 }
 0x3b9   : > { %v10613_v25 = vadd.f32 %v5771_v41, %v5770_v21 }
 0x3ba   : > { %v10615_v45 = vadd.f32 %v5737_v19, %v5736_v9 }
 0x3bb   : > { %v7219_v8 = vpop.f32.mrb[212].mxu1 }
 0x3bc   : > { %v5820_v49 = vsel %vm307_vm1, %v7219_v8, 0.0  ;;  %v4724_v27 = vpop.f32.mrb[213].mxu1 }
 0x3bd   : > { %v5821_v42 = vadd.f32 %v5820_v49, %v10466_v43  ;;  %v5786_v47 = vsel %vm307_vm1, %v4724_v27, 0.0  ;;  %v7220_v50 = vpop.f32.mrb[214].mxu1  ;;  %v7257_v14 = vpop.f32.mrb[248].mxu0  ;;  %v5839_v43 = vsel %vm307_vm1, %v7254_v34, 0.0 }
 0x3be   : > { %v5787_v2 = vadd.f32 %v5786_v47, %v10470_v13  ;;  %v5837_v61 = vsel %vm307_vm1, %v7220_v50, 0.0  ;;  %v4727_v18 = vpop.f32.mrb[215].mxu1  ;;  %v4907_v6 = vpop.f32.mrb[249].mxu0  ;;  %v5805_v13 = vsel %vm307_vm1, %v4894_v62, 0.0  ;;  %v5890_v41 = vsel %vm307_vm1, %v7257_v14, 0.0 }
 0x3bf   : > { %v5838_v33 = vadd.f32 %v5837_v61, %v10473_v5  ;;  %v5803_v32 = vsel %vm307_vm1, %v4727_v18, 0.0  ;;  %v10626_v38 = vadd.f32 %v5822_v17, %v5821_v42  ;;  %v7258_v56 = vpop.f32.mrb[250].mxu0  ;;  %v5856_v34 = vsel %vm307_vm1, %v4907_v6, 0.0 }
 0x3c0   : > { %v5804_v24 = vadd.f32 %v5803_v32, %v10475_v23  ;;  %v10630_v36 = vadd.f32 %v5788_v54, %v5787_v2  ;;  %v4910_v60 = vpop.f32.mrb[251].mxu0 }
 0x3c1   : > { %v10633_v3 = vadd.f32 %v5839_v43, %v5838_v33 }
 0x3c2   : > { %v10635_v29 = vadd.f32 %v5805_v13, %v5804_v24 }
 0x3c3   : > { %v7223_v5 = vpop.f32.mrb[216].mxu1 }
 0x3c4   : > { %v5888_v15 = vsel %vm307_vm1, %v7223_v5, 0.0  ;;  %v4740_v21 = vpop.f32.mrb[217].mxu1 }
 0x3c5   : > { %v5889_v57 = vadd.f32 %v5888_v15, %v10486_v51  ;;  %v5854_v7 = vsel %vm307_vm1, %v4740_v21, 0.0  ;;  %v7224_v23 = vpop.f32.mrb[218].mxu1  ;;  %v7261_v49 = vpop.f32.mrb[252].mxu0  ;;  %v5907_v51 = vsel %vm307_vm1, %v7258_v56, 0.0 }
 0x3c6   : > { %v5855_v9 = vadd.f32 %v5854_v7, %v10490_v53  ;;  %v5905_v48 = vsel %vm307_vm1, %v7224_v23, 0.0  ;;  %v4743_v19 = vpop.f32.mrb[219].mxu1  ;;  %v4923_v47 = vpop.f32.mrb[253].mxu0  ;;  %v5873_v53 = vsel %vm307_vm1, %v4910_v60, 0.0  ;;  %v5958_v43 = vsel %vm307_vm1, %v7261_v49, 0.0 }
 0x3c7   : > { %v5906_v62 = vadd.f32 %v5905_v48, %v10493_v20  ;;  %v5871_v8 = vsel %vm307_vm1, %v4743_v19, 0.0  ;;  %v10646_v27 = vadd.f32 %v5890_v41, %v5889_v57  ;;  %v7262_v17 = vpop.f32.mrb[254].mxu0  ;;  %v5924_v56 = vsel %vm307_vm1, %v4923_v47, 0.0 }
 0x3c8   : > { %v5872_v42 = vadd.f32 %v5871_v8, %v10495_v63  ;;  %v10650_v50 = vadd.f32 %v5856_v34, %v5855_v9  ;;  %v4926_v61 = vpop.f32.mrb[255].mxu0 }
 0x3c9   : > { %v10653_v2 = vadd.f32 %v5907_v51, %v5906_v62 }
 0x3ca   : > { %v10655_v18 = vadd.f32 %v5873_v53, %v5872_v42 }
 0x3cb   : > { %v7227_v20 = vpop.f32.mrb[220].mxu1 }
 0x3cc   : > { %v5956_v54 = vsel %vm307_vm1, %v7227_v20, 0.0  ;;  %v4756_v33 = vpop.f32.mrb[221].mxu1 }
 0x3cd   : > { %v5957_v32 = vadd.f32 %v5956_v54, %v10506_v55  ;;  %v5922_v14 = vsel %vm307_vm1, %v4756_v33, 0.0  ;;  %v7228_v63 = vpop.f32.mrb[222].mxu1  ;;  %v7301_v15 = vpop.f32.mrb[0].mxu0  ;;  %v5975_v55 = vsel %vm307_vm1, %v7262_v17, 0.0 }
 0x3ce   : > { %v5923_v24 = vadd.f32 %v5922_v14, %v10510_v22  ;;  %v5973_v6 = vsel %vm307_vm1, %v7228_v63, 0.0  ;;  %v4759_v13 = vpop.f32.mrb[223].mxu1  ;;  %v5145_v7 = vpop.f32.mrb[1].mxu0  ;;  %v5941_v22 = vsel %vm307_vm1, %v4926_v61, 0.0  ;;  %v5486_v51 = vsel %vm307_vm1, %v7301_v15, 0.0 }
 0x3cf   : > { %v5974_v60 = vadd.f32 %v5973_v6, %v10513_v52  ;;  %v5939_v5 = vsel %vm307_vm1, %v4759_v13, 0.0  ;;  %v10666_v21 = vadd.f32 %v5958_v43, %v5957_v32  ;;  %v7302_v41 = vpop.f32.mrb[2].mxu0  ;;  %v5452_v17 = vsel %vm307_vm1, %v5145_v7, 0.0 }
 0x3d0   : > { %v5940_v57 = vadd.f32 %v5939_v5, %v10515_v0  ;;  %v10670_v23 = vadd.f32 %v5924_v56, %v5923_v24  ;;  %v5148_v48 = vpop.f32.mrb[3].mxu0 }
 0x3d1   : > { %v10673_v9 = vadd.f32 %v5975_v55, %v5974_v60 }
 0x3d2   : > { %v10675_v19 = vadd.f32 %v5941_v22, %v5940_v57 }
 0x3d3   : > { %v7267_v52 = vpop.f32.mrb[224].mxu1 }
 0x3d4   : > { %v5484_v34 = vsel %vm307_vm1, %v7267_v52, 0.0  ;;  %v4978_v62 = vpop.f32.mrb[225].mxu1 }
 0x3d5   : > { %v5485_v8 = vadd.f32 %v5484_v34, %v10526_v58  ;;  %v5450_v49 = vsel %vm307_vm1, %v4978_v62, 0.0  ;;  %v7268_v0 = vpop.f32.mrb[226].mxu1  ;;  %v7305_v54 = vpop.f32.mrb[4].mxu0  ;;  %v5503_v58 = vsel %vm307_vm1, %v7302_v41, 0.0 }
 0x3d6   : > { %v5451_v42 = vadd.f32 %v5450_v49, %v10530_v1  ;;  %v5501_v47 = vsel %vm307_vm1, %v7268_v0, 0.0  ;;  %v4981_v53 = vpop.f32.mrb[227].mxu1  ;;  %v5161_v14 = vpop.f32.mrb[5].mxu0  ;;  %v5469_v1 = vsel %vm307_vm1, %v5148_v48, 0.0  ;;  %v5554_v55 = vsel %vm307_vm1, %v7305_v54, 0.0 }
 0x3d7   : > { %v5502_v61 = vadd.f32 %v5501_v47, %v10533_v37  ;;  %v5467_v20 = vsel %vm307_vm1, %v4981_v53, 0.0  ;;  %v10686_v33 = vadd.f32 %v5486_v51, %v5485_v8  ;;  %v7306_v43 = vpop.f32.mrb[6].mxu0  ;;  %v5520_v41 = vsel %vm307_vm1, %v5161_v14, 0.0 }
 0x3d8   : > { %v5468_v32 = vadd.f32 %v5467_v20, %v10535_v28  ;;  %v10690_v63 = vadd.f32 %v5452_v17, %v5451_v42  ;;  %v5164_v6 = vpop.f32.mrb[7].mxu0 }
 0x3d9   : > { %v10693_v24 = vadd.f32 %v5503_v58, %v5502_v61 }
 0x3da   : > { %v10695_v13 = vadd.f32 %v5469_v1, %v5468_v32 }
 0x3db   : > { %v7271_v37 = vpop.f32.mrb[228].mxu1 }
 0x3dc   : > { %v5552_v56 = vsel %vm307_vm1, %v7271_v37, 0.0  ;;  %v4994_v60 = vpop.f32.mrb[229].mxu1 }
 0x3dd   : > { %v5553_v5 = vadd.f32 %v5552_v56, %v10546_v12  ;;  %v5518_v15 = vsel %vm307_vm1, %v4994_v60, 0.0  ;;  %v7272_v28 = vpop.f32.mrb[230].mxu1  ;;  %v7309_v34 = vpop.f32.mrb[8].mxu0  ;;  %v5571_v12 = vsel %vm307_vm1, %v7306_v43, 0.0 }
 0x3de   : > { %v5519_v57 = vadd.f32 %v5518_v15, %v10550_v11  ;;  %v5569_v7 = vsel %vm307_vm1, %v7272_v28, 0.0  ;;  %v4997_v22 = vpop.f32.mrb[231].mxu1  ;;  %v5177_v49 = vpop.f32.mrb[9].mxu0  ;;  %v5537_v11 = vsel %vm307_vm1, %v5164_v6, 0.0  ;;  %v5622_v58 = vsel %vm307_vm1, %v7309_v34, 0.0 }
 0x3df   : > { %v5570_v48 = vadd.f32 %v5569_v7, %v10553_v46  ;;  %v5535_v52 = vsel %vm307_vm1, %v4997_v22, 0.0  ;;  %v10706_v62 = vadd.f32 %v5554_v55, %v5553_v5  ;;  %v7310_v51 = vpop.f32.mrb[10].mxu0  ;;  %v5588_v43 = vsel %vm307_vm1, %v5177_v49, 0.0 }
 0x3e0   : > { %v5536_v8 = vadd.f32 %v5535_v52, %v10555_v44  ;;  %v10710_v0 = vadd.f32 %v5520_v41, %v5519_v57  ;;  %v5180_v47 = vpop.f32.mrb[11].mxu0 }
 0x3e1   : > { %v10713_v42 = vadd.f32 %v5571_v12, %v5570_v48 }
 0x3e2   : > { %v10715_v53 = vadd.f32 %v5537_v11, %v5536_v8 }
 0x3e3   : > { %v7275_v46 = vpop.f32.mrb[232].mxu1 }
 0x3e4   : > { %v5620_v17 = vsel %vm307_vm1, %v7275_v46, 0.0  ;;  %v5010_v61 = vpop.f32.mrb[233].mxu1 }
 0x3e5   : > { %v5621_v20 = vadd.f32 %v5620_v17, %v10566_v35  ;;  %v5586_v54 = vsel %vm307_vm1, %v5010_v61, 0.0  ;;  %v7276_v44 = vpop.f32.mrb[234].mxu1  ;;  %v7313_v56 = vpop.f32.mrb[12].mxu0  ;;  %v5639_v35 = vsel %vm307_vm1, %v7310_v51, 0.0 }
 0x3e6   : > { %v5587_v32 = vadd.f32 %v5586_v54, %v10570_v10  ;;  %v5637_v14 = vsel %vm307_vm1, %v7276_v44, 0.0  ;;  %v5013_v1 = vpop.f32.mrb[235].mxu1  ;;  %v5193_v15 = vpop.f32.mrb[13].mxu0  ;;  %v5605_v10 = vsel %vm307_vm1, %v5180_v47, 0.0  ;;  %v5690_v12 = vsel %vm307_vm1, %v7313_v56, 0.0 }
 0x3e7   : > { %v5638_v6 = vadd.f32 %v5637_v14, %v10573_v4  ;;  %v5603_v37 = vsel %vm307_vm1, %v5013_v1, 0.0  ;;  %v10726_v60 = vadd.f32 %v5622_v58, %v5621_v20  ;;  %v7314_v55 = vpop.f32.mrb[14].mxu0  ;;  %v5656_v51 = vsel %vm307_vm1, %v5193_v15, 0.0 }
 0x3e8   : > { %v5604_v5 = vadd.f32 %v5603_v37, %v10575_v30  ;;  %v10730_v28 = vadd.f32 %v5588_v43, %v5587_v32  ;;  %v5196_v7 = vpop.f32.mrb[15].mxu0 }
 0x3e9   : > { %v10733_v57 = vadd.f32 %v5639_v35, %v5638_v6 }
 0x3ea   : > { %v10735_v22 = vadd.f32 %v5605_v10, %v5604_v5 }
 0x3eb   : > { %v7279_v4 = vpop.f32.mrb[236].mxu1 }
 0x3ec   : > { %v5688_v41 = vsel %vm307_vm1, %v7279_v4, 0.0  ;;  %v5026_v48 = vpop.f32.mrb[237].mxu1 }
 0x3ed   : > { %v5689_v52 = vadd.f32 %v5688_v41, %v10586_v26  ;;  %v5654_v34 = vsel %vm307_vm1, %v5026_v48, 0.0  ;;  %v7280_v30 = vpop.f32.mrb[238].mxu1  ;;  %v7317_v17 = vpop.f32.mrb[16].mxu0  ;;  %v5707_v26 = vsel %vm307_vm1, %v7314_v55, 0.0 }
 0x3ee   : > { %v5655_v8 = vadd.f32 %v5654_v34, %v10590_v59  ;;  %v5705_v49 = vsel %vm307_vm1, %v7280_v30, 0.0  ;;  %v5029_v11 = vpop.f32.mrb[239].mxu1  ;;  %v5209_v54 = vpop.f32.mrb[17].mxu0  ;;  %v5673_v59 = vsel %vm307_vm1, %v5196_v7, 0.0  ;;  %v5758_v35 = vsel %vm307_vm1, %v7317_v17, 0.0 }
 0x3ef   : > { %v5706_v47 = vadd.f32 %v5705_v49, %v10593_v16  ;;  %v5671_v46 = vsel %vm307_vm1, %v5029_v11, 0.0  ;;  %v10746_v61 = vadd.f32 %v5690_v12, %v5689_v52  ;;  %v7318_v58 = vpop.f32.mrb[18].mxu0  ;;  %v5724_v55 = vsel %vm307_vm1, %v5209_v54, 0.0 }
 0x3f0   : > { %v5672_v20 = vadd.f32 %v5671_v46, %v10595_v31  ;;  %v10750_v44 = vadd.f32 %v5656_v51, %v5655_v8  ;;  %v5212_v14 = vpop.f32.mrb[19].mxu0 }
 0x3f1   : > { %v10753_v32 = vadd.f32 %v5707_v26, %v5706_v47 }
 0x3f2   : > { %v10755_v1 = vadd.f32 %v5673_v59, %v5672_v20 }
 0x3f3   : > { %v7283_v16 = vpop.f32.mrb[240].mxu1 }
 0x3f4   : > { %v5756_v43 = vsel %vm307_vm1, %v7283_v16, 0.0  ;;  %v5042_v6 = vpop.f32.mrb[241].mxu1 }
 0x3f5   : > { %v5757_v37 = vadd.f32 %v5756_v43, %v10606_v40  ;;  %v5722_v56 = vsel %vm307_vm1, %v5042_v6, 0.0  ;;  %v7284_v31 = vpop.f32.mrb[242].mxu1  ;;  %v7321_v41 = vpop.f32.mrb[20].mxu0  ;;  %v5775_v40 = vsel %vm307_vm1, %v7318_v58, 0.0 }
 0x3f6   : > { %v5723_v5 = vadd.f32 %v5722_v56, %v10610_v39  ;;  %v5773_v15 = vsel %vm307_vm1, %v7284_v31, 0.0  ;;  %v5045_v10 = vpop.f32.mrb[243].mxu1  ;;  %v5225_v34 = vpop.f32.mrb[21].mxu0  ;;  %v5741_v39 = vsel %vm307_vm1, %v5212_v14, 0.0  ;;  %v5826_v26 = vsel %vm307_vm1, %v7321_v41, 0.0 }
 0x3f7   : > { %v5774_v7 = vadd.f32 %v5773_v15, %v10613_v25  ;;  %v5739_v4 = vsel %vm307_vm1, %v5045_v10, 0.0  ;;  %v10766_v48 = vadd.f32 %v5758_v35, %v5757_v37  ;;  %v7322_v12 = vpop.f32.mrb[22].mxu0  ;;  %v5792_v58 = vsel %vm307_vm1, %v5225_v34, 0.0 }
 0x3f8   : > { %v5740_v52 = vadd.f32 %v5739_v4, %v10615_v45  ;;  %v10770_v30 = vadd.f32 %v5724_v55, %v5723_v5  ;;  %v5228_v49 = vpop.f32.mrb[23].mxu0 }
 0x3f9   : > { %v10773_v8 = vadd.f32 %v5775_v40, %v5774_v7 }
 0x3fa   : > { %v10775_v11 = vadd.f32 %v5741_v39, %v5740_v52 }
 0x3fb   : > { %v7287_v25 = vpop.f32.mrb[244].mxu1 }
 0x3fc   : > { %v5824_v51 = vsel %vm307_vm1, %v7287_v25, 0.0  ;;  %v5058_v47 = vpop.f32.mrb[245].mxu1 }
 0x3fd   : > { %v5825_v46 = vadd.f32 %v5824_v51, %v10626_v38  ;;  %v5790_v17 = vsel %vm307_vm1, %v5058_v47, 0.0  ;;  %v7288_v45 = vpop.f32.mrb[246].mxu1  ;;  %v7325_v43 = vpop.f32.mrb[24].mxu0  ;;  %v5843_v38 = vsel %vm307_vm1, %v7322_v12, 0.0 }
 0x3fe   : > { %v5791_v20 = vadd.f32 %v5790_v17, %v10630_v36  ;;  %v5841_v54 = vsel %vm307_vm1, %v7288_v45, 0.0  ;;  %v5061_v59 = vpop.f32.mrb[247].mxu1  ;;  %v5241_v56 = vpop.f32.mrb[25].mxu0  ;;  %v5809_v36 = vsel %vm307_vm1, %v5228_v49, 0.0  ;;  %v5894_v40 = vsel %vm307_vm1, %v7325_v43, 0.0 }
 0x3ff   : > { %v5842_v14 = vadd.f32 %v5841_v54, %v10633_v3  ;;  %v5807_v16 = vsel %vm307_vm1, %v5061_v59, 0.0  ;;  %v10786_v6 = vadd.f32 %v5826_v26, %v5825_v46  ;;  %v7326_v35 = vpop.f32.mrb[26].mxu0  ;;  %v5860_v12 = vsel %vm307_vm1, %v5241_v56, 0.0 }
 0x400   : > { %v5808_v37 = vadd.f32 %v5807_v16, %v10635_v29  ;;  %v10790_v31 = vadd.f32 %v5792_v58, %v5791_v20  ;;  %v5244_v15 = vpop.f32.mrb[27].mxu0 }
 0x401   : > { %v10793_v5 = vadd.f32 %v5843_v38, %v5842_v14 }
 0x402   : > { %v10795_v10 = vadd.f32 %v5809_v36, %v5808_v37 }
 0x403   : > { %v7291_v3 = vpop.f32.mrb[248].mxu1 }
 0x404   : > { %v5892_v55 = vsel %vm307_vm1, %v7291_v3, 0.0  ;;  %v5074_v7 = vpop.f32.mrb[249].mxu1 }
 0x405   : > { %v5893_v4 = vadd.f32 %v5892_v55, %v10646_v27  ;;  %v5858_v41 = vsel %vm307_vm1, %v5074_v7, 0.0  ;;  %v7292_v29 = vpop.f32.mrb[250].mxu1  ;;  %v7329_v51 = vpop.f32.mrb[28].mxu0  ;;  %v5911_v27 = vsel %vm307_vm1, %v7326_v35, 0.0 }
 0x406   : > { %v5859_v52 = vadd.f32 %v5858_v41, %v10650_v50  ;;  %v5909_v34 = vsel %vm307_vm1, %v7292_v29, 0.0  ;;  %v5077_v39 = vpop.f32.mrb[251].mxu1  ;;  %v5257_v17 = vpop.f32.mrb[29].mxu0  ;;  %v5877_v50 = vsel %vm307_vm1, %v5244_v15, 0.0  ;;  %v5962_v16 = vsel %vm307_vm1, %v7329_v51, 0.0 }
 0x407   : > { %v5910_v49 = vadd.f32 %v5909_v34, %v10653_v2  ;;  %v5875_v25 = vsel %vm307_vm1, %v5077_v39, 0.0  ;;  %v10806_v47 = vadd.f32 %v5894_v40, %v5893_v4  ;;  %v7330_v26 = vpop.f32.mrb[30].mxu0  ;;  %v5928_v37 = vsel %vm307_vm1, %v5257_v17, 0.0 }
 0x408   : > { %v5876_v46 = vadd.f32 %v5875_v25, %v10655_v18  ;;  %v10810_v45 = vadd.f32 %v5860_v12, %v5859_v52  ;;  %v5260_v54 = vpop.f32.mrb[31].mxu0  ;;  %v5979_v15 = vsel %vm307_vm1, %v7330_v26, 0.0 }
 0x409   : > { %v10813_v20 = vadd.f32 %v5911_v27, %v5910_v49 }
 0x40a   : > { %v10815_v59 = vadd.f32 %v5877_v50, %v5876_v46  ;;  %v7392_v50 = vld [vmem:[%s7671_s20 + $0x10] sm:$0xff] }
 0x40b   : > { %v7295_v2 = vpop.f32.mrb[252].mxu1 }
 0x40c   : > { %v5960_v58 = vsel %vm307_vm1, %v7295_v2, 0.0  ;;  %v5090_v14 = vpop.f32.mrb[253].mxu1 }
 0x40d   : > { %v5961_v43 = vadd.f32 %v5960_v58, %v10666_v21  ;;  %v5926_v18 = vsel %vm307_vm1, %v5090_v14, 0.0  ;;  %v7296_v38 = vpop.f32.mrb[254].mxu1  ;;  %v5945_v21 = vsel %vm307_vm1, %v5260_v54, 0.0  ;;  %v7393_v54 = vld [vmem:[%s7671_s20] sm:$0xff]  ;;  %v7394_v14 = vld [vmem:[%s7671_s20 + $0x18] sm:$0xff] }
 0x40e   : > { %v5927_v56 = vadd.f32 %v5926_v18, %v10670_v23  ;;  %v5977_v36 = vsel %vm307_vm1, %v7296_v38, 0.0  ;;  %v5093_v35 = vpop.f32.mrb[255].mxu1  ;;  %v7395_v18 = vld [vmem:[%s7671_s20 + $0x8] sm:$0xff] }
 0x40f   : > { %v5978_v3 = vadd.f32 %v5977_v36, %v10673_v9  ;;  %v10826_v55 = vadd.f32 %v5962_v16, %v5961_v43  ;;  %v5943_v7 = vsel %vm307_vm1, %v5093_v35, 0.0  ;;  %v10841_v9 = vld [vmem:[%s11051_s7] ss:$0 sm:$0xff] }
 0x410   : > { %v5944_v4 = vadd.f32 %v5943_v7, %v10675_v19  ;;  %v10831_v41 = vadd.f32 %v5928_v37, %v5927_v56 }
 0x411   : > { %v10833_v29 = vadd.f32 %v5979_v15, %v5978_v3 }
 0x412   : > { %v10835_v23 = vadd.f32 %v5945_v21, %v5944_v4 }
 0x413   : > { %v7335_v40 = vpop.f32.mrb[0].mxu1 }
 0x414   : > { %v5488_v52 = vsel %vm307_vm1, %v7335_v40, 0.0  ;;  %v5312_v34 = vpop.f32.mrb[1].mxu1 }
 0x415   : > { %v5489_v19 = vadd.f32 %v5488_v52, %v10686_v33  ;;  %v5454_v39 = vsel %vm307_vm1, %v5312_v34, 0.0  ;;  %v7336_v12 = vpop.f32.mrb[2].mxu1  ;;  %v7396_v34 = vld [vmem:[%s7671_s20 + $0x30] sm:$0xff] }
 0x416   : > { %v5455_v49 = vadd.f32 %v5454_v39, %v10690_v63  ;;  %v5505_v25 = vsel %vm307_vm1, %v7336_v12, 0.0  ;;  %v5315_v51 = vpop.f32.mrb[3].mxu1  ;;  %v7397_v39 = vld [vmem:[%s7671_s20 + $0x20] sm:$0xff] }
 0x417   : > { %v5992_v27 = vadd.f32 %v10841_v9, %v5489_v19  ;;  %v5506_v46 = vadd.f32 %v5505_v25, %v10693_v24  ;;  %v5471_v17 = vsel %vm307_vm1, %v5315_v51, 0.0  ;;  %v7398_v25 = vld [vmem:[%s7671_s20 + $0x38] sm:$0xff] }
 0x418   : > { %v5990_v33 = vadd.f32 %v10841_v9, %v5455_v49  ;;  %v5472_v63 = vadd.f32 %v5471_v17, %v10695_v13 }
 0x419   : > { %v6024_v26 = vadd.f32 %v7392_v50, %v5992_v27  ;;  %v5993_v24 = vadd.f32 %v10841_v9, %v5506_v46  ;;  %v7399_v27 = vld [vmem:[%s7671_s20 + $0x28] sm:$0xff] }
 0x41a   : > { %v6022_v2 = vadd.f32 %v7393_v54, %v5990_v33  ;;  %v5991_v58 = vadd.f32 %v10841_v9, %v5472_v63 }
 0x41b   : > { %6056 = vst.msk [vmem:[%s10855_s23 + $0x10] sm:$0xff] %vm307_vm1, %v6024_v26  ;;  %v6025_v16 = vadd.f32 %v7394_v14, %v5993_v24  ;;  %v7339_v43 = vpop.f32.mrb[4].mxu1 }
 0x41c   : > { %6054 = vst.msk [vmem:[%s10855_s23] sm:$0xff] %vm307_vm1, %v6022_v2  ;;  %v6023_v38 = vadd.f32 %v7395_v18, %v5991_v58  ;;  %v5556_v13 = vsel %vm307_vm1, %v7339_v43, 0.0  ;;  %v5328_v37 = vpop.f32.mrb[5].mxu1  ;;  %v7400_v43 = vld [vmem:[%s7671_s20 + $0x50] sm:$0xff] }
 0x41d   : > { %6057 = vst.msk [vmem:[%s10855_s23 + $0x18] sm:$0xff] %vm307_vm1, %v6025_v16  ;;  %v5557_v56 = vadd.f32 %v5556_v13, %v10706_v62  ;;  %v5522_v36 = vsel %vm307_vm1, %v5328_v37, 0.0  ;;  %v7340_v35 = vpop.f32.mrb[6].mxu1 }
 0x41e   : > { %6055 = vst.msk [vmem:[%s10855_s23 + $0x8] sm:$0xff] %vm307_vm1, %v6023_v38  ;;  %v5523_v15 = vadd.f32 %v5522_v36, %v10710_v0  ;;  %v5573_v3 = vsel %vm307_vm1, %v7340_v35, 0.0  ;;  %v5331_v7 = vpop.f32.mrb[7].mxu1  ;;  %v7401_v38 = vld [vmem:[%s7671_s20 + $0x40] sm:$0xff]  ;;  %v7403_v35 = vld [vmem:[%s7671_s20 + $0x48] sm:$0xff] }
 0x41f   : > { %v5996_v21 = vadd.f32 %v10841_v9, %v5557_v56  ;;  %v5574_v4 = vadd.f32 %v5573_v3, %v10713_v42  ;;  %v5539_v62 = vsel %vm307_vm1, %v5331_v7, 0.0  ;;  %v7402_v56 = vld [vmem:[%s7671_s20 + $0x58] sm:$0xff] }
 0x420   : > { %v5994_v40 = vadd.f32 %v10841_v9, %v5523_v15  ;;  %v5540_v52 = vadd.f32 %v5539_v62, %v10715_v53 }
 0x421   : > { %v6028_v19 = vadd.f32 %v7396_v34, %v5996_v21  ;;  %v5997_v0 = vadd.f32 %v10841_v9, %v5574_v4 }
 0x422   : > { %v6026_v12 = vadd.f32 %v7397_v39, %v5994_v40  ;;  %v5995_v49 = vadd.f32 %v10841_v9, %v5540_v52 }
 0x423   : > { %6060 = vst.msk [vmem:[%s10855_s23 + $0x30] sm:$0xff] %vm307_vm1, %v6028_v19  ;;  %v6029_v42 = vadd.f32 %v7398_v25, %v5997_v0  ;;  %v7343_v51 = vpop.f32.mrb[8].mxu1  ;;  %v7405_v25 = vld [vmem:[%s7671_s20 + $0x60] sm:$0xff] }
 0x424   : > { %6058 = vst.msk [vmem:[%s10855_s23 + $0x20] sm:$0xff] %vm307_vm1, %v6026_v12  ;;  %v6027_v46 = vadd.f32 %v7399_v27, %v5995_v49  ;;  %v5624_v53 = vsel %vm307_vm1, %v7343_v51, 0.0  ;;  %v5344_v17 = vpop.f32.mrb[9].mxu1  ;;  %v7404_v12 = vld [vmem:[%s7671_s20 + $0x70] sm:$0xff]  ;;  %v7406_v27 = vld [vmem:[%s7671_s20 + $0x78] sm:$0xff] }
 0x425   : > { %6061 = vst.msk [vmem:[%s10855_s23 + $0x38] sm:$0xff] %vm307_vm1, %v6029_v42  ;;  %v5625_v33 = vadd.f32 %v5624_v53, %v10726_v60  ;;  %v5590_v63 = vsel %vm307_vm1, %v5344_v17, 0.0  ;;  %v7344_v50 = vpop.f32.mrb[10].mxu1  ;;  %v7407_v53 = vld [vmem:[%s7671_s20 + $0x68] sm:$0xff] }
 0x426   : > { %6059 = vst.msk [vmem:[%s10855_s23 + $0x28] sm:$0xff] %vm307_vm1, %v6027_v46  ;;  %v5591_v26 = vadd.f32 %v5590_v63, %v10730_v28  ;;  %v5641_v24 = vsel %vm307_vm1, %v7344_v50, 0.0  ;;  %v5347_v54 = vpop.f32.mrb[11].mxu1 }
 0x427   : > { %v6000_v2 = vadd.f32 %v10841_v9, %v5625_v33  ;;  %v5642_v58 = vadd.f32 %v5641_v24, %v10733_v57  ;;  %v5607_v60 = vsel %vm307_vm1, %v5347_v54, 0.0 }
 0x428   : > { %v5998_v14 = vadd.f32 %v10841_v9, %v5591_v26  ;;  %v5608_v16 = vadd.f32 %v5607_v60, %v10735_v22 }
 0x429   : > { %v6032_v18 = vadd.f32 %v7400_v43, %v6000_v2  ;;  %v6001_v28 = vadd.f32 %v10841_v9, %v5642_v58  ;;  %v7408_v43 = vld [vmem:[%s7671_s20 + $0x90] sm:$0xff] }
 0x42a   : > { %v6030_v13 = vadd.f32 %v7401_v38, %v5998_v14  ;;  %v5999_v37 = vadd.f32 %v10841_v9, %v5608_v16 }
 0x42b   : > { %6064 = vst.msk [vmem:[%s10855_s23 + $0x50] sm:$0xff] %vm307_vm1, %v6032_v18  ;;  %v6033_v57 = vadd.f32 %v7402_v56, %v6001_v28  ;;  %v7347_v36 = vpop.f32.mrb[12].mxu1  ;;  %v7409_v28 = vld [vmem:[%s7671_s20 + $0x80] sm:$0xff] }
 0x42c   : > { %6062 = vst.msk [vmem:[%s10855_s23 + $0x40] sm:$0xff] %vm307_vm1, %v6030_v13  ;;  %v6031_v15 = vadd.f32 %v7403_v35, %v5999_v37  ;;  %v5692_v22 = vsel %vm307_vm1, %v7347_v36, 0.0  ;;  %v5360_v3 = vpop.f32.mrb[13].mxu1  ;;  %v7410_v37 = vld [vmem:[%s7671_s20 + $0x98] sm:$0xff] }
 0x42d   : > { %6065 = vst.msk [vmem:[%s10855_s23 + $0x58] sm:$0xff] %vm307_vm1, %v6033_v57  ;;  %v5693_v7 = vadd.f32 %v5692_v22, %v10746_v61  ;;  %v5658_v21 = vsel %vm307_vm1, %v5360_v3, 0.0  ;;  %v7348_v4 = vpop.f32.mrb[14].mxu1  ;;  %v7411_v57 = vld [vmem:[%s7671_s20 + $0x88] sm:$0xff] }
 0x42e   : > { %6063 = vst.msk [vmem:[%s10855_s23 + $0x48] sm:$0xff] %vm307_vm1, %v6031_v15  ;;  %v5659_v62 = vadd.f32 %v5658_v21, %v10750_v44  ;;  %v5709_v40 = vsel %vm307_vm1, %v7348_v4, 0.0  ;;  %v5363_v52 = vpop.f32.mrb[15].mxu1 }
 0x42f   : > { %v6004_v34 = vadd.f32 %v10841_v9, %v5693_v7  ;;  %v5710_v19 = vadd.f32 %v5709_v40, %v10753_v32  ;;  %v5675_v61 = vsel %vm307_vm1, %v5363_v52, 0.0 }
 0x430   : > { %v6002_v0 = vadd.f32 %v10841_v9, %v5659_v62  ;;  %v5676_v39 = vadd.f32 %v5675_v61, %v10755_v1 }
 0x431   : > { %v6036_v49 = vadd.f32 %v7404_v12, %v6004_v34  ;;  %v6005_v44 = vadd.f32 %v10841_v9, %v5710_v19  ;;  %v7412_v19 = vld [vmem:[%s7671_s20 + $0xb0] sm:$0xff] }
 0x432   : > { %v6034_v42 = vadd.f32 %v7405_v25, %v6002_v0  ;;  %v6003_v51 = vadd.f32 %v10841_v9, %v5676_v39  ;;  %v7413_v0 = vld [vmem:[%s7671_s20 + $0xa0] sm:$0xff]  ;;  %v7415_v25 = vld [vmem:[%s7671_s20 + $0xa8] sm:$0xff] }
 0x433   : > { %6068 = vst.msk [vmem:[%s10855_s23 + $0x70] sm:$0xff] %vm307_vm1, %v6036_v49  ;;  %v6037_v32 = vadd.f32 %v7406_v27, %v6005_v44  ;;  %v7351_v46 = vpop.f32.mrb[16].mxu1  ;;  %v7414_v49 = vld [vmem:[%s7671_s20 + $0xb8] sm:$0xff] }
 0x434   : > { %6066 = vst.msk [vmem:[%s10855_s23 + $0x60] sm:$0xff] %vm307_vm1, %v6034_v42  ;;  %v6035_v17 = vadd.f32 %v7407_v53, %v6003_v51  ;;  %v5760_v1 = vsel %vm307_vm1, %v7351_v46, 0.0  ;;  %v5376_v33 = vpop.f32.mrb[17].mxu1 }
 0x435   : > { %6069 = vst.msk [vmem:[%s10855_s23 + $0x78] sm:$0xff] %vm307_vm1, %v6037_v32  ;;  %v5761_v63 = vadd.f32 %v5760_v1, %v10766_v48  ;;  %v5726_v50 = vsel %vm307_vm1, %v5376_v33, 0.0  ;;  %v7352_v26 = vpop.f32.mrb[18].mxu1 }
 0x436   : > { %6067 = vst.msk [vmem:[%s10855_s23 + $0x68] sm:$0xff] %vm307_vm1, %v6035_v17  ;;  %v5727_v24 = vadd.f32 %v5726_v50, %v10770_v30  ;;  %v5777_v54 = vsel %vm307_vm1, %v7352_v26, 0.0  ;;  %v5379_v2 = vpop.f32.mrb[19].mxu1 }
 0x437   : > { %v6008_v58 = vadd.f32 %v10841_v9, %v5761_v63  ;;  %v5778_v60 = vadd.f32 %v5777_v54, %v10773_v8  ;;  %v5743_v48 = vsel %vm307_vm1, %v5379_v2, 0.0  ;;  %v7417_v2 = vld [vmem:[%s7671_s20 + $0xc0] sm:$0xff] }
 0x438   : > { %v6006_v14 = vadd.f32 %v10841_v9, %v5727_v24  ;;  %v5744_v16 = vadd.f32 %v5743_v48, %v10775_v11  ;;  %v7416_v24 = vld [vmem:[%s7671_s20 + $0xd0] sm:$0xff]  ;;  %v7418_v48 = vld [vmem:[%s7671_s20 + $0xd8] sm:$0xff] }
 0x439   : > { %v6040_v18 = vadd.f32 %v7408_v43, %v6008_v58  ;;  %v6009_v30 = vadd.f32 %v10841_v9, %v5778_v60 }
 0x43a   : > { %v6038_v38 = vadd.f32 %v7409_v28, %v6006_v14  ;;  %v6007_v13 = vadd.f32 %v10841_v9, %v5744_v16  ;;  %v7419_v16 = vld [vmem:[%s7671_s20 + $0xc8] sm:$0xff] }
 0x43b   : > { %6072 = vst.msk [vmem:[%s10855_s23 + $0x90] sm:$0xff] %vm307_vm1, %v6040_v18  ;;  %v6041_v8 = vadd.f32 %v7410_v37, %v6009_v30  ;;  %v7355_v56 = vpop.f32.mrb[20].mxu1 }
 0x43c   : > { %6070 = vst.msk [vmem:[%s10855_s23 + $0x80] sm:$0xff] %vm307_vm1, %v6038_v38  ;;  %v6039_v36 = vadd.f32 %v7411_v57, %v6007_v13  ;;  %v5828_v11 = vsel %vm307_vm1, %v7355_v56, 0.0  ;;  %v5392_v35 = vpop.f32.mrb[21].mxu1 }
 0x43d   : > { %6073 = vst.msk [vmem:[%s10855_s23 + $0x98] sm:$0xff] %vm307_vm1, %v6041_v8  ;;  %v5829_v15 = vadd.f32 %v5828_v11, %v10786_v6  ;;  %v5794_v22 = vsel %vm307_vm1, %v5392_v35, 0.0  ;;  %v7356_v3 = vpop.f32.mrb[22].mxu1  ;;  %v7420_v35 = vld [vmem:[%s7671_s20 + $0xf0] sm:$0xff] }
 0x43e   : > { %6071 = vst.msk [vmem:[%s10855_s23 + $0x88] sm:$0xff] %vm307_vm1, %v6039_v36  ;;  %v5795_v7 = vadd.f32 %v5794_v22, %v10790_v31  ;;  %v5845_v21 = vsel %vm307_vm1, %v7356_v3, 0.0  ;;  %v5395_v4 = vpop.f32.mrb[23].mxu1  ;;  %v7421_v22 = vld [vmem:[%s7671_s20 + $0xe0] sm:$0xff] }
 0x43f   : > { %v6012_v62 = vadd.f32 %v10841_v9, %v5829_v15  ;;  %v5846_v40 = vadd.f32 %v5845_v21, %v10793_v5  ;;  %v5811_v6 = vsel %vm307_vm1, %v5395_v4, 0.0  ;;  %v7422_v21 = vld [vmem:[%s7671_s20 + $0xf8] sm:$0xff]  ;;  %v7423_v4 = vld [vmem:[%s7671_s20 + $0xe8] sm:$0xff] }
 0x440   : > { %v6010_v52 = vadd.f32 %v10841_v9, %v5795_v7  ;;  %v5812_v34 = vadd.f32 %v5811_v6, %v10795_v10 }
 0x441   : > { %v6044_v61 = vadd.f32 %v7412_v19, %v6012_v62  ;;  %v6013_v31 = vadd.f32 %v10841_v9, %v5846_v40 }
 0x442   : > { %v6042_v39 = vadd.f32 %v7413_v0, %v6010_v52  ;;  %v6011_v12 = vadd.f32 %v10841_v9, %v5812_v34 }
 0x443   : > { %6076 = vst.msk [vmem:[%s10855_s23 + $0xb0] sm:$0xff] %vm307_vm1, %v6044_v61  ;;  %v6045_v5 = vadd.f32 %v7414_v49, %v6013_v31  ;;  %v7359_v44 = vpop.f32.mrb[24].mxu1 }
 0x444   : > { %6074 = vst.msk [vmem:[%s10855_s23 + $0xa0] sm:$0xff] %vm307_vm1, %v6042_v39  ;;  %v6043_v42 = vadd.f32 %v7415_v25, %v6011_v12  ;;  %v5896_v10 = vsel %vm307_vm1, %v7359_v44, 0.0  ;;  %v5408_v51 = vpop.f32.mrb[25].mxu1 }
 0x445   : > { %6077 = vst.msk [vmem:[%s10855_s23 + $0xb8] sm:$0xff] %vm307_vm1, %v6045_v5  ;;  %v5897_v27 = vadd.f32 %v5896_v10, %v10806_v47  ;;  %v5862_v32 = vsel %vm307_vm1, %v5408_v51, 0.0  ;;  %v7360_v46 = vpop.f32.mrb[26].mxu1 }
 0x446   : > { %6075 = vst.msk [vmem:[%s10855_s23 + $0xa8] sm:$0xff] %vm307_vm1, %v6043_v42  ;;  %v5863_v53 = vadd.f32 %v5862_v32, %v10810_v45  ;;  %v5913_v17 = vsel %vm307_vm1, %v7360_v46, 0.0  ;;  %v5411_v1 = vpop.f32.mrb[27].mxu1 }
 0x447   : > { %v6016_v33 = vadd.f32 %v10841_v9, %v5897_v27  ;;  %v5914_v63 = vadd.f32 %v5913_v17, %v10813_v20  ;;  %v5879_v47 = vsel %vm307_vm1, %v5411_v1, 0.0 }
 0x448   : > { %v6014_v50 = vadd.f32 %v10841_v9, %v5863_v53  ;;  %v5880_v26 = vadd.f32 %v5879_v47, %v10815_v59 }
 0x449   : > { %v6048_v54 = vadd.f32 %v7416_v24, %v6016_v33  ;;  %v6017_v45 = vadd.f32 %v10841_v9, %v5914_v63 }
 0x44a   : > { %v6046_v58 = vadd.f32 %v7417_v2, %v6014_v50  ;;  %v6015_v60 = vadd.f32 %v10841_v9, %v5880_v26 }
 0x44b   : > { %6080 = vst.msk [vmem:[%s10855_s23 + $0xd0] sm:$0xff] %vm307_vm1, %v6048_v54  ;;  %v6049_v20 = vadd.f32 %v7418_v48, %v6017_v45  ;;  %v7363_v14 = vpop.f32.mrb[28].mxu1 }
 0x44c   : > { %6078 = vst.msk [vmem:[%s10855_s23 + $0xc0] sm:$0xff] %vm307_vm1, %v6046_v58  ;;  %v6047_v43 = vadd.f32 %v7419_v16, %v6015_v60  ;;  %v5964_v59 = vsel %vm307_vm1, %v7363_v14, 0.0  ;;  %v5424_v18 = vpop.f32.mrb[29].mxu1 }
 0x44d   : > { %6081 = vst.msk [vmem:[%s10855_s23 + $0xd8] sm:$0xff] %vm307_vm1, %v6049_v20  ;;  %v5965_v30 = vadd.f32 %v5964_v59, %v10826_v55  ;;  %v5930_v28 = vsel %vm307_vm1, %v5424_v18, 0.0  ;;  %v7364_v38 = vpop.f32.mrb[30].mxu1 }
 0x44e   : > { %6079 = vst.msk [vmem:[%s10855_s23 + $0xc8] sm:$0xff] %vm307_vm1, %v6047_v43  ;;  %v5931_v13 = vadd.f32 %v5930_v28, %v10831_v41  ;;  %v5981_v37 = vsel %vm307_vm1, %v7364_v38, 0.0  ;;  %v5427_v8 = vpop.f32.mrb[31].mxu1 }
 0x44f   : > { %v6020_v56 = vadd.f32 %v10841_v9, %v5965_v30  ;;  %v5982_v57 = vadd.f32 %v5981_v37, %v10833_v29  ;;  %v5947_v55 = vsel %vm307_vm1, %v5427_v8, 0.0 }
 0x450   : > { %v6018_v36 = vadd.f32 %v10841_v9, %v5931_v13  ;;  %v5948_v11 = vadd.f32 %v5947_v55, %v10835_v23 }
 0x451   : > { %v6052_v15 = vadd.f32 %v7420_v35, %v6020_v56  ;;  %v6021_v41 = vadd.f32 %v10841_v9, %v5982_v57 }
 0x452   : > { %v6050_v3 = vadd.f32 %v7421_v22, %v6018_v36  ;;  %v6019_v7 = vadd.f32 %v10841_v9, %v5948_v11 }
 0x453   : > { %6084 = vst.msk [vmem:[%s10855_s23 + $0xf0] sm:$0xff] %vm307_vm1, %v6052_v15  ;;  %v6053_v29 = vadd.f32 %v7422_v21, %v6021_v41 }
 0x454   : > { %6082 = vst.msk [vmem:[%s10855_s23 + $0xe0] sm:$0xff] %vm307_vm1, %v6050_v3  ;;  %v6051_v62 = vadd.f32 %v7423_v4, %v6019_v7 }
 0x455   : > { %6085 = vst.msk [vmem:[%s10855_s23 + $0xf8] sm:$0xff] %vm307_vm1, %v6053_v29 }
 0x456   : > { %6083 = vst.msk [vmem:[%s10855_s23 + $0xe8] sm:$0xff] %vm307_vm1, %v6051_v62 }
 0x457 PF: > { %s18_s27 = sadd.s32 1, %s7430_s27  }
 0x458   : > { %p15_p4 = scmp.ge.s32.totalorder %s18_s27, 4  }
 0x45a   :  { %17 = sbr.rel (!%p15_p4) target bundleno = 1 (0x1), region = 83 }

</bundles_post_ra>
